<compile_context>
chip_gen: v7x
topology: tpu7x:2x2x1
jax: 0.10.0
libtpu: 0.0.40
codegen_flags: <defaults>
</compile_context>

<pallas_src>
import functools

import jax
import jax.numpy as jnp
from jax import lax
from jax.experimental import pallas as pl
from jax.experimental.pallas import tpu as pltpu


ROW_TILE = 128   # destination-row tile (sublane-aligned)
LANE = 128       # lane width for padding


# ---------------------------------------------------------------------------
# helpers
# ---------------------------------------------------------------------------

def _round_up(v, m):
    return ((v + m - 1) // m) * m


def _pad2d(a, rows, cols):
    r, c = a.shape
    if r == rows and c == cols:
        return a
    return jnp.pad(a, ((0, rows - r), (0, cols - c)))


def _apply_act(y, act):
    if act == "relu":
        return jnp.maximum(y, 0.0)
    if act == "elu":  # F.elu, alpha=1.0
        return jnp.where(y > 0, y, jnp.exp(jnp.minimum(y, 0.0)) - 1.0)
    return y


# ---------------------------------------------------------------------------
# Linear kernel: y = act(x @ w [+ b]); full K resident, row-tiled grid
# ---------------------------------------------------------------------------

def _make_linear_kernel(act, has_bias):
    def kernel(*refs):
        if has_bias:
            x_ref, w_ref, b_ref, o_ref = refs
        else:
            x_ref, w_ref, o_ref = refs
            b_ref = None
        y = jnp.dot(x_ref[...].astype(jnp.bfloat16),
                    w_ref[...].astype(jnp.bfloat16),
                    preferred_element_type=jnp.float32)
        if b_ref is not None:
            y = y + b_ref[...]                       # (1, Nout) broadcasts
        o_ref[...] = _apply_act(y, act).astype(o_ref.dtype)
    return kernel


def linear(x, w, bias=None, act="none", tm=ROW_TILE):
    m, k = x.shape
    k2, n_out = w.shape
    assert k == k2 and m % tm == 0
    in_specs = [
        pl.BlockSpec((tm, k), lambda i: (i, 0)),
        pl.BlockSpec((k, n_out), lambda i: (0, 0)),
    ]
    args = [x, w]
    if bias is not None:
        in_specs.append(pl.BlockSpec((1, n_out), lambda i: (0, 0)))
        args.append(bias.reshape(1, n_out).astype(jnp.float32))
    return pl.pallas_call(
        _make_linear_kernel(act, bias is not None),
        out_shape=jax.ShapeDtypeStruct((m, n_out), jnp.float32),
        grid_spec=pltpu.PrefetchScalarGridSpec(
            num_scalar_prefetch=0,
            grid=(m // tm,),
            in_specs=in_specs,
            out_specs=pl.BlockSpec((tm, n_out), lambda i: (i, 0)),
        ),
        compiler_params=pltpu.CompilerParams(
            dimension_semantics=("parallel",)),
    )(*args)


# ---------------------------------------------------------------------------
# GAT attention kernel: grid = (heads, dst-row tiles), heads = column blocks
# ---------------------------------------------------------------------------

def _make_gat_head_kernel(act, negative_slope):
    def kernel(xq_ref, xs_ref, asrc_ref, adst_ref, adj_ref, b_ref, o_ref):
        xq = xq_ref[...]                              # (tq, C) f32 dst features
        xs = xs_ref[...]                              # (N,  C) f32 all sources
        mask = adj_ref[...] != 0                      # (tq, N) from int8

        # Attention scores, kept in f32 (cheap; matters on v5e's f32-only VPU).
        s_dst = jnp.sum(xq * adst_ref[...], axis=1, keepdims=True)        # (tq, 1)
        s_src = lax.dot_general(asrc_ref[...], xs, (((1,), (1,)), ((), ())),
                                preferred_element_type=jnp.float32)        # (1, N)

        e = s_dst + s_src                                                  # (tq, N)
        e = jnp.where(e > 0, e, negative_slope * e)                        # LeakyReLU(0.2)
        e = jnp.where(mask, e, jnp.float32(-1e30))                         # mask non-edges

        # Masked softmax: self-loops keep every row max finite, so exp(e - m)
        # underflows to exactly 0 on masked entries — no second select.
        m = jnp.max(e, axis=1, keepdims=True)                              # (tq, 1)
        p = jnp.exp(e - m)                                                 # (tq, N)
        denom = jnp.sum(p, axis=1, keepdims=True)                          # (tq, 1)

        # Aggregate with the UNnormalized weights (bf16 MXU, f32 acc), then
        # normalize the (tq, C) result: N*C multiplies instead of N*N, and the
        # reciprocal rides the EUP slot.
        agg = jnp.dot(p.astype(jnp.bfloat16), xs.astype(jnp.bfloat16),
                      preferred_element_type=jnp.float32)                  # (tq, C)
        y = agg * pl.reciprocal(denom, approx=True) + b_ref[...]
        o_ref[...] = _apply_act(y, act).astype(o_ref.dtype)

    return kernel


def gat_attention(xh, adj, a_src, a_dst, bias, heads, ch, act, tq=ROW_TILE):
    """xh: (N_pad, heads*ch); adj: (N_pad, N_pad) int8; a_*/bias: (1, heads*ch)."""
    n_pad, hc = xh.shape
    assert hc == heads * ch and n_pad % tq == 0 and ch % LANE == 0
    nq = n_pad // tq
    return pl.pallas_call(
        _make_gat_head_kernel(act=act, negative_slope=0.2),
        out_shape=jax.ShapeDtypeStruct((n_pad, hc), jnp.float32),
        grid_spec=pltpu.PrefetchScalarGridSpec(
            num_scalar_prefetch=0,
            grid=(heads, nq),
            in_specs=[
                pl.BlockSpec((tq, ch), lambda hh, qi: (qi, hh)),     # dst-row features
                pl.BlockSpec((n_pad, ch), lambda hh, qi: (0, hh)),   # all-source features
                pl.BlockSpec((1, ch), lambda hh, qi: (0, hh)),       # a_src
                pl.BlockSpec((1, ch), lambda hh, qi: (0, hh)),       # a_dst
                pl.BlockSpec((tq, n_pad), lambda hh, qi: (qi, 0)),   # int8 adjacency rows
                pl.BlockSpec((1, ch), lambda hh, qi: (0, hh)),       # layer bias
            ],
            out_specs=pl.BlockSpec((tq, ch), lambda hh, qi: (qi, hh)),
        ),
        compiler_params=pltpu.CompilerParams(
            dimension_semantics=("parallel", "parallel")),
    )(xh, xh, a_src, a_dst, adj, bias)


# ---------------------------------------------------------------------------
# Fused MLP head: relu(h @ W3 + b3) @ W4 + b4, lane-padded output
# ---------------------------------------------------------------------------

def _mlp_kernel(h_ref, w3_ref, b3_ref, w4_ref, b4_ref, o_ref):
    z = jnp.dot(h_ref[...].astype(jnp.bfloat16), w3_ref[...].astype(jnp.bfloat16),
                preferred_element_type=jnp.float32) + b3_ref[...]
    z = jnp.maximum(z, 0.0)
    o = jnp.dot(z.astype(jnp.bfloat16), w4_ref[...].astype(jnp.bfloat16),
                preferred_element_type=jnp.float32) + b4_ref[...]
    o_ref[...] = o.astype(o_ref.dtype)


def mlp_head(h, w3, b3, w4, b4, tm=ROW_TILE):
    m, c = h.shape
    mh = w3.shape[1]
    no = w4.shape[1]
    assert m % tm == 0
    return pl.pallas_call(
        _mlp_kernel,
        out_shape=jax.ShapeDtypeStruct((m, no), jnp.float32),
        grid_spec=pltpu.PrefetchScalarGridSpec(
            num_scalar_prefetch=0,
            grid=(m // tm,),
            in_specs=[
                pl.BlockSpec((tm, c), lambda i: (i, 0)),
                pl.BlockSpec((c, mh), lambda i: (0, 0)),
                pl.BlockSpec((1, mh), lambda i: (0, 0)),
                pl.BlockSpec((mh, no), lambda i: (0, 0)),
                pl.BlockSpec((1, no), lambda i: (0, 0)),
            ],
            out_specs=pl.BlockSpec((tm, no), lambda i: (i, 0)),
        ),
        compiler_params=pltpu.CompilerParams(
            dimension_semantics=("parallel",)),
    )(h, w3, b3, w4, b4)


# ---------------------------------------------------------------------------
# Full GATClassifier forward
# ---------------------------------------------------------------------------

def _dense_adj(edge_index, n_pad):
    # adj[i, j] = 1 iff edge j -> i exists (edge_index[0]=src, [1]=dst), + self loops
    # (self loops also on padded rows so padded softmax rows stay well defined).
    # TODO(synk): duplicate (multigraph) edges collapse to one in the dense mask,
    # unlike PyG's edge-list softmax.
    src, dst = edge_index[0], edge_index[1]
    adj = jnp.zeros((n_pad, n_pad), jnp.int8)
    adj = adj.at[dst, src].set(1)
    idx = jnp.arange(n_pad)
    adj = adj.at[idx, idx].set(1)
    return adj


def gat_classifier_forward(x, edge_index, params, heads, hidden, out_dim):
    # TODO(synk): training-mode dropout (p=0.6 on features and attention) is
    # identity at inference and intentionally not implemented.
    n, in_dim = x.shape
    assert hidden % LANE == 0
    n_pad = _round_up(n, ROW_TILE)
    k_pad = _round_up(in_dim, LANE)

    x_p = _pad2d(x.astype(jnp.float32), n_pad, k_pad)
    w1_p = _pad2d(params["W1"], k_pad, heads * hidden)
    adj = _dense_adj(edge_index, n_pad)                          # int8, padded

    # ---- GAT layer 1: heads=H, concat=True, fused ELU ----
    x1 = linear(x_p, w1_p)                                       # (n_pad, H*C)
    h1 = gat_attention(
        x1, adj,
        params["a1_src"].reshape(1, heads * hidden),
        params["a1_dst"].reshape(1, heads * hidden),
        params["b1"].reshape(1, heads * hidden),
        heads, hidden, act="elu")                                # (n_pad, H*C)

    # ---- GAT layer 2: 1 head, concat=False (mean of 1 head = identity),
    #      fused ReLU (= first MLP op) ----
    x2 = linear(h1, params["W2"])                                # (n_pad, C)
    h2 = gat_attention(
        x2, adj,
        params["a2_src"].reshape(1, hidden),
        params["a2_dst"].reshape(1, hidden),
        params["b2"].reshape(1, hidden),
        1, hidden, act="relu")                                   # (n_pad, C)

    # ---- fused MLP: Linear(C, 64) + ReLU + Linear(64, out_dim), lane-padded ----
    mh_pad = _round_up(params["W3"].shape[1], LANE)
    no_pad = _round_up(out_dim, LANE)
    w3_p = _pad2d(params["W3"], hidden, mh_pad)
    b3_p = _pad2d(params["b3"].reshape(1, -1), 1, mh_pad)
    w4_p = _pad2d(params["W4"], mh_pad, no_pad)
    b4_p = _pad2d(params["b4"].reshape(1, -1), 1, no_pad)
    out = mlp_head(h2, w3_p, b3_p, w4_p, b4_p)                   # (n_pad, no_pad)
    return out[:n, :out_dim]


# ---------------------------------------------------------------------------
# Pure-JAX reference (for correctness check)
# ---------------------------------------------------------------------------

_HI = jax.lax.Precision.HIGHEST


def _gat_conv_ref(x, adj, w, a_src, a_dst, bias, heads, out_c, concat,
                  negative_slope=0.2):
    n = x.shape[0]
    xp = jnp.dot(x, w, precision=_HI).reshape(n, heads, out_c)        # (N, H, C)
    s_src = jnp.einsum("nhc,hc->hn", xp, a_src, precision=_HI)        # (H, N)
    s_dst = jnp.einsum("nhc,hc->hn", xp, a_dst, precision=_HI)        # (H, N)
    e = s_dst[:, :, None] + s_src[:, None, :]                         # (H, N, N)
    e = jnp.where(e > 0, e, negative_slope * e)
    e = jnp.where(adj[None] > 0, e, -1e30)
    e = e - jnp.max(e, axis=-1, keepdims=True)
    p = jnp.where(adj[None] > 0, jnp.exp(e), 0.0)
    att = p / jnp.sum(p, axis=-1, keepdims=True)
    out = jnp.einsum("hij,jhc->ihc", att, xp, precision=_HI)          # (N, H, C)
    out = out.reshape(n, heads * out_c) if concat else out.mean(axis=1)
    return out + bias


def _ref_forward(x, adj, p, heads, hidden):
    h = _gat_conv_ref(x, adj, p["W1"], p["a1_src"], p["a1_dst"], p["b1"],
                      heads, hidden, True)
    h = jax.nn.elu(h)
    h = _gat_conv_ref(h, adj, p["W2"], p["a2_src"], p["a2_dst"], p["b2"],
                      1, hidden, False)
    h = jax.nn.relu(h)
    h = jax.nn.relu(jnp.dot(h, p["W3"], precision=_HI) + p["b3"])
    return jnp.dot(h, p["W4"], precision=_HI) + p["b4"]


# ---------------------------------------------------------------------------
# main
# ---------------------------------------------------------------------------

def _init_params(key, in_dim, hidden, heads, mlp_hidden, out_dim):
    ks = jax.random.split(key, 12)

    def g(k, shape, scale=0.1):
        return scale * jax.random.normal(k, shape, jnp.float32)

    return dict(
        W1=g(ks[0], (in_dim, heads * hidden)),
        a1_src=g(ks[1], (heads, hidden)),
        a1_dst=g(ks[2], (heads, hidden)),
        b1=g(ks[3], (heads * hidden,)),
        W2=g(ks[4], (heads * hidden, hidden)),
        a2_src=g(ks[5], (1, hidden)),
        a2_dst=g(ks[6], (1, hidden)),
        b2=g(ks[7], (hidden,)),
        W3=g(ks[8], (hidden, mlp_hidden)),
        b3=g(ks[9], (mlp_hidden,)),
        W4=g(ks[10], (mlp_hidden, out_dim)),
        b4=g(ks[11], (out_dim,)),
    )


if __name__ == "__main__":
    # Small graph; in_dim matches the module default (521) to exercise the
    # non-128-aligned K / N padding path.
    N_NODES, N_EDGES = 200, 800
    IN_DIM, HIDDEN, HEADS, MLP_HIDDEN, OUT_DIM = 521, 128, 4, 64, 4

    key = jax.random.PRNGKey(0)
    kx, ke1, ke2, kp = jax.random.split(key, 4)
    x = jax.random.normal(kx, (N_NODES, IN_DIM), jnp.float32)
    src = jax.random.randint(ke1, (N_EDGES,), 0, N_NODES, dtype=jnp.int32)
    dst = jax.random.randint(ke2, (N_EDGES,), 0, N_NODES, dtype=jnp.int32)
    edge_index = jnp.stack([src, dst], axis=0)

    params = _init_params(kp, IN_DIM, HIDDEN, HEADS, MLP_HIDDEN, OUT_DIM)

    fwd = jax.jit(functools.partial(gat_classifier_forward,
                                    heads=HEADS, hidden=HIDDEN, out_dim=OUT_DIM))
    out = jax.block_until_ready(fwd(x, edge_index, params))

    adj_ref = _dense_adj(edge_index, N_NODES)
    ref = _ref_forward(x, adj_ref, params, HEADS, HIDDEN)

    assert out.shape == (N_NODES, OUT_DIM)
    assert bool(jnp.isfinite(out).all())
    scale = float(jnp.maximum(jnp.max(jnp.abs(ref)), 1.0))
    err = float(jnp.max(jnp.abs(out - ref)))
    assert err < 5e-2 * scale, (err, scale)

    print("KERNEL_OK")
</pallas_src>

<mosaic_0001>
module attributes {stable_mosaic.version = 11 : i64} {
  func.func @kernel(%arg0: i32, %arg1: memref<128x640xf32, #tpu.memory_space<vmem>>, %arg2: memref<640x512xf32, #tpu.memory_space<vmem>>, %arg3: memref<128x512xf32, #tpu.memory_space<vmem>>) attributes {dimension_semantics = [#tpu.dimension_semantics<parallel>], iteration_bounds = array<i64: 2>, scalar_prefetch = 0 : i64, scratch_operands = 0 : i64, tpu.core_type = #tpu.core_type<tc>, window_params = [{transform_indices = @transform_0, window_bounds = array<i64: 128, 640>}, {pipeline_mode = #tpu.pipeline_mode<synchronous>, transform_indices = @transform_1, window_bounds = array<i64: 640, 512>}, {transform_indices = @transform_2, window_bounds = array<i64: 128, 512>}]} {
    %c0 = arith.constant 0 : index
    %c0_0 = arith.constant 0 : index
    %0 = vector.load %arg1[%c0, %c0_0] : memref<128x640xf32, #tpu.memory_space<vmem>>, vector<128x640xf32>
    %1 = arith.truncf %0 : vector<128x640xf32> to vector<128x640xbf16>
    %c0_1 = arith.constant 0 : index
    %c0_2 = arith.constant 0 : index
    %2 = vector.load %arg2[%c0_1, %c0_2] : memref<640x512xf32, #tpu.memory_space<vmem>>, vector<640x512xf32>
    %3 = arith.truncf %2 : vector<640x512xf32> to vector<640x512xbf16>
    %cst = arith.constant dense<0.000000e+00> : vector<128x512xf32>
    %4 = tpu.matmul %1, %3, %cst {dimension_numbers = #tpu.dot_dimension_numbers<[1], [0], [0], [1], [0, 0, 1, 1], [], []>} : vector<128x640xbf16>, vector<640x512xbf16>, vector<128x512xf32> -> vector<128x512xf32>
    %c0_3 = arith.constant 0 : index
    %c0_4 = arith.constant 0 : index
    %5 = vector.load %arg3[%c0_3, %c0_4] : memref<128x512xf32, #tpu.memory_space<vmem>>, vector<128x512xf32>
    tpu.vector_store %arg3[%c0_3, %c0_4], %4 {strides = array<i32>} : memref<128x512xf32, #tpu.memory_space<vmem>>, vector<128x512xf32>,
    return
  }
  func.func @transform_0(%arg0: i32) -> (i32, i32) {
    %c0_i32 = arith.constant 0 : i32
    %c0_i32_0 = arith.constant 0 : i32
    return %arg0, %c0_i32 : i32, i32
  }
  func.func @transform_1(%arg0: i32) -> (i32, i32) {
    %c0_i32 = arith.constant 0 : i32
    %c0_i32_0 = arith.constant 0 : i32
    %c0_i32_1 = arith.constant 0 : i32
    return %c0_i32, %c0_i32_0 : i32, i32
  }
  func.func @transform_2(%arg0: i32) -> (i32, i32) {
    %c0_i32 = arith.constant 0 : i32
    %c0_i32_0 = arith.constant 0 : i32
    return %arg0, %c0_i32 : i32, i32
  }
}

module attributes {stable_mosaic.version = 11 : i64} {
  func.func @kernel(%arg0: i32, %arg1: i32, %arg2: memref<128x128xf32, #tpu.memory_space<vmem>>, %arg3: memref<256x128xf32, #tpu.memory_space<vmem>>, %arg4: memref<1x128xf32, #tpu.memory_space<vmem>>, %arg5: memref<1x128xf32, #tpu.memory_space<vmem>>, %arg6: memref<128x256xi8, #tpu.memory_space<vmem>>, %arg7: memref<1x128xf32, #tpu.memory_space<vmem>>, %arg8: memref<128x128xf32, #tpu.memory_space<vmem>>) attributes {dimension_semantics = [#tpu.dimension_semantics<parallel>, #tpu.dimension_semantics<parallel>], iteration_bounds = array<i64: 4, 2>, scalar_prefetch = 0 : i64, scratch_operands = 0 : i64, tpu.core_type = #tpu.core_type<tc>, window_params = [{transform_indices = @transform_0, window_bounds = array<i64: 128, 128>}, {transform_indices = @transform_1, window_bounds = array<i64: 256, 128>}, {transform_indices = @transform_2, window_bounds = array<i64: 1, 128>}, {transform_indices = @transform_3, window_bounds = array<i64: 1, 128>}, {transform_indices = @transform_4, window_bounds = array<i64: 128, 256>}, {transform_indices = @transform_5, window_bounds = array<i64: 1, 128>}, {transform_indices = @transform_6, window_bounds = array<i64: 128, 128>}]} {
    %c0 = arith.constant 0 : index
    %c0_0 = arith.constant 0 : index
    %0 = vector.load %arg2[%c0, %c0_0] : memref<128x128xf32, #tpu.memory_space<vmem>>, vector<128x128xf32>
    %c0_1 = arith.constant 0 : index
    %c0_2 = arith.constant 0 : index
    %1 = vector.load %arg3[%c0_1, %c0_2] : memref<256x128xf32, #tpu.memory_space<vmem>>, vector<256x128xf32>
    %c0_3 = arith.constant 0 : index
    %c0_4 = arith.constant 0 : index
    %2 = vector.load %arg6[%c0_3, %c0_4] : memref<128x256xi8, #tpu.memory_space<vmem>>, vector<128x256xi8>
    %c0_i8 = arith.constant 0 : i8
    %3 = vector.broadcast %c0_i8 : i8 to vector<128x256xi8>
    %4 = arith.cmpi ne, %2, %3 : vector<128x256xi8>
    %c0_5 = arith.constant 0 : index
    %c0_6 = arith.constant 0 : index
    %5 = vector.load %arg5[%c0_5, %c0_6] : memref<1x128xf32, #tpu.memory_space<vmem>>, vector<1x128xf32>
    %6 = vector.broadcast %5 : vector<1x128xf32> to vector<128x128xf32>
    %7 = arith.mulf %0, %6 : vector<128x128xf32>
    %cst = arith.constant dense<0.000000e+00> : vector<128xf32>
    %8 = vector.multi_reduction <add>, %7, %cst [1] : vector<128x128xf32> to vector<128xf32>
    %9 = vector.shape_cast %8 : vector<128xf32> to vector<128x1xf32>
    %c0_7 = arith.constant 0 : index
    %c0_8 = arith.constant 0 : index
    %10 = vector.load %arg4[%c0_7, %c0_8] : memref<1x128xf32, #tpu.memory_space<vmem>>, vector<1x128xf32>
    %cst_9 = arith.constant dense<0.000000e+00> : vector<1x256xf32>
    %11 = tpu.matmul %10, %1, %cst_9 {dimension_numbers = #tpu.dot_dimension_numbers<[1], [1], [0], [0], [0, 0, 1, 0], [], []>} : vector<1x128xf32>, vector<256x128xf32>, vector<1x256xf32> -> vector<1x256xf32>
    %12 = vector.broadcast %9 : vector<128x1xf32> to vector<128x256xf32>
    %13 = vector.broadcast %11 : vector<1x256xf32> to vector<128x256xf32>
    %14 = arith.addf %12, %13 : vector<128x256xf32>
    %cst_10 = arith.constant 0.000000e+00 : f32
    %15 = vector.broadcast %cst_10 : f32 to vector<128x256xf32>
    %16 = arith.cmpf ogt, %14, %15 : vector<128x256xf32>
    %cst_11 = arith.constant 2.000000e-01 : f32
    %17 = vector.broadcast %cst_11 : f32 to vector<128x256xf32>
    %18 = arith.mulf %17, %14 : vector<128x256xf32>
    %19 = arith.select %16, %14, %18 : vector<128x256xi1>, vector<128x256xf32>
    %cst_12 = arith.constant -1.000000e+30 : f32
    %20 = vector.broadcast %cst_12 : f32 to vector<128x256xf32>
    %21 = arith.select %4, %19, %20 : vector<128x256xi1>, vector<128x256xf32>
    %cst_13 = arith.constant dense<0xFF800000> : vector<128xf32>
    %22 = vector.multi_reduction <maximumf>, %21, %cst_13 [1] : vector<128x256xf32> to vector<128xf32>
    %23 = vector.shape_cast %22 : vector<128xf32> to vector<128x1xf32>
    %24 = vector.broadcast %23 : vector<128x1xf32> to vector<128x256xf32>
    %25 = arith.subf %21, %24 : vector<128x256xf32>
    %26 = math.exp %25 : vector<128x256xf32>
    %cst_14 = arith.constant dense<0.000000e+00> : vector<128xf32>
    %27 = vector.multi_reduction <add>, %26, %cst_14 [1] : vector<128x256xf32> to vector<128xf32>
    %28 = vector.shape_cast %27 : vector<128xf32> to vector<128x1xf32>
    %29 = arith.truncf %26 : vector<128x256xf32> to vector<128x256xbf16>
    %30 = arith.truncf %1 : vector<256x128xf32> to vector<256x128xbf16>
    %cst_15 = arith.constant dense<0.000000e+00> : vector<128x128xf32>
    %31 = tpu.matmul %29, %30, %cst_15 {dimension_numbers = #tpu.dot_dimension_numbers<[1], [0], [0], [1], [0, 0, 1, 1], [], []>} : vector<128x256xbf16>, vector<256x128xbf16>, vector<128x128xf32> -> vector<128x128xf32>
    %32 = tpu.reciprocal %28 {approx = true} : vector<128x1xf32> -> vector<128x1xf32>
    %33 = vector.broadcast %32 : vector<128x1xf32> to vector<128x128xf32>
    %34 = arith.mulf %31, %33 : vector<128x128xf32>
    %c0_16 = arith.constant 0 : index
    %c0_17 = arith.constant 0 : index
    %35 = vector.load %arg7[%c0_16, %c0_17] : memref<1x128xf32, #tpu.memory_space<vmem>>, vector<1x128xf32>
    %36 = vector.broadcast %35 : vector<1x128xf32> to vector<128x128xf32>
    %37 = arith.addf %34, %36 : vector<128x128xf32>
    %cst_18 = arith.constant 0.000000e+00 : f32
    %38 = vector.broadcast %cst_18 : f32 to vector<128x128xf32>
    %39 = arith.cmpf ogt, %37, %38 : vector<128x128xf32>
    %cst_19 = arith.constant 0.000000e+00 : f32
    %40 = vector.broadcast %cst_19 : f32 to vector<128x128xf32>
    %41 = arith.minimumf %37, %40 : vector<128x128xf32>
    %42 = math.exp %41 : vector<128x128xf32>
    %cst_20 = arith.constant 1.000000e+00 : f32
    %43 = vector.broadcast %cst_20 : f32 to vector<128x128xf32>
    %44 = arith.subf %42, %43 : vector<128x128xf32>
    %45 = arith.select %39, %37, %44 : vector<128x128xi1>, vector<128x128xf32>
    %c0_21 = arith.constant 0 : index
    %c0_22 = arith.constant 0 : index
    %46 = vector.load %arg8[%c0_21, %c0_22] : memref<128x128xf32, #tpu.memory_space<vmem>>, vector<128x128xf32>
    tpu.vector_store %arg8[%c0_21, %c0_22], %45 {strides = array<i32>} : memref<128x128xf32, #tpu.memory_space<vmem>>, vector<128x128xf32>,
    return
  }
  func.func @transform_0(%arg0: i32, %arg1: i32) -> (i32, i32) {
    %c0_i32 = arith.constant 0 : i32
    return %arg1, %arg0 : i32, i32
  }
  func.func @transform_1(%arg0: i32, %arg1: i32) -> (i32, i32) {
    %c0_i32 = arith.constant 0 : i32
    %c0_i32_0 = arith.constant 0 : i32
    return %c0_i32, %arg0 : i32, i32
  }
  func.func @transform_2(%arg0: i32, %arg1: i32) -> (i32, i32) {
    %c0_i32 = arith.constant 0 : i32
    %c0_i32_0 = arith.constant 0 : i32
    return %c0_i32, %arg0 : i32, i32
  }
  func.func @transform_3(%arg0: i32, %arg1: i32) -> (i32, i32) {
    %c0_i32 = arith.constant 0 : i32
    %c0_i32_0 = arith.constant 0 : i32
    return %c0_i32, %arg0 : i32, i32
  }
  func.func @transform_4(%arg0: i32, %arg1: i32) -> (i32, i32) {
    %c0_i32 = arith.constant 0 : i32
    %c0_i32_0 = arith.constant 0 : i32
    return %arg1, %c0_i32 : i32, i32
  }
  func.func @transform_5(%arg0: i32, %arg1: i32) -> (i32, i32) {
    %c0_i32 = arith.constant 0 : i32
    %c0_i32_0 = arith.constant 0 : i32
    return %c0_i32, %arg0 : i32, i32
  }
  func.func @transform_6(%arg0: i32, %arg1: i32) -> (i32, i32) {
    %c0_i32 = arith.constant 0 : i32
    return %arg1, %arg0 : i32, i32
  }
}

module attributes {stable_mosaic.version = 11 : i64} {
  func.func @kernel(%arg0: i32, %arg1: memref<128x512xf32, #tpu.memory_space<vmem>>, %arg2: memref<512x128xf32, #tpu.memory_space<vmem>>, %arg3: memref<128x128xf32, #tpu.memory_space<vmem>>) attributes {dimension_semantics = [#tpu.dimension_semantics<parallel>], iteration_bounds = array<i64: 2>, scalar_prefetch = 0 : i64, scratch_operands = 0 : i64, tpu.core_type = #tpu.core_type<tc>, window_params = [{transform_indices = @transform_0, window_bounds = array<i64: 128, 512>}, {pipeline_mode = #tpu.pipeline_mode<synchronous>, transform_indices = @transform_1, window_bounds = array<i64: 512, 128>}, {transform_indices = @transform_2, window_bounds = array<i64: 128, 128>}]} {
    %c0 = arith.constant 0 : index
    %c0_0 = arith.constant 0 : index
    %0 = vector.load %arg1[%c0, %c0_0] : memref<128x512xf32, #tpu.memory_space<vmem>>, vector<128x512xf32>
    %1 = arith.truncf %0 : vector<128x512xf32> to vector<128x512xbf16>
    %c0_1 = arith.constant 0 : index
    %c0_2 = arith.constant 0 : index
    %2 = vector.load %arg2[%c0_1, %c0_2] : memref<512x128xf32, #tpu.memory_space<vmem>>, vector<512x128xf32>
    %3 = arith.truncf %2 : vector<512x128xf32> to vector<512x128xbf16>
    %cst = arith.constant dense<0.000000e+00> : vector<128x128xf32>
    %4 = tpu.matmul %1, %3, %cst {dimension_numbers = #tpu.dot_dimension_numbers<[1], [0], [0], [1], [0, 0, 1, 1], [], []>} : vector<128x512xbf16>, vector<512x128xbf16>, vector<128x128xf32> -> vector<128x128xf32>
    %c0_3 = arith.constant 0 : index
    %c0_4 = arith.constant 0 : index
    %5 = vector.load %arg3[%c0_3, %c0_4] : memref<128x128xf32, #tpu.memory_space<vmem>>, vector<128x128xf32>
    tpu.vector_store %arg3[%c0_3, %c0_4], %4 {strides = array<i32>} : memref<128x128xf32, #tpu.memory_space<vmem>>, vector<128x128xf32>,
    return
  }
  func.func @transform_0(%arg0: i32) -> (i32, i32) {
    %c0_i32 = arith.constant 0 : i32
    %c0_i32_0 = arith.constant 0 : i32
    return %arg0, %c0_i32 : i32, i32
  }
  func.func @transform_1(%arg0: i32) -> (i32, i32) {
    %c0_i32 = arith.constant 0 : i32
    %c0_i32_0 = arith.constant 0 : i32
    %c0_i32_1 = arith.constant 0 : i32
    return %c0_i32, %c0_i32_0 : i32, i32
  }
  func.func @transform_2(%arg0: i32) -> (i32, i32) {
    %c0_i32 = arith.constant 0 : i32
    %c0_i32_0 = arith.constant 0 : i32
    return %arg0, %c0_i32 : i32, i32
  }
}

module attributes {stable_mosaic.version = 11 : i64} {
  func.func @kernel(%arg0: i32, %arg1: i32, %arg2: memref<128x128xf32, #tpu.memory_space<vmem>>, %arg3: memref<256x128xf32, #tpu.memory_space<vmem>>, %arg4: memref<1x128xf32, #tpu.memory_space<vmem>>, %arg5: memref<1x128xf32, #tpu.memory_space<vmem>>, %arg6: memref<128x256xi8, #tpu.memory_space<vmem>>, %arg7: memref<1x128xf32, #tpu.memory_space<vmem>>, %arg8: memref<128x128xf32, #tpu.memory_space<vmem>>) attributes {dimension_semantics = [#tpu.dimension_semantics<parallel>, #tpu.dimension_semantics<parallel>], iteration_bounds = array<i64: 1, 2>, scalar_prefetch = 0 : i64, scratch_operands = 0 : i64, tpu.core_type = #tpu.core_type<tc>, window_params = [{transform_indices = @transform_0, window_bounds = array<i64: 128, 128>}, {transform_indices = @transform_1, window_bounds = array<i64: 256, 128>}, {transform_indices = @transform_2, window_bounds = array<i64: 1, 128>}, {transform_indices = @transform_3, window_bounds = array<i64: 1, 128>}, {transform_indices = @transform_4, window_bounds = array<i64: 128, 256>}, {transform_indices = @transform_5, window_bounds = array<i64: 1, 128>}, {transform_indices = @transform_6, window_bounds = array<i64: 128, 128>}]} {
    %c0 = arith.constant 0 : index
    %c0_0 = arith.constant 0 : index
    %0 = vector.load %arg2[%c0, %c0_0] : memref<128x128xf32, #tpu.memory_space<vmem>>, vector<128x128xf32>
    %c0_1 = arith.constant 0 : index
    %c0_2 = arith.constant 0 : index
    %1 = vector.load %arg3[%c0_1, %c0_2] : memref<256x128xf32, #tpu.memory_space<vmem>>, vector<256x128xf32>
    %c0_3 = arith.constant 0 : index
    %c0_4 = arith.constant 0 : index
    %2 = vector.load %arg6[%c0_3, %c0_4] : memref<128x256xi8, #tpu.memory_space<vmem>>, vector<128x256xi8>
    %c0_i8 = arith.constant 0 : i8
    %3 = vector.broadcast %c0_i8 : i8 to vector<128x256xi8>
    %4 = arith.cmpi ne, %2, %3 : vector<128x256xi8>
    %c0_5 = arith.constant 0 : index
    %c0_6 = arith.constant 0 : index
    %5 = vector.load %arg5[%c0_5, %c0_6] : memref<1x128xf32, #tpu.memory_space<vmem>>, vector<1x128xf32>
    %6 = vector.broadcast %5 : vector<1x128xf32> to vector<128x128xf32>
    %7 = arith.mulf %0, %6 : vector<128x128xf32>
    %cst = arith.constant dense<0.000000e+00> : vector<128xf32>
    %8 = vector.multi_reduction <add>, %7, %cst [1] : vector<128x128xf32> to vector<128xf32>
    %9 = vector.shape_cast %8 : vector<128xf32> to vector<128x1xf32>
    %c0_7 = arith.constant 0 : index
    %c0_8 = arith.constant 0 : index
    %10 = vector.load %arg4[%c0_7, %c0_8] : memref<1x128xf32, #tpu.memory_space<vmem>>, vector<1x128xf32>
    %cst_9 = arith.constant dense<0.000000e+00> : vector<1x256xf32>
    %11 = tpu.matmul %10, %1, %cst_9 {dimension_numbers = #tpu.dot_dimension_numbers<[1], [1], [0], [0], [0, 0, 1, 0], [], []>} : vector<1x128xf32>, vector<256x128xf32>, vector<1x256xf32> -> vector<1x256xf32>
    %12 = vector.broadcast %9 : vector<128x1xf32> to vector<128x256xf32>
    %13 = vector.broadcast %11 : vector<1x256xf32> to vector<128x256xf32>
    %14 = arith.addf %12, %13 : vector<128x256xf32>
    %cst_10 = arith.constant 0.000000e+00 : f32
    %15 = vector.broadcast %cst_10 : f32 to vector<128x256xf32>
    %16 = arith.cmpf ogt, %14, %15 : vector<128x256xf32>
    %cst_11 = arith.constant 2.000000e-01 : f32
    %17 = vector.broadcast %cst_11 : f32 to vector<128x256xf32>
    %18 = arith.mulf %17, %14 : vector<128x256xf32>
    %19 = arith.select %16, %14, %18 : vector<128x256xi1>, vector<128x256xf32>
    %cst_12 = arith.constant -1.000000e+30 : f32
    %20 = vector.broadcast %cst_12 : f32 to vector<128x256xf32>
    %21 = arith.select %4, %19, %20 : vector<128x256xi1>, vector<128x256xf32>
    %cst_13 = arith.constant dense<0xFF800000> : vector<128xf32>
    %22 = vector.multi_reduction <maximumf>, %21, %cst_13 [1] : vector<128x256xf32> to vector<128xf32>
    %23 = vector.shape_cast %22 : vector<128xf32> to vector<128x1xf32>
    %24 = vector.broadcast %23 : vector<128x1xf32> to vector<128x256xf32>
    %25 = arith.subf %21, %24 : vector<128x256xf32>
    %26 = math.exp %25 : vector<128x256xf32>
    %cst_14 = arith.constant dense<0.000000e+00> : vector<128xf32>
    %27 = vector.multi_reduction <add>, %26, %cst_14 [1] : vector<128x256xf32> to vector<128xf32>
    %28 = vector.shape_cast %27 : vector<128xf32> to vector<128x1xf32>
    %29 = arith.truncf %26 : vector<128x256xf32> to vector<128x256xbf16>
    %30 = arith.truncf %1 : vector<256x128xf32> to vector<256x128xbf16>
    %cst_15 = arith.constant dense<0.000000e+00> : vector<128x128xf32>
    %31 = tpu.matmul %29, %30, %cst_15 {dimension_numbers = #tpu.dot_dimension_numbers<[1], [0], [0], [1], [0, 0, 1, 1], [], []>} : vector<128x256xbf16>, vector<256x128xbf16>, vector<128x128xf32> -> vector<128x128xf32>
    %32 = tpu.reciprocal %28 {approx = true} : vector<128x1xf32> -> vector<128x1xf32>
    %33 = vector.broadcast %32 : vector<128x1xf32> to vector<128x128xf32>
    %34 = arith.mulf %31, %33 : vector<128x128xf32>
    %c0_16 = arith.constant 0 : index
    %c0_17 = arith.constant 0 : index
    %35 = vector.load %arg7[%c0_16, %c0_17] : memref<1x128xf32, #tpu.memory_space<vmem>>, vector<1x128xf32>
    %36 = vector.broadcast %35 : vector<1x128xf32> to vector<128x128xf32>
    %37 = arith.addf %34, %36 : vector<128x128xf32>
    %cst_18 = arith.constant 0.000000e+00 : f32
    %38 = vector.broadcast %cst_18 : f32 to vector<128x128xf32>
    %39 = arith.maximumf %37, %38 : vector<128x128xf32>
    %c0_19 = arith.constant 0 : index
    %c0_20 = arith.constant 0 : index
    %40 = vector.load %arg8[%c0_19, %c0_20] : memref<128x128xf32, #tpu.memory_space<vmem>>, vector<128x128xf32>
    tpu.vector_store %arg8[%c0_19, %c0_20], %39 {strides = array<i32>} : memref<128x128xf32, #tpu.memory_space<vmem>>, vector<128x128xf32>,
    return
  }
  func.func @transform_0(%arg0: i32, %arg1: i32) -> (i32, i32) {
    %c0_i32 = arith.constant 0 : i32
    return %arg1, %arg0 : i32, i32
  }
  func.func @transform_1(%arg0: i32, %arg1: i32) -> (i32, i32) {
    %c0_i32 = arith.constant 0 : i32
    %c0_i32_0 = arith.constant 0 : i32
    return %c0_i32, %arg0 : i32, i32
  }
  func.func @transform_2(%arg0: i32, %arg1: i32) -> (i32, i32) {
    %c0_i32 = arith.constant 0 : i32
    %c0_i32_0 = arith.constant 0 : i32
    return %c0_i32, %arg0 : i32, i32
  }
  func.func @transform_3(%arg0: i32, %arg1: i32) -> (i32, i32) {
    %c0_i32 = arith.constant 0 : i32
    %c0_i32_0 = arith.constant 0 : i32
    return %c0_i32, %arg0 : i32, i32
  }
  func.func @transform_4(%arg0: i32, %arg1: i32) -> (i32, i32) {
    %c0_i32 = arith.constant 0 : i32
    %c0_i32_0 = arith.constant 0 : i32
    return %arg1, %c0_i32 : i32, i32
  }
  func.func @transform_5(%arg0: i32, %arg1: i32) -> (i32, i32) {
    %c0_i32 = arith.constant 0 : i32
    %c0_i32_0 = arith.constant 0 : i32
    return %c0_i32, %arg0 : i32, i32
  }
  func.func @transform_6(%arg0: i32, %arg1: i32) -> (i32, i32) {
    %c0_i32 = arith.constant 0 : i32
    return %arg1, %arg0 : i32, i32
  }
}

module attributes {stable_mosaic.version = 11 : i64} {
  func.func @_mlp_kernel(%arg0: i32, %arg1: memref<128x128xf32, #tpu.memory_space<vmem>>, %arg2: memref<128x128xf32, #tpu.memory_space<vmem>>, %arg3: memref<1x128xf32, #tpu.memory_space<vmem>>, %arg4: memref<128x128xf32, #tpu.memory_space<vmem>>, %arg5: memref<1x128xf32, #tpu.memory_space<vmem>>, %arg6: memref<128x128xf32, #tpu.memory_space<vmem>>) attributes {dimension_semantics = [#tpu.dimension_semantics<parallel>], iteration_bounds = array<i64: 2>, scalar_prefetch = 0 : i64, scratch_operands = 0 : i64, tpu.core_type = #tpu.core_type<tc>, window_params = [{transform_indices = @transform_0, window_bounds = array<i64: 128, 128>}, {pipeline_mode = #tpu.pipeline_mode<synchronous>, transform_indices = @transform_1, window_bounds = array<i64: 128, 128>}, {pipeline_mode = #tpu.pipeline_mode<synchronous>, transform_indices = @transform_2, window_bounds = array<i64: 1, 128>}, {pipeline_mode = #tpu.pipeline_mode<synchronous>, transform_indices = @transform_3, window_bounds = array<i64: 128, 128>}, {pipeline_mode = #tpu.pipeline_mode<synchronous>, transform_indices = @transform_4, window_bounds = array<i64: 1, 128>}, {transform_indices = @transform_5, window_bounds = array<i64: 128, 128>}]} {
    %c0 = arith.constant 0 : index
    %c0_0 = arith.constant 0 : index
    %0 = vector.load %arg1[%c0, %c0_0] : memref<128x128xf32, #tpu.memory_space<vmem>>, vector<128x128xf32>
    %1 = arith.truncf %0 : vector<128x128xf32> to vector<128x128xbf16>
    %c0_1 = arith.constant 0 : index
    %c0_2 = arith.constant 0 : index
    %2 = vector.load %arg2[%c0_1, %c0_2] : memref<128x128xf32, #tpu.memory_space<vmem>>, vector<128x128xf32>
    %3 = arith.truncf %2 : vector<128x128xf32> to vector<128x128xbf16>
    %cst = arith.constant dense<0.000000e+00> : vector<128x128xf32>
    %4 = tpu.matmul %1, %3, %cst {dimension_numbers = #tpu.dot_dimension_numbers<[1], [0], [0], [1], [0, 0, 1, 1], [], []>} : vector<128x128xbf16>, vector<128x128xbf16>, vector<128x128xf32> -> vector<128x128xf32>
    %c0_3 = arith.constant 0 : index
    %c0_4 = arith.constant 0 : index
    %5 = vector.load %arg3[%c0_3, %c0_4] : memref<1x128xf32, #tpu.memory_space<vmem>>, vector<1x128xf32>
    %6 = vector.broadcast %5 : vector<1x128xf32> to vector<128x128xf32>
    %7 = arith.addf %4, %6 : vector<128x128xf32>
    %cst_5 = arith.constant 0.000000e+00 : f32
    %8 = vector.broadcast %cst_5 : f32 to vector<128x128xf32>
    %9 = arith.maximumf %7, %8 : vector<128x128xf32>
    %10 = arith.truncf %9 : vector<128x128xf32> to vector<128x128xbf16>
    %c0_6 = arith.constant 0 : index
    %c0_7 = arith.constant 0 : index
    %11 = vector.load %arg4[%c0_6, %c0_7] : memref<128x128xf32, #tpu.memory_space<vmem>>, vector<128x128xf32>
    %12 = arith.truncf %11 : vector<128x128xf32> to vector<128x128xbf16>
    %cst_8 = arith.constant dense<0.000000e+00> : vector<128x128xf32>
    %13 = tpu.matmul %10, %12, %cst_8 {dimension_numbers = #tpu.dot_dimension_numbers<[1], [0], [0], [1], [0, 0, 1, 1], [], []>} : vector<128x128xbf16>, vector<128x128xbf16>, vector<128x128xf32> -> vector<128x128xf32>
    %c0_9 = arith.constant 0 : index
    %c0_10 = arith.constant 0 : index
    %14 = vector.load %arg5[%c0_9, %c0_10] : memref<1x128xf32, #tpu.memory_space<vmem>>, vector<1x128xf32>
    %15 = vector.broadcast %14 : vector<1x128xf32> to vector<128x128xf32>
    %16 = arith.addf %13, %15 : vector<128x128xf32>
    %c0_11 = arith.constant 0 : index
    %c0_12 = arith.constant 0 : index
    %17 = vector.load %arg6[%c0_11, %c0_12] : memref<128x128xf32, #tpu.memory_space<vmem>>, vector<128x128xf32>
    tpu.vector_store %arg6[%c0_11, %c0_12], %16 {strides = array<i32>} : memref<128x128xf32, #tpu.memory_space<vmem>>, vector<128x128xf32>,
    return
  }
  func.func @transform_0(%arg0: i32) -> (i32, i32) {
    %c0_i32 = arith.constant 0 : i32
    %c0_i32_0 = arith.constant 0 : i32
    return %arg0, %c0_i32 : i32, i32
  }
  func.func @transform_1(%arg0: i32) -> (i32, i32) {
    %c0_i32 = arith.constant 0 : i32
    %c0_i32_0 = arith.constant 0 : i32
    %c0_i32_1 = arith.constant 0 : i32
    return %c0_i32, %c0_i32_0 : i32, i32
  }
  func.func @transform_2(%arg0: i32) -> (i32, i32) {
    %c0_i32 = arith.constant 0 : i32
    %c0_i32_0 = arith.constant 0 : i32
    %c0_i32_1 = arith.constant 0 : i32
    return %c0_i32, %c0_i32_0 : i32, i32
  }
  func.func @transform_3(%arg0: i32) -> (i32, i32) {
    %c0_i32 = arith.constant 0 : i32
    %c0_i32_0 = arith.constant 0 : i32
    %c0_i32_1 = arith.constant 0 : i32
    return %c0_i32, %c0_i32_0 : i32, i32
  }
  func.func @transform_4(%arg0: i32) -> (i32, i32) {
    %c0_i32 = arith.constant 0 : i32
    %c0_i32_0 = arith.constant 0 : i32
    %c0_i32_1 = arith.constant 0 : i32
    return %c0_i32, %c0_i32_0 : i32, i32
  }
  func.func @transform_5(%arg0: i32) -> (i32, i32) {
    %c0_i32 = arith.constant 0 : i32
    %c0_i32_0 = arith.constant 0 : i32
    return %arg0, %c0_i32 : i32, i32
  }
}

</mosaic_0001>

<bundles_post_ra>
// kernel: gat_classifier_forward.5
= control target key start
LH: loop header
LB: loop body
LE: loop exit
PB: predicated region body
PF: predicated region fallthrough
CT: control target
= control target key end

     0   :  { %s1728_s9 = smov 0   ;;  %s2865_s0 = inlined_call_operand.vmem [shape: f32[256,640], index: 0, kind: input, shape index: {}]   ;;  %s2866_s1 = inlined_call_operand.vmem [shape: f32[640,512], index: 1, kind: input, shape index: {}]   ;;  %s2867_s2 = inlined_call_operand.vmem [shape: f32[256,512], index: 2, kind: output, shape index: {}]  }
   0x1 LB: > { %s1553_s10 = sadd.s32 4294967295, %s1710_s9   ;;  %p1557_p0 = scmp.ge.s32.totalorder %s1710_s9, 1  ;;  %s1710_s9 = sphi %s1728_s9, %s12_s9  }
   0x2   : > { %p114_p1 = scmp.lt.s32.totalorder %s1710_s9, 3 }
   0x4   : > { %p115_p2 = pnand %p1557_p0, %p114_p1 }
   0x5   : > { %v274_v0 = vld [vmem:[%s2866_s1 + $0x8] sm:$0xff] (!%p115_p2)  ;;  %v276_v2 = vld [vmem:[%s2866_s1 + $0x18] sm:$0xff] (!%p115_p2)  ;;  %v273_v5 = vld [vmem:[%s2866_s1] sm:$0xff] (!%p115_p2)  ;;  %s1918_s27 = sshll.u32 (!%p115_p2), %s1553_s10, 4 }
   0x6   : > { %118 = sbr.rel (%p115_p2) target bundleno = 474 (0x1da), region = 28  ;;  %v278_v1 = vld [vmem:[%s2866_s1 + $0x28] sm:$0xff] (!%p115_p2)  ;;  %v280_v4 = vld [vmem:[%s2866_s1 + $0x38] sm:$0xff] (!%p115_p2)  ;;  %v277_v6 = vld [vmem:[%s2866_s1 + $0x20] sm:$0xff] (!%p115_p2)  ;;  %p139_p3 = scmp.lt.s32.totalorder (!%p115_p2), %s1918_s27, 31 }
   0x7   : > { %v594_v3 = vpack.c.bf16 (!%p115_p2), %v278_v1, %v274_v0  ;;  %v596_v7 = vpack.c.bf16 (!%p115_p2), %v280_v4, %v276_v2  ;;  %v593_v8 = vpack.c.bf16 (!%p115_p2), %v277_v6, %v273_v5  ;;  %v275_v9 = vld [vmem:[%s2866_s1 + $0x10] sm:$0xff] (!%p115_p2)  ;;  %v282_v11 = vld [vmem:[%s2866_s1 + $0x48] sm:$0xff] (!%p115_p2)  ;;  %v284_v14 = vld [vmem:[%s2866_s1 + $0x58] sm:$0xff] (!%p115_p2) }
   0x8   : > { %v279_v10 = vld [vmem:[%s2866_s1 + $0x30] sm:$0xff] (!%p115_p2)  ;;  %v286_v13 = vld [vmem:[%s2866_s1 + $0x68] sm:$0xff] (!%p115_p2)  ;;  %v288_v15 = vld [vmem:[%s2866_s1 + $0x78] sm:$0xff] (!%p115_p2) }
   0x9   : > { %753 = vmatprep.subr.bf16.mxu0 (!%p115_p2), %v594_v3  ;;  %v595_v12 = vpack.c.bf16 (!%p115_p2), %v279_v10, %v275_v9  ;;  %1092 = vmatprep.subr.bf16.mxu1 (!%p115_p2), %v596_v7  ;;  %v598_v16 = vpack.c.bf16 (!%p115_p2), %v286_v13, %v282_v11  ;;  %v600_v17 = vpack.c.bf16 (!%p115_p2), %v288_v15, %v284_v14  ;;  %v281_v18 = vld [vmem:[%s2866_s1 + $0x40] sm:$0xff] (!%p115_p2)  ;;  %v283_v20 = vld [vmem:[%s2866_s1 + $0x50] sm:$0xff] (!%p115_p2)  ;;  %v290_v23 = vld [vmem:[%s2866_s1 + $0x88] sm:$0xff] (!%p115_p2) }
   0xa   : > { %754 = vmatpush1.bf16.msra.mxu0 (!%p115_p2), %v593_v8  ;;  %v285_v19 = vld [vmem:[%s2866_s1 + $0x60] sm:$0xff] (!%p115_p2)  ;;  %v287_v22 = vld [vmem:[%s2866_s1 + $0x70] sm:$0xff] (!%p115_p2)  ;;  %v294_v24 = vld [vmem:[%s2866_s1 + $0xa8] sm:$0xff] (!%p115_p2) }
   0xb   : > { %1093 = vmatpush1.bf16.msra.mxu1 (!%p115_p2), %v595_v12  ;;  %v597_v21 = vpack.c.bf16 (!%p115_p2), %v285_v19, %v281_v18  ;;  %755 = vmatprep.subr.bf16.mxu0 (!%p115_p2), %v598_v16  ;;  %v599_v25 = vpack.c.bf16 (!%p115_p2), %v287_v22, %v283_v20  ;;  %v602_v26 = vpack.c.bf16 (!%p115_p2), %v294_v24, %v290_v23  ;;  %v292_v27 = vld [vmem:[%s2866_s1 + $0x98] sm:$0xff] (!%p115_p2)  ;;  %v289_v29 = vld [vmem:[%s2866_s1 + $0x80] sm:$0xff] (!%p115_p2)  ;;  %v291_v32 = vld [vmem:[%s2866_s1 + $0x90] sm:$0xff] (!%p115_p2) }
   0xc   : > { %1094 = vmatprep.subr.bf16.mxu1 (!%p115_p2), %v600_v17  ;;  %v296_v28 = vld [vmem:[%s2866_s1 + $0xb8] sm:$0xff] (!%p115_p2)  ;;  %v293_v31 = vld [vmem:[%s2866_s1 + $0xa0] sm:$0xff] (!%p115_p2)  ;;  %v295_v33 = vld [vmem:[%s2866_s1 + $0xb0] sm:$0xff] (!%p115_p2) }
   0xd   : > { %v604_v30 = vpack.c.bf16 %v296_v28, %v292_v27  ;;  %v601_v34 = vpack.c.bf16 %v293_v31, %v289_v29  ;;  %v298_v35 = vld [vmem:[%s2866_s1 + $0xc8] sm:$0xff]  ;;  %v300_v37 = vld [vmem:[%s2866_s1 + $0xd8] sm:$0xff]  ;;  %v603_v38 = vpack.c.bf16 %v295_v33, %v291_v32  ;;  %v297_v41 = vld [vmem:[%s2866_s1 + $0xc0] sm:$0xff]  ;;  %s2869_s27 = smov (!%p139_p3, %s1918_s27), 31 }
   0xe   : > { %756 = vmatpush1.bf16.msra.mxu0 %v597_v21  ;;  %v302_v36 = vld [vmem:[%s2866_s1 + $0xe8] sm:$0xff]  ;;  %v304_v40 = vld [vmem:[%s2866_s1 + $0xf8] sm:$0xff]  ;;  %v301_v42 = vld [vmem:[%s2866_s1 + $0xe0] sm:$0xff]  ;;  %s1694_s23 = smul.u32 40, %s2869_s27 }
   0xf   : > { %1095 = vmatpush1.bf16.msra.mxu1 %v599_v25  ;;  %757 = vmatprep.subr.bf16.mxu0 %v602_v26  ;;  %v606_v39 = vpack.c.bf16 %v302_v36, %v298_v35  ;;  %v608_v43 = vpack.c.bf16 %v304_v40, %v300_v37  ;;  %v299_v44 = vld [vmem:[%s2866_s1 + $0xd0] sm:$0xff]  ;;  %v306_v46 = vld [vmem:[%s2866_s1 + $0x108] sm:$0xff]  ;;  %v308_v48 = vld [vmem:[%s2866_s1 + $0x118] sm:$0xff]  ;;  %v605_v50 = vpack.c.bf16 %v301_v42, %v297_v41 }
  0x10   : > { %1096 = vmatprep.subr.bf16.mxu1 %v604_v30  ;;  %v303_v45 = vld [vmem:[%s2866_s1 + $0xf0] sm:$0xff]  ;;  %v310_v47 = vld [vmem:[%s2866_s1 + $0x128] sm:$0xff]  ;;  %v312_v49 = vld [vmem:[%s2866_s1 + $0x138] sm:$0xff]  ;;  %s2026_s16 = scalar_lea.vmem %s2865_s0, %s1694_s23  ;;  %s1565_s23 = sshll.u32 %s2869_s27, 5 }
  0x11   : > { %v607_v51 = vpack.c.bf16 %v303_v45, %v299_v44  ;;  %v610_v52 = vpack.c.bf16 %v310_v47, %v306_v46  ;;  %v305_v53 = vld [vmem:[%s2866_s1 + $0x100] sm:$0xff]  ;;  %v307_v55 = vld [vmem:[%s2866_s1 + $0x110] sm:$0xff]  ;;  %v612_v56 = vpack.c.bf16 %v312_v49, %v308_v48  ;;  %v314_v58 = vld [vmem:[%s2866_s1 + $0x148] sm:$0xff]  ;;  %s2796_s26 = scalar_lea.vmem %s2867_s2, %s1565_s23 }
  0x12   : > { %758 = vmatpush1.bf16.msra.mxu0 %v601_v34  ;;  %v309_v54 = vld [vmem:[%s2866_s1 + $0x120] sm:$0xff]  ;;  %v311_v57 = vld [vmem:[%s2866_s1 + $0x130] sm:$0xff]  ;;  %v318_v59 = vld [vmem:[%s2866_s1 + $0x168] sm:$0xff] }
  0x13   : > { %1097 = vmatpush1.bf16.msra.mxu1 %v603_v38  ;;  %759 = vmatprep.subr.bf16.mxu0 %v606_v39  ;;  %v316_v60 = vld [vmem:[%s2866_s1 + $0x158] sm:$0xff]  ;;  %v609_v62 = vpack.c.bf16 %v309_v54, %v305_v53  ;;  %v611_v63 = vpack.c.bf16 %v311_v57, %v307_v55  ;;  %v614_v0 = vpack.c.bf16 %v318_v59, %v314_v58  ;;  %v313_v1 = vld [vmem:[%s2866_s1 + $0x140] sm:$0xff]  ;;  %v315_v3 = vld [vmem:[%s2866_s1 + $0x150] sm:$0xff] }
  0x14   : > { %1098 = vmatprep.subr.bf16.mxu1 %v608_v43  ;;  %v320_v61 = vld [vmem:[%s2866_s1 + $0x178] sm:$0xff]  ;;  %v317_v2 = vld [vmem:[%s2866_s1 + $0x160] sm:$0xff]  ;;  %v319_v5 = vld [vmem:[%s2866_s1 + $0x170] sm:$0xff] }
  0x15   : > { %v616_v4 = vpack.c.bf16 %v320_v61, %v316_v60  ;;  %v322_v6 = vld [vmem:[%s2866_s1 + $0x188] sm:$0xff]  ;;  %v324_v8 = vld [vmem:[%s2866_s1 + $0x198] sm:$0xff]  ;;  %v613_v10 = vpack.c.bf16 %v317_v2, %v313_v1  ;;  %v615_v11 = vpack.c.bf16 %v319_v5, %v315_v3  ;;  %v321_v13 = vld [vmem:[%s2866_s1 + $0x180] sm:$0xff] }
  0x16   : > { %760 = vmatpush1.bf16.msra.mxu0 %v605_v50  ;;  %v326_v7 = vld [vmem:[%s2866_s1 + $0x1a8] sm:$0xff]  ;;  %v328_v9 = vld [vmem:[%s2866_s1 + $0x1b8] sm:$0xff]  ;;  %v325_v14 = vld [vmem:[%s2866_s1 + $0x1a0] sm:$0xff] }
  0x17   : > { %1099 = vmatpush1.bf16.msra.mxu1 %v607_v51  ;;  %761 = vmatprep.subr.bf16.mxu0 %v610_v52  ;;  %v618_v12 = vpack.c.bf16 %v326_v7, %v322_v6  ;;  %v323_v15 = vld [vmem:[%s2866_s1 + $0x190] sm:$0xff]  ;;  %v620_v16 = vpack.c.bf16 %v328_v9, %v324_v8  ;;  %v330_v18 = vld [vmem:[%s2866_s1 + $0x1c8] sm:$0xff]  ;;  %v332_v20 = vld [vmem:[%s2866_s1 + $0x1d8] sm:$0xff]  ;;  %v617_v22 = vpack.c.bf16 %v325_v14, %v321_v13 }
  0x18   : > { %1100 = vmatprep.subr.bf16.mxu1 %v612_v56  ;;  %v327_v17 = vld [vmem:[%s2866_s1 + $0x1b0] sm:$0xff]  ;;  %v334_v19 = vld [vmem:[%s2866_s1 + $0x1e8] sm:$0xff]  ;;  %v336_v21 = vld [vmem:[%s2866_s1 + $0x1f8] sm:$0xff] }
  0x19   : > { %v619_v23 = vpack.c.bf16 %v327_v17, %v323_v15  ;;  %v622_v24 = vpack.c.bf16 %v334_v19, %v330_v18  ;;  %v329_v25 = vld [vmem:[%s2866_s1 + $0x1c0] sm:$0xff]  ;;  %v331_v27 = vld [vmem:[%s2866_s1 + $0x1d0] sm:$0xff]  ;;  %v624_v28 = vpack.c.bf16 %v336_v21, %v332_v20  ;;  %v338_v30 = vld [vmem:[%s2866_s1 + $0x208] sm:$0xff] }
  0x1a   : > { %762 = vmatpush1.bf16.msra.mxu0 %v609_v62  ;;  %v333_v26 = vld [vmem:[%s2866_s1 + $0x1e0] sm:$0xff]  ;;  %v335_v29 = vld [vmem:[%s2866_s1 + $0x1f0] sm:$0xff]  ;;  %v342_v31 = vld [vmem:[%s2866_s1 + $0x228] sm:$0xff] }
  0x1b   : > { %1101 = vmatpush1.bf16.msra.mxu1 %v611_v63  ;;  %763 = vmatprep.subr.bf16.mxu0 %v614_v0  ;;  %v340_v32 = vld [vmem:[%s2866_s1 + $0x218] sm:$0xff]  ;;  %v621_v34 = vpack.c.bf16 %v333_v26, %v329_v25  ;;  %v623_v35 = vpack.c.bf16 %v335_v29, %v331_v27  ;;  %v626_v36 = vpack.c.bf16 %v342_v31, %v338_v30  ;;  %v337_v37 = vld [vmem:[%s2866_s1 + $0x200] sm:$0xff]  ;;  %v339_v39 = vld [vmem:[%s2866_s1 + $0x210] sm:$0xff] }
  0x1c   : > { %1102 = vmatprep.subr.bf16.mxu1 %v616_v4  ;;  %v344_v33 = vld [vmem:[%s2866_s1 + $0x238] sm:$0xff]  ;;  %v341_v38 = vld [vmem:[%s2866_s1 + $0x220] sm:$0xff]  ;;  %v343_v41 = vld [vmem:[%s2866_s1 + $0x230] sm:$0xff] }
  0x1d   : > { %v628_v40 = vpack.c.bf16 %v344_v33, %v340_v32  ;;  %v346_v42 = vld [vmem:[%s2866_s1 + $0x248] sm:$0xff]  ;;  %v348_v44 = vld [vmem:[%s2866_s1 + $0x258] sm:$0xff]  ;;  %v625_v46 = vpack.c.bf16 %v341_v38, %v337_v37  ;;  %v627_v47 = vpack.c.bf16 %v343_v41, %v339_v39  ;;  %v345_v49 = vld [vmem:[%s2866_s1 + $0x240] sm:$0xff] }
  0x1e   : > { %764 = vmatpush1.bf16.msra.mxu0 %v613_v10  ;;  %v350_v43 = vld [vmem:[%s2866_s1 + $0x268] sm:$0xff]  ;;  %v352_v45 = vld [vmem:[%s2866_s1 + $0x278] sm:$0xff]  ;;  %v349_v50 = vld [vmem:[%s2866_s1 + $0x260] sm:$0xff] }
  0x1f   : > { %1103 = vmatpush1.bf16.msra.mxu1 %v615_v11  ;;  %765 = vmatprep.subr.bf16.mxu0 %v618_v12  ;;  %v630_v48 = vpack.c.bf16 %v350_v43, %v346_v42  ;;  %v347_v51 = vld [vmem:[%s2866_s1 + $0x250] sm:$0xff]  ;;  %v632_v52 = vpack.c.bf16 %v352_v45, %v348_v44  ;;  %v354_v54 = vld [vmem:[%s2866_s1 + $0x288] sm:$0xff]  ;;  %v356_v56 = vld [vmem:[%s2866_s1 + $0x298] sm:$0xff]  ;;  %v629_v58 = vpack.c.bf16 %v349_v50, %v345_v49 }
  0x20   : > { %1104 = vmatprep.subr.bf16.mxu1 %v620_v16  ;;  %v351_v53 = vld [vmem:[%s2866_s1 + $0x270] sm:$0xff]  ;;  %v358_v55 = vld [vmem:[%s2866_s1 + $0x2a8] sm:$0xff]  ;;  %v360_v57 = vld [vmem:[%s2866_s1 + $0x2b8] sm:$0xff] }
  0x21   : > { %v631_v59 = vpack.c.bf16 %v351_v53, %v347_v51  ;;  %v634_v60 = vpack.c.bf16 %v358_v55, %v354_v54  ;;  %v353_v61 = vld [vmem:[%s2866_s1 + $0x280] sm:$0xff]  ;;  %v355_v63 = vld [vmem:[%s2866_s1 + $0x290] sm:$0xff]  ;;  %v636_v0 = vpack.c.bf16 %v360_v57, %v356_v56  ;;  %v362_v2 = vld [vmem:[%s2866_s1 + $0x2c8] sm:$0xff] }
  0x22   : > { %766 = vmatpush1.bf16.msra.mxu0 %v617_v22  ;;  %v357_v62 = vld [vmem:[%s2866_s1 + $0x2a0] sm:$0xff]  ;;  %v359_v1 = vld [vmem:[%s2866_s1 + $0x2b0] sm:$0xff]  ;;  %v366_v3 = vld [vmem:[%s2866_s1 + $0x2e8] sm:$0xff] }
  0x23   : > { %1105 = vmatpush1.bf16.msra.mxu1 %v619_v23  ;;  %767 = vmatprep.subr.bf16.mxu0 %v622_v24  ;;  %v364_v4 = vld [vmem:[%s2866_s1 + $0x2d8] sm:$0xff]  ;;  %v633_v6 = vpack.c.bf16 %v357_v62, %v353_v61  ;;  %v361_v7 = vld [vmem:[%s2866_s1 + $0x2c0] sm:$0xff]  ;;  %v635_v8 = vpack.c.bf16 %v359_v1, %v355_v63  ;;  %v638_v9 = vpack.c.bf16 %v366_v3, %v362_v2  ;;  %v363_v11 = vld [vmem:[%s2866_s1 + $0x2d0] sm:$0xff] }
  0x24   : > { %1106 = vmatprep.subr.bf16.mxu1 %v624_v28  ;;  %v368_v5 = vld [vmem:[%s2866_s1 + $0x2f8] sm:$0xff]  ;;  %v365_v10 = vld [vmem:[%s2866_s1 + $0x2e0] sm:$0xff]  ;;  %v367_v12 = vld [vmem:[%s2866_s1 + $0x2f0] sm:$0xff] }
  0x25   : > { %v640_v13 = vpack.c.bf16 %v368_v5, %v364_v4  ;;  %v370_v14 = vld [vmem:[%s2866_s1 + $0x308] sm:$0xff]  ;;  %v372_v17 = vld [vmem:[%s2866_s1 + $0x318] sm:$0xff]  ;;  %v159_v19 = vld [vmem:[%s2026_s16 + $0x30] sm:$0xff]  ;;  %v637_v20 = vpack.c.bf16 %v365_v10, %v361_v7  ;;  %v639_v22 = vpack.c.bf16 %v367_v12, %v363_v11 }
  0x26   : > { %768 = vmatpush1.bf16.msra.mxu0 %v621_v34  ;;  %v374_v15 = vld [vmem:[%s2866_s1 + $0x328] sm:$0xff]  ;;  %v376_v18 = vld [vmem:[%s2866_s1 + $0x338] sm:$0xff]  ;;  %v369_v24 = vld [vmem:[%s2866_s1 + $0x300] sm:$0xff] }
  0x27   : > { %1107 = vmatpush1.bf16.msra.mxu1 %v623_v35  ;;  %769 = vmatprep.subr.bf16.mxu0 %v626_v36  ;;  %v154_v16 = vld [vmem:[%s2026_s16 + $0x8] sm:$0xff]  ;;  %v642_v23 = vpack.c.bf16 %v374_v15, %v370_v14  ;;  %v373_v25 = vld [vmem:[%s2866_s1 + $0x320] sm:$0xff]  ;;  %v371_v26 = vld [vmem:[%s2866_s1 + $0x310] sm:$0xff]  ;;  %v644_v27 = vpack.c.bf16 %v376_v18, %v372_v17 }
  0x28   : > { %1108 = vmatprep.subr.bf16.mxu1 %v628_v40  ;;  %v234_v21 = vpack.c.bf16 %v159_v19, %v154_v16  ;;  %v375_v28 = vld [vmem:[%s2866_s1 + $0x330] sm:$0xff]  ;;  %v378_v29 = vld [vmem:[%s2866_s1 + $0x348] sm:$0xff]  ;;  %v380_v31 = vld [vmem:[%s2866_s1 + $0x358] sm:$0xff]  ;;  %v641_v33 = vpack.c.bf16 %v373_v25, %v369_v24 }
  0x29   : > { %v382_v30 = vld [vmem:[%s2866_s1 + $0x368] sm:$0xff]  ;;  %v384_v32 = vld [vmem:[%s2866_s1 + $0x378] sm:$0xff]  ;;  %v643_v34 = vpack.c.bf16 %v375_v28, %v371_v26  ;;  %v377_v36 = vld [vmem:[%s2866_s1 + $0x340] sm:$0xff] }
  0x2a   : > { %770 = vmatpush1.bf16.msra.mxu0 %v625_v46  ;;  %785 = vmatprep.mubr.bf16.mxu0 %v234_v21  ;;  %v646_v35 = vpack.c.bf16 %v382_v30, %v378_v29  ;;  %v381_v37 = vld [vmem:[%s2866_s1 + $0x360] sm:$0xff]  ;;  %v379_v38 = vld [vmem:[%s2866_s1 + $0x350] sm:$0xff]  ;;  %v648_v39 = vpack.c.bf16 %v384_v32, %v380_v31  ;;  %v386_v41 = vld [vmem:[%s2866_s1 + $0x388] sm:$0xff] }
  0x2b   : > { %1109 = vmatpush1.bf16.msra.mxu1 %v627_v47  ;;  %771 = vmatprep.subr.bf16.mxu0 %v630_v48  ;;  %v383_v40 = vld [vmem:[%s2866_s1 + $0x370] sm:$0xff]  ;;  %v390_v42 = vld [vmem:[%s2866_s1 + $0x3a8] sm:$0xff]  ;;  %v388_v43 = vld [vmem:[%s2866_s1 + $0x398] sm:$0xff]  ;;  %v645_v45 = vpack.c.bf16 %v381_v37, %v377_v36 }
  0x2c   : > { %1110 = vmatprep.subr.bf16.mxu1 %v632_v52  ;;  %1124 = vmatprep.mubr.bf16.mxu1 %v234_v21  ;;  %v392_v44 = vld [vmem:[%s2866_s1 + $0x3b8] sm:$0xff]  ;;  %v647_v46 = vpack.c.bf16 %v383_v40, %v379_v38  ;;  %v650_v47 = vpack.c.bf16 %v390_v42, %v386_v41  ;;  %v385_v48 = vld [vmem:[%s2866_s1 + $0x380] sm:$0xff]  ;;  %v387_v50 = vld [vmem:[%s2866_s1 + $0x390] sm:$0xff] }
  0x2d   : > { %v389_v49 = vld [vmem:[%s2866_s1 + $0x3a0] sm:$0xff]  ;;  %v652_v51 = vpack.c.bf16 %v392_v44, %v388_v43  ;;  %v391_v52 = vld [vmem:[%s2866_s1 + $0x3b0] sm:$0xff]  ;;  %v394_v53 = vld [vmem:[%s2866_s1 + $0x3c8] sm:$0xff] }
  0x2e   : > { %772 = vmatpush1.bf16.msra.mxu0 %v629_v58  ;;  %v398_v54 = vld [vmem:[%s2866_s1 + $0x3e8] sm:$0xff]  ;;  %v396_v55 = vld [vmem:[%s2866_s1 + $0x3d8] sm:$0xff]  ;;  %v649_v57 = vpack.c.bf16 %v389_v49, %v385_v48  ;;  %v651_v58 = vpack.c.bf16 %v391_v52, %v387_v50  ;;  %v397_v61 = vld [vmem:[%s2866_s1 + $0x3e0] sm:$0xff] }
  0x2f   : > { %1111 = vmatpush1.bf16.msra.mxu1 %v631_v59  ;;  %773 = vmatprep.subr.bf16.mxu0 %v634_v60  ;;  %v400_v56 = vld [vmem:[%s2866_s1 + $0x3f8] sm:$0xff]  ;;  %v654_v59 = vpack.c.bf16 %v398_v54, %v394_v53  ;;  %v393_v60 = vld [vmem:[%s2866_s1 + $0x3c0] sm:$0xff]  ;;  %v395_v62 = vld [vmem:[%s2866_s1 + $0x3d0] sm:$0xff] }
  0x30   : > { %1112 = vmatprep.subr.bf16.mxu1 %v636_v0  ;;  %v656_v63 = vpack.c.bf16 %v400_v56, %v396_v55  ;;  %v399_v0 = vld [vmem:[%s2866_s1 + $0x3f0] sm:$0xff]  ;;  %v402_v1 = vld [vmem:[%s2866_s1 + $0x408] sm:$0xff]  ;;  %v404_v3 = vld [vmem:[%s2866_s1 + $0x418] sm:$0xff]  ;;  %v653_v5 = vpack.c.bf16 %v397_v61, %v393_v60 }
  0x31   : > { %v406_v2 = vld [vmem:[%s2866_s1 + $0x428] sm:$0xff]  ;;  %v408_v4 = vld [vmem:[%s2866_s1 + $0x438] sm:$0xff]  ;;  %v405_v11 = vld [vmem:[%s2866_s1 + $0x420] sm:$0xff] }
  0x32   : > { %774 = vmatpush1.bf16.msra.mxu0 %v633_v6  ;;  %v153_v6 = vld [vmem:[%s2026_s16] sm:$0xff]  ;;  %v158_v7 = vld [vmem:[%s2026_s16 + $0x28] sm:$0xff]  ;;  %v658_v10 = vpack.c.bf16 %v406_v2, %v402_v1  ;;  %v403_v12 = vld [vmem:[%s2866_s1 + $0x410] sm:$0xff]  ;;  %v660_v14 = vpack.c.bf16 %v408_v4, %v404_v3 }
  0x33   : > { %1113 = vmatpush1.bf16.msra.mxu1 %v635_v8  ;;  %775 = vmatprep.subr.bf16.mxu0 %v638_v9  ;;  %v401_v8 = vld [vmem:[%s2866_s1 + $0x400] sm:$0xff]  ;;  %v655_v9 = vpack.c.bf16 %v399_v0, %v395_v62  ;;  %v410_v15 = vld [vmem:[%s2866_s1 + $0x448] sm:$0xff]  ;;  %v412_v17 = vld [vmem:[%s2866_s1 + $0x458] sm:$0xff]  ;;  %v233_v18 = vpack.c.bf16 %v158_v7, %v153_v6 }
  0x34   : > { %1114 = vmatprep.subr.bf16.mxu1 %v640_v13  ;;  %v407_v13 = vld [vmem:[%s2866_s1 + $0x430] sm:$0xff]  ;;  %v414_v16 = vld [vmem:[%s2866_s1 + $0x468] sm:$0xff]  ;;  %v416_v19 = vld [vmem:[%s2866_s1 + $0x478] sm:$0xff] }
  0x35   : > { %v169_v21 = vld [vmem:[%s2026_s16 + $0x80] sm:$0xff]  ;;  %v662_v24 = vpack.c.bf16 %v414_v16, %v410_v15  ;;  %v664_v28 = vpack.c.bf16 %v416_v19, %v412_v17  ;;  %v415_v29 = vld [vmem:[%s2866_s1 + $0x470] sm:$0xff]  ;;  %v418_v31 = vld [vmem:[%s2866_s1 + $0x488] sm:$0xff] }
  0x36   : > { %776 = vmatpush1.bf16.msra.mxu0 %v637_v20  ;;  %v164_v20 = vld [vmem:[%s2026_s16 + $0x58] sm:$0xff]  ;;  %v409_v25 = vld [vmem:[%s2866_s1 + $0x440] sm:$0xff]  ;;  %v422_v32 = vld [vmem:[%s2866_s1 + $0x4a8] sm:$0xff] }
  0x37   : > { %1115 = vmatpush1.bf16.msra.mxu1 %v639_v22  ;;  %777 = vmatprep.subr.bf16.mxu0 %v642_v23  ;;  %v657_v22 = vpack.c.bf16 %v405_v11, %v401_v8  ;;  %v659_v23 = vpack.c.bf16 %v407_v13, %v403_v12  ;;  %v413_v26 = vld [vmem:[%s2866_s1 + $0x460] sm:$0xff]  ;;  %v239_v30 = vpack.c.bf16 %v169_v21, %v164_v20  ;;  %v163_v36 = vld [vmem:[%s2026_s16 + $0x50] sm:$0xff]  ;;  %v168_v37 = vld [vmem:[%s2026_s16 + $0x78] sm:$0xff] }
  0x38   : > { %1116 = vmatprep.subr.bf16.mxu1 %v644_v27  ;;  %v411_v27 = vld [vmem:[%s2866_s1 + $0x450] sm:$0xff]  ;;  %v417_v38 = vld [vmem:[%s2866_s1 + $0x480] sm:$0xff]  ;;  %v666_v40 = vpack.c.bf16 %v422_v32, %v418_v31  ;;  %v238_v48 = vpack.c.bf16 %v168_v37, %v163_v36  ;;  %v432_v49 = vld [vmem:[%s2866_s1 + $0x4f8] sm:$0xff] }
  0x39   : > { %v421_v41 = vld [vmem:[%s2866_s1 + $0x4a0] sm:$0xff]  ;;  %v419_v42 = vld [vmem:[%s2866_s1 + $0x490] sm:$0xff]  ;;  %v174_v50 = vld [vmem:[%s2026_s16 + $0xa8] sm:$0xff] }
  0x3a   : > { %778 = vmatpush1.bf16.msra.mxu0 %v641_v33  ;;  %v420_v33 = vld [vmem:[%s2866_s1 + $0x498] sm:$0xff]  ;;  %v423_v43 = vld [vmem:[%s2866_s1 + $0x4b0] sm:$0xff]  ;;  %v665_v52 = vpack.c.bf16 %v421_v41, %v417_v38  ;;  %v425_v55 = vld [vmem:[%s2866_s1 + $0x4c0] sm:$0xff] }
  0x3b   : > { %1117 = vmatpush1.bf16.msra.mxu1 %v643_v34  ;;  %779 = vmatprep.subr.bf16.mxu0 %v646_v35  ;;  %v424_v34 = vld [vmem:[%s2866_s1 + $0x4b8] sm:$0xff]  ;;  %v661_v35 = vpack.c.bf16 %v413_v26, %v409_v25  ;;  %v667_v53 = vpack.c.bf16 %v423_v43, %v419_v42  ;;  %v429_v56 = vld [vmem:[%s2866_s1 + $0x4e0] sm:$0xff]  ;;  %v434_v61 = vld [vmem:[%s2866_s1 + $0x508] sm:$0xff] }
  0x3c   : > { %1118 = vmatprep.subr.bf16.mxu1 %v648_v39  ;;  %v663_v39 = vpack.c.bf16 %v415_v29, %v411_v27  ;;  %v668_v44 = vpack.c.bf16 %v424_v34, %v420_v33  ;;  %v438_v62 = vld [vmem:[%s2866_s1 + $0x528] sm:$0xff]  ;;  %v440_v0 = vld [vmem:[%s2866_s1 + $0x538] sm:$0xff]  ;;  %v669_v1 = vpack.c.bf16 %v429_v56, %v425_v55  ;;  %v173_v2 = vld [vmem:[%s2026_s16 + $0xa0] sm:$0xff] }
  0x3d   : > { %v178_v3 = vld [vmem:[%s2026_s16 + $0xc8] sm:$0xff]  ;;  %v433_v4 = vld [vmem:[%s2866_s1 + $0x500] sm:$0xff]  ;;  %v674_v6 = vpack.c.bf16 %v438_v62, %v434_v61  ;;  %v435_v8 = vld [vmem:[%s2866_s1 + $0x510] sm:$0xff] }
  0x3e   : > { %780 = vmatpush1.bf16.msra.mxu0 %v645_v45  ;;  %v426_v45 = vld [vmem:[%s2866_s1 + $0x4c8] sm:$0xff]  ;;  %v437_v7 = vld [vmem:[%s2866_s1 + $0x520] sm:$0xff]  ;;  %v444_v13 = vld [vmem:[%s2866_s1 + $0x558] sm:$0xff] }
  0x3f   : > { %1119 = vmatpush1.bf16.msra.mxu1 %v647_v46  ;;  %781 = vmatprep.subr.bf16.mxu0 %v650_v47  ;;  %v430_v46 = vld [vmem:[%s2866_s1 + $0x4e8] sm:$0xff]  ;;  %v428_v47 = vld [vmem:[%s2866_s1 + $0x4d8] sm:$0xff]  ;;  %v189_v17 = vld [vmem:[%s2026_s16 + $0x120] sm:$0xff] }
  0x40   : > { %1120 = vmatprep.subr.bf16.mxu1 %v652_v51  ;;  %v179_v51 = vld [vmem:[%s2026_s16 + $0xd0] sm:$0xff]  ;;  %v670_v54 = vpack.c.bf16 %v430_v46, %v426_v45  ;;  %v442_v11 = vld [vmem:[%s2866_s1 + $0x548] sm:$0xff]  ;;  %v448_v15 = vld [vmem:[%s2866_s1 + $0x578] sm:$0xff] }
  0x41   : > { %v244_v60 = vpack.c.bf16 %v179_v51, %v174_v50  ;;  %v446_v12 = vld [vmem:[%s2866_s1 + $0x568] sm:$0xff]  ;;  %v184_v16 = vld [vmem:[%s2026_s16 + $0xf8] sm:$0xff]  ;;  %v441_v21 = vld [vmem:[%s2866_s1 + $0x540] sm:$0xff] }
  0x42   : > { %782 = vmatpush1.bf16.msra.mxu0 %v649_v57  ;;  %v427_v57 = vld [vmem:[%s2866_s1 + $0x4d0] sm:$0xff]  ;;  %v678_v20 = vpack.c.bf16 %v446_v12, %v442_v11  ;;  %v249_v26 = vpack.c.bf16 %v189_v17, %v184_v16  ;;  %v450_v27 = vld [vmem:[%s2866_s1 + $0x588] sm:$0xff]  ;;  %v452_v29 = vld [vmem:[%s2866_s1 + $0x598] sm:$0xff] }
  0x43   : > { %1121 = vmatpush1.bf16.msra.mxu1 %v651_v58  ;;  %783 = vmatprep.subr.bf16.mxu0 %v654_v59  ;;  %v672_v58 = vpack.c.bf16 %v432_v49, %v428_v47  ;;  %v431_v59 = vld [vmem:[%s2866_s1 + $0x4f0] sm:$0xff]  ;;  %v188_v33 = vld [vmem:[%s2026_s16 + $0x118] sm:$0xff]  ;;  %v449_v34 = vld [vmem:[%s2866_s1 + $0x580] sm:$0xff] }
  0x44   : > { %1122 = vmatprep.subr.bf16.mxu1 %v656_v63  ;;  %v436_v63 = vld [vmem:[%s2866_s1 + $0x518] sm:$0xff]  ;;  %v447_v25 = vld [vmem:[%s2866_s1 + $0x570] sm:$0xff]  ;;  %v453_v37 = vld [vmem:[%s2866_s1 + $0x5a0] sm:$0xff] }
  0x45   : > { %v183_v32 = vld [vmem:[%s2026_s16 + $0xf0] sm:$0xff]  ;;  %v458_v41 = vld [vmem:[%s2866_s1 + $0x5c8] sm:$0xff]  ;;  %v460_v43 = vld [vmem:[%s2866_s1 + $0x5d8] sm:$0xff] }
  0x46   : > { %784 = vmatpush1.bf16.msra.mxu0 %v653_v5  ;;  %v671_v5 = vpack.c.bf16 %v431_v59, %v427_v57  ;;  %v451_v38 = vld [vmem:[%s2866_s1 + $0x590] sm:$0xff]  ;;  %v462_v42 = vld [vmem:[%s2866_s1 + $0x5e8] sm:$0xff]  ;;  %v464_v45 = vld [vmem:[%s2866_s1 + $0x5f8] sm:$0xff] }
  0x47   : > { %1123 = vmatpush1.bf16.msra.mxu1 %v655_v9  ;;  %866 = vmatprep.subr.bf16.mxu0 %v658_v10  ;;  %v439_v9 = vld [vmem:[%s2866_s1 + $0x530] sm:$0xff]  ;;  %v676_v10 = vpack.c.bf16 %v440_v0, %v436_v63  ;;  %v194_v46 = vld [vmem:[%s2026_s16 + $0x148] sm:$0xff]  ;;  %v686_v50 = vpack.c.bf16 %v462_v42, %v458_v41  ;;  %v457_v51 = vld [vmem:[%s2866_s1 + $0x5c0] sm:$0xff] }
  0x48   : > { %1205 = vmatprep.subr.bf16.mxu1 %v660_v14  ;;  %v243_v14 = vpack.c.bf16 %v178_v3, %v173_v2  ;;  %v675_v19 = vpack.c.bf16 %v439_v9, %v435_v8  ;;  %v199_v47 = vld [vmem:[%s2026_s16 + $0x170] sm:$0xff]  ;;  %v466_v57 = vld [vmem:[%s2866_s1 + $0x608] sm:$0xff]  ;;  %v468_v59 = vld [vmem:[%s2866_s1 + $0x618] sm:$0xff] }
  0x49   : > { %786 = vmatmul.mubr.bf16.vlgmr.msra.gmra.mrb[0].mxu0 %v233_v18  ;;  %v463_v55 = vld [vmem:[%s2866_s1 + $0x5f0] sm:$0xff]  ;;  %v254_v56 = vpack.c.bf16 %v199_v47, %v194_v46  ;;  %v193_v62 = vld [vmem:[%s2026_s16 + $0x140] sm:$0xff]  ;;  %v198_v63 = vld [vmem:[%s2026_s16 + $0x168] sm:$0xff] }
  0x4a   : > { %1125 = vmatmul.mubr.bf16.vlgmr.msra.gmra.mrb[0].mxu1 %v233_v18  ;;  %867 = vmatpush1.bf16.msra.mxu0 %v657_v22  ;;  %v673_v18 = vpack.c.bf16 %v437_v7, %v433_v4  ;;  %v445_v22 = vld [vmem:[%s2866_s1 + $0x560] sm:$0xff]  ;;  %v467_v4 = vld [vmem:[%s2866_s1 + $0x610] sm:$0xff]  ;;  %v474_v7 = vld [vmem:[%s2866_s1 + $0x648] sm:$0xff] }
  0x4b   : > { %1206 = vmatpush1.bf16.msra.mxu1 %v659_v23  ;;  %868 = vmatprep.subr.bf16.mxu0 %v662_v24  ;;  %v443_v23 = vld [vmem:[%s2866_s1 + $0x550] sm:$0xff]  ;;  %v680_v24 = vpack.c.bf16 %v448_v15, %v444_v13  ;;  %v677_v31 = vpack.c.bf16 %v445_v22, %v441_v21  ;;  %v465_v0 = vld [vmem:[%s2866_s1 + $0x600] sm:$0xff]  ;;  %v478_v8 = vld [vmem:[%s2866_s1 + $0x668] sm:$0xff] }
  0x4c   : > { %1207 = vmatprep.subr.bf16.mxu1 %v664_v28  ;;  %795 = vmatprep.mubr.bf16.mxu0 %v239_v30  ;;  %v454_v28 = vld [vmem:[%s2866_s1 + $0x5a8] sm:$0xff]  ;;  %v469_v3 = vld [vmem:[%s2866_s1 + $0x620] sm:$0xff]  ;;  %v476_v9 = vld [vmem:[%s2866_s1 + $0x658] sm:$0xff]  ;;  %v694_v16 = vpack.c.bf16 %v478_v8, %v474_v7 }
  0x4d   : > { %1134 = vmatprep.mubr.bf16.mxu1 %v239_v30  ;;  %v456_v30 = vld [vmem:[%s2866_s1 + $0x5b8] sm:$0xff]  ;;  %v682_v36 = vpack.c.bf16 %v454_v28, %v450_v27  ;;  %v209_v13 = vld [vmem:[%s2026_s16 + $0x1c0] sm:$0xff]  ;;  %v479_v21 = vld [vmem:[%s2866_s1 + $0x670] sm:$0xff] }
  0x4e   : > { %869 = vmatpush1.bf16.msra.mxu0 %v661_v35  ;;  %v679_v35 = vpack.c.bf16 %v447_v25, %v443_v23  ;;  %v480_v11 = vld [vmem:[%s2866_s1 + $0x678] sm:$0xff]  ;;  %v473_v17 = vld [vmem:[%s2866_s1 + $0x640] sm:$0xff]  ;;  %v482_v23 = vld [vmem:[%s2866_s1 + $0x688] sm:$0xff] }
  0x4f   : > { %1208 = vmatpush1.bf16.msra.mxu1 %v663_v39  ;;  %870 = vmatprep.subr.bf16.mxu0 %v666_v40  ;;  %v455_v39 = vld [vmem:[%s2866_s1 + $0x5b0] sm:$0xff]  ;;  %v684_v40 = vpack.c.bf16 %v456_v30, %v452_v29  ;;  %v204_v12 = vld [vmem:[%s2026_s16 + $0x198] sm:$0xff]  ;;  %v481_v30 = vld [vmem:[%s2866_s1 + $0x680] sm:$0xff] }
  0x50   : > { %1209 = vmatprep.subr.bf16.mxu1 %v668_v44  ;;  %v248_v44 = vpack.c.bf16 %v188_v33, %v183_v32  ;;  %v683_v49 = vpack.c.bf16 %v455_v39, %v451_v38  ;;  %v259_v22 = vpack.c.bf16 %v209_v13, %v204_v12  ;;  %v484_v25 = vld [vmem:[%s2866_s1 + $0x698] sm:$0xff]  ;;  %v203_v28 = vld [vmem:[%s2026_s16 + $0x190] sm:$0xff]  ;;  %v485_v33 = vld [vmem:[%s2866_s1 + $0x6a0] sm:$0xff] }
  0x51   : > { %796 = vmatmul.mubr.bf16.gmra.mrb[4].mxu0 %v238_v48  ;;  %v208_v29 = vld [vmem:[%s2026_s16 + $0x1b8] sm:$0xff]  ;;  %v494_v38 = vld [vmem:[%s2866_s1 + $0x6e8] sm:$0xff]  ;;  %v489_v47 = vld [vmem:[%s2866_s1 + $0x6c0] sm:$0xff] }
  0x52   : > { %1135 = vmatmul.mubr.bf16.gmra.mrb[4].mxu1 %v238_v48  ;;  %871 = vmatpush1.bf16.msra.mxu0 %v665_v52  ;;  %v681_v48 = vpack.c.bf16 %v453_v37, %v449_v34  ;;  %v461_v52 = vld [vmem:[%s2866_s1 + $0x5e0] sm:$0xff]  ;;  %v483_v34 = vld [vmem:[%s2866_s1 + $0x690] sm:$0xff]  ;;  %v490_v37 = vld [vmem:[%s2866_s1 + $0x6c8] sm:$0xff] }
  0x53   : > { %1210 = vmatpush1.bf16.msra.mxu1 %v667_v53  ;;  %872 = vmatprep.subr.bf16.mxu0 %v670_v54  ;;  %v459_v53 = vld [vmem:[%s2866_s1 + $0x5d0] sm:$0xff]  ;;  %v688_v54 = vpack.c.bf16 %v464_v45, %v460_v43  ;;  %v685_v61 = vpack.c.bf16 %v461_v52, %v457_v51  ;;  %v492_v39 = vld [vmem:[%s2866_s1 + $0x6d8] sm:$0xff]  ;;  %v214_v42 = vld [vmem:[%s2026_s16 + $0x1e8] sm:$0xff]  ;;  %v702_v46 = vpack.c.bf16 %v494_v38, %v490_v37 }
  0x54   : > { %1211 = vmatprep.subr.bf16.mxu1 %v672_v58  ;;  %805 = vmatprep.mubr.bf16.mxu0 %v244_v60  ;;  %v470_v58 = vld [vmem:[%s2866_s1 + $0x628] sm:$0xff]  ;;  %v496_v41 = vld [vmem:[%s2866_s1 + $0x6f8] sm:$0xff]  ;;  %v219_v43 = vld [vmem:[%s2026_s16 + $0x210] sm:$0xff] }
  0x55   : > { %1144 = vmatprep.mubr.bf16.mxu1 %v244_v60  ;;  %v472_v60 = vld [vmem:[%s2866_s1 + $0x638] sm:$0xff]  ;;  %v690_v2 = vpack.c.bf16 %v470_v58, %v466_v57  ;;  %v495_v51 = vld [vmem:[%s2866_s1 + $0x6f0] sm:$0xff]  ;;  %v264_v52 = vpack.c.bf16 %v219_v43, %v214_v42  ;;  %v213_v58 = vld [vmem:[%s2026_s16 + $0x1e0] sm:$0xff] }
  0x56   : > { %873 = vmatpush1.bf16.msra.mxu0 %v669_v1  ;;  %v687_v1 = vpack.c.bf16 %v463_v55, %v459_v53  ;;  %v498_v53 = vld [vmem:[%s2866_s1 + $0x708] sm:$0xff]  ;;  %v500_v55 = vld [vmem:[%s2866_s1 + $0x718] sm:$0xff]  ;;  %v505_v13 = vld [vmem:[%s2866_s1 + $0x740] sm:$0xff] }
  0x57   : > { %1212 = vmatpush1.bf16.msra.mxu1 %v671_v5  ;;  %874 = vmatprep.subr.bf16.mxu0 %v674_v6  ;;  %v471_v5 = vld [vmem:[%s2866_s1 + $0x630] sm:$0xff]  ;;  %v692_v6 = vpack.c.bf16 %v472_v60, %v468_v59  ;;  %v218_v59 = vld [vmem:[%s2026_s16 + $0x208] sm:$0xff]  ;;  %v497_v60 = vld [vmem:[%s2866_s1 + $0x700] sm:$0xff] }
  0x58   : > { %1213 = vmatprep.subr.bf16.mxu1 %v676_v10  ;;  %v253_v10 = vpack.c.bf16 %v198_v63, %v193_v62  ;;  %v691_v15 = vpack.c.bf16 %v471_v5, %v467_v4  ;;  %v501_v63 = vld [vmem:[%s2866_s1 + $0x720] sm:$0xff]  ;;  %v510_v4 = vld [vmem:[%s2866_s1 + $0x768] sm:$0xff]  ;;  %v508_v5 = vld [vmem:[%s2866_s1 + $0x758] sm:$0xff] }
  0x59   : > { %806 = vmatmul.mubr.bf16.gmra.mrb[8].mxu0 %v243_v14  ;;  %v512_v7 = vld [vmem:[%s2866_s1 + $0x778] sm:$0xff]  ;;  %v521_v43 = vld [vmem:[%s2866_s1 + $0x7c0] sm:$0xff] }
  0x5a   : > { %1145 = vmatmul.mubr.bf16.gmra.mrb[8].mxu1 %v243_v14  ;;  %875 = vmatpush1.bf16.msra.mxu0 %v673_v18  ;;  %v689_v14 = vpack.c.bf16 %v469_v3, %v465_v0  ;;  %v477_v18 = vld [vmem:[%s2866_s1 + $0x660] sm:$0xff]  ;;  %v499_v0 = vld [vmem:[%s2866_s1 + $0x710] sm:$0xff]  ;;  %v506_v3 = vld [vmem:[%s2866_s1 + $0x748] sm:$0xff] }
  0x5b   : > { %1214 = vmatpush1.bf16.msra.mxu1 %v675_v19  ;;  %876 = vmatprep.subr.bf16.mxu0 %v678_v20  ;;  %v475_v19 = vld [vmem:[%s2866_s1 + $0x650] sm:$0xff]  ;;  %v696_v20 = vpack.c.bf16 %v480_v11, %v476_v9  ;;  %v693_v27 = vpack.c.bf16 %v477_v18, %v473_v17  ;;  %v224_v8 = vld [vmem:[%s2026_s16 + $0x238] sm:$0xff]  ;;  %v229_v9 = vld [vmem:[%s2026_s16 + $0x260] sm:$0xff]  ;;  %v710_v12 = vpack.c.bf16 %v510_v4, %v506_v3 }
  0x5c   : > { %1215 = vmatprep.subr.bf16.mxu1 %v680_v24  ;;  %815 = vmatprep.mubr.bf16.mxu0 %v249_v26  ;;  %v486_v24 = vld [vmem:[%s2866_s1 + $0x6a8] sm:$0xff]  ;;  %v511_v17 = vld [vmem:[%s2866_s1 + $0x770] sm:$0xff]  ;;  %v269_v18 = vpack.c.bf16 %v229_v9, %v224_v8  ;;  %v528_v37 = vld [vmem:[%s2866_s1 + $0x7f8] sm:$0xff] }
  0x5d   : > { %1154 = vmatprep.mubr.bf16.mxu1 %v249_v26  ;;  %v488_v26 = vld [vmem:[%s2866_s1 + $0x6b8] sm:$0xff]  ;;  %v698_v32 = vpack.c.bf16 %v486_v24, %v482_v23  ;;  %v223_v24 = vld [vmem:[%s2026_s16 + $0x230] sm:$0xff]  ;;  %v542_v3 = vld [vmem:[%s2866_s1 + $0x868] sm:$0xff] }
  0x5e   : > { %877 = vmatpush1.bf16.msra.mxu0 %v677_v31  ;;  %v695_v31 = vpack.c.bf16 %v479_v21, %v475_v19  ;;  %v514_v19 = vld [vmem:[%s2866_s1 + $0x788] sm:$0xff]  ;;  %v516_v21 = vld [vmem:[%s2866_s1 + $0x798] sm:$0xff]  ;;  %v537_v9 = vld [vmem:[%s2866_s1 + $0x840] sm:$0xff] }
  0x5f   : > { %1216 = vmatpush1.bf16.msra.mxu1 %v679_v35  ;;  %878 = vmatprep.subr.bf16.mxu0 %v682_v36  ;;  %v487_v35 = vld [vmem:[%s2866_s1 + $0x6b0] sm:$0xff]  ;;  %v700_v36 = vpack.c.bf16 %v488_v26, %v484_v25  ;;  %v228_v25 = vld [vmem:[%s2026_s16 + $0x258] sm:$0xff]  ;;  %v513_v26 = vld [vmem:[%s2866_s1 + $0x780] sm:$0xff] }
  0x60   : > { %1217 = vmatprep.subr.bf16.mxu1 %v684_v40  ;;  %v258_v40 = vpack.c.bf16 %v208_v29, %v203_v28  ;;  %v699_v45 = vpack.c.bf16 %v487_v35, %v483_v34  ;;  %v517_v29 = vld [vmem:[%s2866_s1 + $0x7a0] sm:$0xff]  ;;  %v526_v34 = vld [vmem:[%s2866_s1 + $0x7e8] sm:$0xff]  ;;  %v524_v35 = vld [vmem:[%s2866_s1 + $0x7d8] sm:$0xff] }
  0x61   : > { %816 = vmatmul.mubr.bf16.gmra.mrb[12].mxu0 %v248_v44  ;;  %v156_v38 = vld [vmem:[%s2026_s16 + $0x18] sm:$0xff] }
  0x62   : > { %1155 = vmatmul.mubr.bf16.gmra.mrb[12].mxu1 %v248_v44  ;;  %879 = vmatpush1.bf16.msra.mxu0 %v681_v48  ;;  %v697_v44 = vpack.c.bf16 %v485_v33, %v481_v30  ;;  %v493_v48 = vld [vmem:[%s2866_s1 + $0x6e0] sm:$0xff]  ;;  %v515_v30 = vld [vmem:[%s2866_s1 + $0x790] sm:$0xff]  ;;  %v522_v33 = vld [vmem:[%s2866_s1 + $0x7c8] sm:$0xff] }
  0x63   : > { %1218 = vmatpush1.bf16.msra.mxu1 %v683_v49  ;;  %880 = vmatprep.subr.bf16.mxu0 %v686_v50  ;;  %v491_v49 = vld [vmem:[%s2866_s1 + $0x6d0] sm:$0xff]  ;;  %v704_v50 = vpack.c.bf16 %v496_v41, %v492_v39  ;;  %v701_v57 = vpack.c.bf16 %v493_v48, %v489_v47  ;;  %v161_v39 = vld [vmem:[%s2026_s16 + $0x40] sm:$0xff]  ;;  %v718_v42 = vpack.c.bf16 %v526_v34, %v522_v33  ;;  %v558_v33 = vld [vmem:[%s2866_s1 + $0x8e8] sm:$0xff] }
  0x64   : > { %1219 = vmatprep.subr.bf16.mxu1 %v688_v54  ;;  %825 = vmatprep.mubr.bf16.mxu0 %v254_v56  ;;  %v502_v54 = vld [vmem:[%s2866_s1 + $0x728] sm:$0xff]  ;;  %v527_v47 = vld [vmem:[%s2866_s1 + $0x7f0] sm:$0xff]  ;;  %v236_v48 = vpack.c.bf16 %v161_v39, %v156_v38 }
  0x65   : > { %1164 = vmatprep.mubr.bf16.mxu1 %v254_v56  ;;  %v504_v56 = vld [vmem:[%s2866_s1 + $0x738] sm:$0xff]  ;;  %v706_v62 = vpack.c.bf16 %v502_v54, %v498_v53  ;;  %v155_v54 = vld [vmem:[%s2026_s16 + $0x10] sm:$0xff] }
  0x66   : > { %881 = vmatpush1.bf16.msra.mxu0 %v685_v61  ;;  %v703_v61 = vpack.c.bf16 %v495_v51, %v491_v49  ;;  %v530_v49 = vld [vmem:[%s2866_s1 + $0x808] sm:$0xff]  ;;  %v532_v51 = vld [vmem:[%s2866_s1 + $0x818] sm:$0xff]  ;;  %v175_v38 = vld [vmem:[%s2026_s16 + $0xb0] sm:$0xff] }
  0x67   : > { %1220 = vmatpush1.bf16.msra.mxu1 %v687_v1  ;;  %882 = vmatprep.subr.bf16.mxu0 %v690_v2  ;;  %v503_v1 = vld [vmem:[%s2866_s1 + $0x730] sm:$0xff]  ;;  %v708_v2 = vpack.c.bf16 %v504_v56, %v500_v55  ;;  %v160_v55 = vld [vmem:[%s2026_s16 + $0x38] sm:$0xff] }
  0x68   : > { %1221 = vmatprep.subr.bf16.mxu1 %v692_v6  ;;  %v263_v6 = vpack.c.bf16 %v218_v59, %v213_v58  ;;  %v707_v11 = vpack.c.bf16 %v503_v1, %v499_v0  ;;  %v529_v58 = vld [vmem:[%s2866_s1 + $0x800] sm:$0xff]  ;;  %v171_v0 = vld [vmem:[%s2026_s16 + $0x90] sm:$0xff]  ;;  %v235_v1 = vpack.c.bf16 %v160_v55, %v155_v54 }
  0x69   : > { %826 = vmatmul.mubr.bf16.gmra.mrb[16].mxu0 %v253_v10  ;;  %v533_v59 = vld [vmem:[%s2866_s1 + $0x820] sm:$0xff] }
  0x6a   : > { %1165 = vmatmul.mubr.bf16.gmra.mrb[16].mxu1 %v253_v10  ;;  %883 = vmatpush1.bf16.msra.mxu0 %v689_v14  ;;  %v705_v10 = vpack.c.bf16 %v501_v63, %v497_v60  ;;  %v509_v14 = vld [vmem:[%s2866_s1 + $0x760] sm:$0xff]  ;;  %v531_v60 = vld [vmem:[%s2866_s1 + $0x810] sm:$0xff]  ;;  %v166_v63 = vld [vmem:[%s2026_s16 + $0x68] sm:$0xff]  ;;  %v721_v4 = vpack.c.bf16 %v533_v59, %v529_v58 }
  0x6b   : > { %1222 = vmatpush1.bf16.msra.mxu1 %v691_v15  ;;  %884 = vmatprep.subr.bf16.mxu0 %v694_v16  ;;  %v507_v15 = vld [vmem:[%s2866_s1 + $0x750] sm:$0xff]  ;;  %v712_v16 = vpack.c.bf16 %v512_v7, %v508_v5  ;;  %v709_v23 = vpack.c.bf16 %v509_v14, %v505_v13  ;;  %v540_v5 = vld [vmem:[%s2866_s1 + $0x858] sm:$0xff]  ;;  %v241_v8 = vpack.c.bf16 %v171_v0, %v166_v63  ;;  %v546_v14 = vld [vmem:[%s2866_s1 + $0x888] sm:$0xff] }
  0x6c   : > { %1223 = vmatprep.subr.bf16.mxu1 %v696_v20  ;;  %835 = vmatprep.mubr.bf16.mxu0 %v259_v22  ;;  %v518_v20 = vld [vmem:[%s2866_s1 + $0x7a8] sm:$0xff]  ;;  %v543_v13 = vld [vmem:[%s2866_s1 + $0x870] sm:$0xff] }
  0x6d   : > { %1174 = vmatprep.mubr.bf16.mxu1 %v259_v22  ;;  %v520_v22 = vld [vmem:[%s2866_s1 + $0x7b8] sm:$0xff]  ;;  %v714_v28 = vpack.c.bf16 %v518_v20, %v514_v19  ;;  %v165_v19 = vld [vmem:[%s2026_s16 + $0x60] sm:$0xff]  ;;  %v170_v20 = vld [vmem:[%s2026_s16 + $0x88] sm:$0xff] }
  0x6e   : > { %885 = vmatpush1.bf16.msra.mxu0 %v693_v27  ;;  %v711_v27 = vpack.c.bf16 %v511_v17, %v507_v15  ;;  %v550_v15 = vld [vmem:[%s2866_s1 + $0x8a8] sm:$0xff]  ;;  %v548_v17 = vld [vmem:[%s2866_s1 + $0x898] sm:$0xff]  ;;  %v563_v58 = vld [vmem:[%s2866_s1 + $0x910] sm:$0xff] }
  0x6f   : > { %1224 = vmatpush1.bf16.msra.mxu1 %v695_v31  ;;  %886 = vmatprep.subr.bf16.mxu0 %v698_v32  ;;  %v519_v31 = vld [vmem:[%s2866_s1 + $0x7b0] sm:$0xff]  ;;  %v716_v32 = vpack.c.bf16 %v520_v22, %v516_v21  ;;  %v574_v63 = vld [vmem:[%s2866_s1 + $0x968] sm:$0xff] }
  0x70   : > { %1225 = vmatprep.subr.bf16.mxu1 %v700_v36  ;;  %v268_v36 = vpack.c.bf16 %v228_v25, %v223_v24  ;;  %v715_v41 = vpack.c.bf16 %v519_v31, %v515_v30  ;;  %v181_v24 = vld [vmem:[%s2026_s16 + $0xe0] sm:$0xff]  ;;  %v730_v25 = vpack.c.bf16 %v550_v15, %v546_v14  ;;  %v240_v30 = vpack.c.bf16 %v170_v20, %v165_v19  ;;  %v551_v31 = vld [vmem:[%s2866_s1 + $0x8b0] sm:$0xff]  ;;  %v190_v14 = vld [vmem:[%s2026_s16 + $0x128] sm:$0xff] }
  0x71   : > { %836 = vmatmul.mubr.bf16.gmra.mrb[20].mxu0 %v258_v40  ;;  %v580_v15 = vld [vmem:[%s2866_s1 + $0x998] sm:$0xff] }
  0x72   : > { %1175 = vmatmul.mubr.bf16.gmra.mrb[20].mxu1 %v258_v40  ;;  %887 = vmatpush1.bf16.msra.mxu0 %v697_v44  ;;  %v713_v40 = vpack.c.bf16 %v517_v29, %v513_v26  ;;  %v525_v44 = vld [vmem:[%s2866_s1 + $0x7e0] sm:$0xff]  ;;  %v547_v29 = vld [vmem:[%s2866_s1 + $0x890] sm:$0xff] }
  0x73   : > { %1226 = vmatpush1.bf16.msra.mxu1 %v699_v45  ;;  %888 = vmatprep.subr.bf16.mxu0 %v702_v46  ;;  %v523_v45 = vld [vmem:[%s2866_s1 + $0x7d0] sm:$0xff]  ;;  %v720_v46 = vpack.c.bf16 %v528_v37, %v524_v35  ;;  %v717_v53 = vpack.c.bf16 %v525_v44, %v521_v43  ;;  %v556_v35 = vld [vmem:[%s2866_s1 + $0x8d8] sm:$0xff]  ;;  %v731_v39 = vpack.c.bf16 %v551_v31, %v547_v29  ;;  %v590_v29 = vld [vmem:[%s2866_s1 + $0x9e8] sm:$0xff] }
  0x74   : > { %1227 = vmatprep.subr.bf16.mxu1 %v704_v50  ;;  %845 = vmatprep.mubr.bf16.mxu0 %v264_v52  ;;  %v534_v50 = vld [vmem:[%s2866_s1 + $0x828] sm:$0xff]  ;;  %v719_v56 = vpack.c.bf16 %v527_v47, %v523_v45  ;;  %v555_v43 = vld [vmem:[%s2866_s1 + $0x8d0] sm:$0xff]  ;;  %v588_v31 = vld [vmem:[%s2866_s1 + $0x9d8] sm:$0xff] }
  0x75   : > { %1184 = vmatprep.mubr.bf16.mxu1 %v264_v52  ;;  %v536_v52 = vld [vmem:[%s2866_s1 + $0x838] sm:$0xff]  ;;  %v559_v45 = vld [vmem:[%s2866_s1 + $0x8f0] sm:$0xff]  ;;  %v566_v47 = vld [vmem:[%s2866_s1 + $0x928] sm:$0xff] }
  0x76   : > { %889 = vmatpush1.bf16.msra.mxu0 %v701_v57  ;;  %v722_v57 = vpack.c.bf16 %v534_v50, %v530_v49  ;;  %v564_v49 = vld [vmem:[%s2866_s1 + $0x918] sm:$0xff]  ;;  %v735_v54 = vpack.c.bf16 %v559_v45, %v555_v43  ;;  %v206_v43 = vld [vmem:[%s2026_s16 + $0x1a8] sm:$0xff] }
  0x77   : > { %1228 = vmatpush1.bf16.msra.mxu1 %v703_v61  ;;  %890 = vmatprep.subr.bf16.mxu0 %v706_v62  ;;  %v724_v61 = vpack.c.bf16 %v536_v52, %v532_v51  ;;  %v535_v62 = vld [vmem:[%s2866_s1 + $0x830] sm:$0xff]  ;;  %v568_v50 = vld [vmem:[%s2866_s1 + $0x938] sm:$0xff]  ;;  %v186_v51 = vld [vmem:[%s2026_s16 + $0x108] sm:$0xff] }
  0x78   : > { %1229 = vmatprep.subr.bf16.mxu1 %v708_v2  ;;  %v538_v2 = vld [vmem:[%s2866_s1 + $0x848] sm:$0xff]  ;;  %v723_v7 = vpack.c.bf16 %v535_v62, %v531_v60  ;;  %v191_v52 = vld [vmem:[%s2026_s16 + $0x130] sm:$0xff]  ;;  %v740_v60 = vpack.c.bf16 %v568_v50, %v564_v49  ;;  %v205_v49 = vld [vmem:[%s2026_s16 + $0x1a0] sm:$0xff] }
  0x79   : > { %846 = vmatmul.mubr.bf16.gmra.mrb[24].mxu0 %v263_v6  ;;  %v570_v62 = vld [vmem:[%s2866_s1 + $0x948] sm:$0xff]  ;;  %v251_v0 = vpack.c.bf16 %v191_v52, %v186_v51  ;;  %v216_v51 = vld [vmem:[%s2026_s16 + $0x1f8] sm:$0xff]  ;;  %v221_v52 = vld [vmem:[%s2026_s16 + $0x220] sm:$0xff] }
  0x7a   : > { %1185 = vmatmul.mubr.bf16.gmra.mrb[24].mxu1 %v263_v6  ;;  %891 = vmatpush1.bf16.msra.mxu0 %v705_v10  ;;  %v544_v6 = vld [vmem:[%s2866_s1 + $0x878] sm:$0xff]  ;;  %v541_v10 = vld [vmem:[%s2866_s1 + $0x860] sm:$0xff]  ;;  %v210_v50 = vld [vmem:[%s2026_s16 + $0x1c8] sm:$0xff] }
  0x7b   : > { %1230 = vmatpush1.bf16.msra.mxu1 %v707_v11  ;;  %892 = vmatprep.subr.bf16.mxu0 %v710_v12  ;;  %v539_v11 = vld [vmem:[%s2866_s1 + $0x850] sm:$0xff]  ;;  %v726_v12 = vpack.c.bf16 %v542_v3, %v538_v2  ;;  %v725_v21 = vpack.c.bf16 %v541_v10, %v537_v9  ;;  %v576_v2 = vld [vmem:[%s2866_s1 + $0x978] sm:$0xff] }
  0x7c   : > { %1231 = vmatprep.subr.bf16.mxu1 %v712_v16  ;;  %855 = vmatprep.mubr.bf16.mxu0 %v269_v18  ;;  %v728_v16 = vpack.c.bf16 %v544_v6, %v540_v5  ;;  %v727_v22 = vpack.c.bf16 %v543_v13, %v539_v11  ;;  %v742_v6 = vpack.c.bf16 %v574_v63, %v570_v62  ;;  %v571_v9 = vld [vmem:[%s2866_s1 + $0x950] sm:$0xff]  ;;  %v582_v13 = vld [vmem:[%s2866_s1 + $0x9a8] sm:$0xff] }
  0x7d   : > { %1194 = vmatprep.mubr.bf16.mxu1 %v269_v18  ;;  %v552_v18 = vld [vmem:[%s2866_s1 + $0x8b8] sm:$0xff]  ;;  %v575_v11 = vld [vmem:[%s2866_s1 + $0x970] sm:$0xff]  ;;  %v230_v62 = vld [vmem:[%s2026_s16 + $0x268] sm:$0xff] }
  0x7e   : > { %893 = vmatpush1.bf16.msra.mxu0 %v709_v23  ;;  %v176_v23 = vld [vmem:[%s2026_s16 + $0xb8] sm:$0xff]  ;;  %v732_v26 = vpack.c.bf16 %v552_v18, %v548_v17  ;;  %v201_v18 = vld [vmem:[%s2026_s16 + $0x180] sm:$0xff]  ;;  %v743_v20 = vpack.c.bf16 %v575_v11, %v571_v9 }
  0x7f   : > { %1232 = vmatpush1.bf16.msra.mxu1 %v711_v27  ;;  %894 = vmatprep.subr.bf16.mxu0 %v714_v28  ;;  %v545_v27 = vld [vmem:[%s2866_s1 + $0x880] sm:$0xff]  ;;  %v246_v34 = vpack.c.bf16 %v181_v24, %v176_v23  ;;  %v196_v17 = vld [vmem:[%s2026_s16 + $0x158] sm:$0xff]  ;;  %v579_v24 = vld [vmem:[%s2866_s1 + $0x990] sm:$0xff] }
  0x80   : > { %1233 = vmatprep.subr.bf16.mxu1 %v716_v32  ;;  %v549_v28 = vld [vmem:[%s2866_s1 + $0x8a0] sm:$0xff]  ;;  %v554_v32 = vld [vmem:[%s2866_s1 + $0x8c8] sm:$0xff]  ;;  %v192_v11 = vld [vmem:[%s2026_s16 + $0x138] sm:$0xff] }
  0x81   : > { %856 = vmatmul.mubr.bf16.gmra.mrb[28].mxu0 %v268_v36  ;;  %v729_v37 = vpack.c.bf16 %v549_v28, %v545_v27  ;;  %v581_v23 = vld [vmem:[%s2866_s1 + $0x9a0] sm:$0xff]  ;;  %v583_v27 = vld [vmem:[%s2866_s1 + $0x9b0] sm:$0xff]  ;;  %v586_v28 = vld [vmem:[%s2866_s1 + $0x9c8] sm:$0xff] }
  0x82   : > { %1195 = vmatmul.mubr.bf16.gmra.mrb[28].mxu1 %v268_v36  ;;  %895 = vmatpush1.bf16.msra.mxu0 %v713_v40  ;;  %v560_v36 = vld [vmem:[%s2866_s1 + $0x8f8] sm:$0xff]  ;;  %v734_v40 = vpack.c.bf16 %v558_v33, %v554_v32 }
  0x83   : > { %1234 = vmatpush1.bf16.msra.mxu1 %v715_v41  ;;  %896 = vmatprep.subr.bf16.mxu0 %v718_v42  ;;  %v553_v41 = vld [vmem:[%s2866_s1 + $0x8c0] sm:$0xff]  ;;  %v736_v44 = vpack.c.bf16 %v560_v36, %v556_v35  ;;  %v592_v32 = vld [vmem:[%s2866_s1 + $0x9f8] sm:$0xff]  ;;  %v750_v35 = vpack.c.bf16 %v590_v29, %v586_v28 }
  0x84   : > { %1235 = vmatprep.subr.bf16.mxu1 %v720_v46  ;;  %898 = vmatprep.mubr.bf16.mxu0 %v236_v48  ;;  %v557_v42 = vld [vmem:[%s2866_s1 + $0x8e0] sm:$0xff]  ;;  %v562_v46 = vld [vmem:[%s2866_s1 + $0x908] sm:$0xff] }
  0x85   : > { %1237 = vmatprep.mubr.bf16.mxu1 %v236_v48  ;;  %v180_v48 = vld [vmem:[%s2026_s16 + $0xd8] sm:$0xff]  ;;  %v738_v55 = vpack.c.bf16 %v566_v47, %v562_v46  ;;  %v585_v36 = vld [vmem:[%s2866_s1 + $0x9c0] sm:$0xff] }
  0x86   : > { %897 = vmatpush1.bf16.msra.mxu0 %v717_v53  ;;  %v733_v53 = vpack.c.bf16 %v557_v42, %v553_v41  ;;  %v245_v59 = vpack.c.bf16 %v180_v48, %v175_v38  ;;  %v752_v38 = vpack.c.bf16 %v592_v32, %v588_v31  ;;  %v195_v41 = vld [vmem:[%s2026_s16 + $0x150] sm:$0xff]  ;;  %v200_v42 = vld [vmem:[%s2026_s16 + $0x178] sm:$0xff] }
  0x87   : > { %1236 = vmatpush1.bf16.msra.mxu1 %v719_v56  ;;  %979 = vmatprep.subr.bf16.mxu0 %v722_v57  ;;  %v561_v56 = vld [vmem:[%s2866_s1 + $0x900] sm:$0xff]  ;;  %v255_v47 = vpack.c.bf16 %v200_v42, %v195_v41 }
  0x88   : > { %1318 = vmatprep.subr.bf16.mxu1 %v724_v61  ;;  %v565_v57 = vld [vmem:[%s2866_s1 + $0x920] sm:$0xff]  ;;  %v567_v61 = vld [vmem:[%s2866_s1 + $0x930] sm:$0xff] }
  0x89   : > { %899 = vmatmul.mubr.bf16.vlgmr.msra.gmra.mrb[0].mxu0 %v235_v1  ;;  %v737_v3 = vpack.c.bf16 %v565_v57, %v561_v56  ;;  %v739_v5 = vpack.c.bf16 %v567_v61, %v563_v58  ;;  %v220_v56 = vld [vmem:[%s2026_s16 + $0x218] sm:$0xff]  ;;  %v226_v57 = vld [vmem:[%s2026_s16 + $0x248] sm:$0xff]  ;;  %v231_v58 = vld [vmem:[%s2026_s16 + $0x270] sm:$0xff] }
  0x8a   : > { %1238 = vmatmul.mubr.bf16.vlgmr.msra.gmra.mrb[0].mxu1 %v235_v1  ;;  %980 = vmatpush1.bf16.msra.mxu0 %v721_v4  ;;  %v572_v1 = vld [vmem:[%s2866_s1 + $0x958] sm:$0xff]  ;;  %v185_v4 = vld [vmem:[%s2026_s16 + $0x100] sm:$0xff] }
  0x8b   : > { %1319 = vmatpush1.bf16.msra.mxu1 %v723_v7  ;;  %908 = vmatprep.mubr.bf16.mxu0 %v241_v8  ;;  %v569_v7 = vld [vmem:[%s2866_s1 + $0x940] sm:$0xff]  ;;  %v744_v10 = vpack.c.bf16 %v576_v2, %v572_v1  ;;  %v162_v2 = vld [vmem:[%s2026_s16 + $0x48] sm:$0xff] }
  0x8c   : > { %1247 = vmatprep.mubr.bf16.mxu1 %v241_v8  ;;  %981 = vmatprep.subr.bf16.mxu0 %v726_v12  ;;  %v573_v8 = vld [vmem:[%s2866_s1 + $0x960] sm:$0xff]  ;;  %v578_v12 = vld [vmem:[%s2866_s1 + $0x988] sm:$0xff] }
  0x8d   : > { %1320 = vmatprep.subr.bf16.mxu1 %v728_v16  ;;  %v584_v16 = vld [vmem:[%s2866_s1 + $0x9b8] sm:$0xff]  ;;  %v741_v19 = vpack.c.bf16 %v573_v8, %v569_v7  ;;  %v225_v61 = vld [vmem:[%s2026_s16 + $0x240] sm:$0xff]  ;;  %v182_v8 = vld [vmem:[%s2026_s16 + $0xe8] sm:$0xff] }
  0x8e   : > { %982 = vmatpush1.bf16.msra.mxu0 %v725_v21  ;;  %v746_v21 = vpack.c.bf16 %v582_v13, %v578_v12  ;;  %v270_v63 = vpack.c.bf16 %v230_v62, %v225_v61  ;;  %v157_v1 = vld [vmem:[%s2026_s16 + $0x20] sm:$0xff] }
  0x8f   : > { %1321 = vmatpush1.bf16.msra.mxu1 %v727_v22  ;;  %983 = vmatprep.subr.bf16.mxu0 %v730_v25  ;;  %v577_v22 = vld [vmem:[%s2866_s1 + $0x980] sm:$0xff]  ;;  %v250_v25 = vpack.c.bf16 %v190_v14, %v185_v4  ;;  %v167_v4 = vld [vmem:[%s2026_s16 + $0x70] sm:$0xff]  ;;  %v202_v14 = vld [vmem:[%s2026_s16 + $0x188] sm:$0xff] }
  0x90   : > { %1322 = vmatprep.subr.bf16.mxu1 %v732_v26  ;;  %v748_v26 = vpack.c.bf16 %v584_v16, %v580_v15  ;;  %v745_v33 = vpack.c.bf16 %v581_v23, %v577_v22  ;;  %v177_v7 = vld [vmem:[%s2026_s16 + $0xc0] sm:$0xff]  ;;  %v207_v16 = vld [vmem:[%s2026_s16 + $0x1b0] sm:$0xff]  ;;  %v232_v23 = vld [vmem:[%s2026_s16 + $0x278] sm:$0xff] }
  0x91   : > { %909 = vmatmul.mubr.bf16.gmra.mrb[4].mxu0 %v240_v30  ;;  %v247_v9 = vpack.c.bf16 %v182_v8, %v177_v7  ;;  %v197_v13 = vld [vmem:[%s2026_s16 + $0x160] sm:$0xff]  ;;  %v227_v22 = vld [vmem:[%s2026_s16 + $0x250] sm:$0xff] }
  0x92   : > { %1248 = vmatmul.mubr.bf16.gmra.mrb[4].mxu1 %v240_v30  ;;  %918 = vmatprep.mubr.bf16.mxu0 %v246_v34  ;;  %v256_v30 = vpack.c.bf16 %v201_v18, %v196_v17  ;;  %v257_v15 = vpack.c.bf16 %v202_v14, %v197_v13  ;;  %v212_v17 = vld [vmem:[%s2026_s16 + $0x1d8] sm:$0xff] }
  0x93   : > { %1257 = vmatprep.mubr.bf16.mxu1 %v246_v34  ;;  %984 = vmatpush1.bf16.msra.mxu0 %v729_v37  ;;  %v747_v34 = vpack.c.bf16 %v583_v27, %v579_v24  ;;  %v589_v37 = vld [vmem:[%s2866_s1 + $0x9e0] sm:$0xff]  ;;  %v262_v18 = vpack.c.bf16 %v212_v17, %v207_v16  ;;  %v272_v24 = vpack.c.bf16 %v232_v23, %v227_v22 }
  0x94   : > { %1323 = vmatpush1.bf16.msra.mxu1 %v731_v39  ;;  %985 = vmatprep.subr.bf16.mxu0 %v734_v40  ;;  %v587_v39 = vld [vmem:[%s2866_s1 + $0x9d0] sm:$0xff]  ;;  %v749_v45 = vpack.c.bf16 %v589_v37, %v585_v36 }
  0x95   : > { %1324 = vmatprep.subr.bf16.mxu1 %v736_v44  ;;  %v591_v40 = vld [vmem:[%s2866_s1 + $0x9f0] sm:$0xff] }
  0x96   : > { %v211_v44 = vld [vmem:[%s2026_s16 + $0x1d0] sm:$0xff]  ;;  %v751_v46 = vpack.c.bf16 %v591_v40, %v587_v39 }
  0x97   : > { %986 = vmatpush1.bf16.msra.mxu0 %v733_v53  ;;  %v261_v48 = vpack.c.bf16 %v211_v44, %v206_v43  ;;  %v260_v53 = vpack.c.bf16 %v210_v50, %v205_v49 }
  0x98   : > { %1325 = vmatpush1.bf16.msra.mxu1 %v735_v54  ;;  %987 = vmatprep.subr.bf16.mxu0 %v738_v55  ;;  %v266_v54 = vpack.c.bf16 %v221_v52, %v216_v51  ;;  %v215_v55 = vld [vmem:[%s2026_s16 + $0x1f0] sm:$0xff] }
  0x99   : > { %919 = vmatmul.mubr.bf16.gmra.mrb[8].mxu0 %v245_v59  ;;  %1326 = vmatprep.subr.bf16.mxu1 %v740_v60  ;;  %v271_v60 = vpack.c.bf16 %v231_v58, %v226_v57 }
  0x9a   : > { %1258 = vmatmul.mubr.bf16.gmra.mrb[8].mxu1 %v245_v59  ;;  %928 = vmatprep.mubr.bf16.mxu0 %v251_v0  ;;  %v265_v59 = vpack.c.bf16 %v220_v56, %v215_v55 }
  0x9b   : > { %1267 = vmatprep.mubr.bf16.mxu1 %v251_v0  ;;  %988 = vmatpush1.bf16.msra.mxu0 %v737_v3  ;;  %v1712_v0 = vmov 0   ;;  %v237_v3 = vpack.c.bf16 %v162_v2, %v157_v1 }
  0x9c   : > { %1327 = vmatpush1.bf16.msra.mxu1 %v739_v5  ;;  %989 = vmatprep.subr.bf16.mxu0 %v742_v6  ;;  %v172_v5 = vld [vmem:[%s2026_s16 + $0x98] sm:$0xff] }
  0x9d   : > { %1328 = vmatprep.subr.bf16.mxu1 %v744_v10  ;;  %v242_v6 = vpack.c.bf16 %v172_v5, %v167_v4  ;;  %v187_v10 = vld [vmem:[%s2026_s16 + $0x110] sm:$0xff] }
  0x9e   : > { %v252_v12 = vpack.c.bf16 %v192_v11, %v187_v10 }
  0x9f   : > { %990 = vmatpush1.bf16.msra.mxu0 %v741_v19  ;;  %v217_v19 = vld [vmem:[%s2026_s16 + $0x200] sm:$0xff] }
  0xa0   : > { %1329 = vmatpush1.bf16.msra.mxu1 %v743_v20  ;;  %991 = vmatprep.subr.bf16.mxu0 %v746_v21  ;;  %v222_v20 = vld [vmem:[%s2026_s16 + $0x228] sm:$0xff] }
  0xa1   : > { %929 = vmatmul.mubr.bf16.gmra.mrb[12].mxu0 %v250_v25  ;;  %1330 = vmatprep.subr.bf16.mxu1 %v748_v26  ;;  %v267_v21 = vpack.c.bf16 %v222_v20, %v217_v19 }
  0xa2   : > { %1268 = vmatmul.mubr.bf16.gmra.mrb[12].mxu1 %v250_v25  ;;  %938 = vmatprep.mubr.bf16.mxu0 %v256_v30 }
  0xa3   : > { %1277 = vmatprep.mubr.bf16.mxu1 %v256_v30  ;;  %992 = vmatpush1.bf16.msra.mxu0 %v745_v33 }
  0xa4   : > { %1331 = vmatpush1.bf16.msra.mxu1 %v747_v34  ;;  %993 = vmatprep.subr.bf16.mxu0 %v750_v35 }
  0xa5   : > { %1332 = vmatprep.subr.bf16.mxu1 %v752_v38 }
  0xa7   : > { %994 = vmatpush1.bf16.msra.mxu0 %v749_v45 }
  0xa8   : > { %1333 = vmatpush1.bf16.msra.mxu1 %v751_v46 }
  0xa9   : > { %939 = vmatmul.mubr.bf16.gmra.mrb[16].mxu0 %v255_v47 }
  0xaa   : > { %1278 = vmatmul.mubr.bf16.gmra.mrb[16].mxu1 %v255_v47  ;;  %948 = vmatprep.mubr.bf16.mxu0 %v261_v48 }
  0xab   : > { %1287 = vmatprep.mubr.bf16.mxu1 %v261_v48 }
  0xb1   : > { %949 = vmatmul.mubr.bf16.gmra.mrb[20].mxu0 %v260_v53 }
  0xb2   : > { %1288 = vmatmul.mubr.bf16.gmra.mrb[20].mxu1 %v260_v53  ;;  %958 = vmatprep.mubr.bf16.mxu0 %v266_v54 }
  0xb3   : > { %1297 = vmatprep.mubr.bf16.mxu1 %v266_v54 }
  0xb9   : > { %959 = vmatmul.mubr.bf16.gmra.mrb[24].mxu0 %v265_v59 }
  0xba   : > { %1298 = vmatmul.mubr.bf16.gmra.mrb[24].mxu1 %v265_v59  ;;  %968 = vmatprep.mubr.bf16.mxu0 %v271_v60 }
  0xbb   : > { %1307 = vmatprep.mubr.bf16.mxu1 %v271_v60 }
  0xc1   : > { %969 = vmatmul.mubr.bf16.gmra.mrb[28].mxu0 %v270_v63 }
  0xc2   : > { %1308 = vmatmul.mubr.bf16.gmra.mrb[28].mxu1 %v270_v63  ;;  %1011 = vmatprep.mubr.bf16.mxu0 %v1712_v0 }
  0xc3   : > { %1350 = vmatprep.mubr.bf16.mxu1 %v1712_v0 }
  0xc9   : > { %1012 = vmatmul.mubr.bf16.vlgmr.msra.gmra.mrb[0].mxu0 %v237_v3 }
  0xca   : > { %1351 = vmatmul.mubr.bf16.vlgmr.msra.gmra.mrb[0].mxu1 %v237_v3  ;;  %1021 = vmatprep.mubr.bf16.mxu0 %v1712_v0 }
  0xcb   : > { %1360 = vmatprep.mubr.bf16.mxu1 %v1712_v0 }
  0xd1   : > { %1022 = vmatmul.mubr.bf16.gmra.mrb[4].mxu0 %v242_v6 }
  0xd2   : > { %1361 = vmatmul.mubr.bf16.gmra.mrb[4].mxu1 %v242_v6  ;;  %1031 = vmatprep.mubr.bf16.mxu0 %v1712_v0 }
  0xd3   : > { %1370 = vmatprep.mubr.bf16.mxu1 %v1712_v0 }
  0xd9   : > { %1032 = vmatmul.mubr.bf16.gmra.mrb[8].mxu0 %v247_v9 }
  0xda   : > { %1371 = vmatmul.mubr.bf16.gmra.mrb[8].mxu1 %v247_v9  ;;  %1041 = vmatprep.mubr.bf16.mxu0 %v1712_v0 }
  0xdb   : > { %1380 = vmatprep.mubr.bf16.mxu1 %v1712_v0 }
  0xe1   : > { %1042 = vmatmul.mubr.bf16.gmra.mrb[12].mxu0 %v252_v12 }
  0xe2   : > { %1381 = vmatmul.mubr.bf16.gmra.mrb[12].mxu1 %v252_v12  ;;  %1051 = vmatprep.mubr.bf16.mxu0 %v1712_v0 }
  0xe3   : > { %1390 = vmatprep.mubr.bf16.mxu1 %v1712_v0 }
  0xe9   : > { %1052 = vmatmul.mubr.bf16.gmra.mrb[16].mxu0 %v257_v15 }
  0xea   : > { %1391 = vmatmul.mubr.bf16.gmra.mrb[16].mxu1 %v257_v15  ;;  %1061 = vmatprep.mubr.bf16.mxu0 %v1712_v0 }
  0xeb   : > { %1400 = vmatprep.mubr.bf16.mxu1 %v1712_v0 }
  0xf1   : > { %1062 = vmatmul.mubr.bf16.gmra.mrb[20].mxu0 %v262_v18 }
  0xf2   : > { %1401 = vmatmul.mubr.bf16.gmra.mrb[20].mxu1 %v262_v18  ;;  %1071 = vmatprep.mubr.bf16.mxu0 %v1712_v0 }
  0xf3   : > { %1410 = vmatprep.mubr.bf16.mxu1 %v1712_v0 }
  0xf9   : > { %1072 = vmatmul.mubr.bf16.gmra.mrb[24].mxu0 %v267_v21 }
  0xfa   : > { %1411 = vmatmul.mubr.bf16.gmra.mrb[24].mxu1 %v267_v21  ;;  %1081 = vmatprep.mubr.bf16.mxu0 %v1712_v0 }
  0xfb   : > { %1420 = vmatprep.mubr.bf16.mxu1 %v1712_v0 }
 0x101   : > { %1082 = vmatmul.mubr.bf16.gmra.mrb[28].mxu0 %v272_v24 }
 0x102   : > { %1421 = vmatmul.mubr.bf16.gmra.mrb[28].mxu1 %v272_v24 }
 0x19c   : > { %v1013_v25 = vpop.f32.mrb[0].mxu0 }
 0x19d   : > { %1431 = vst [vmem:[%s2796_s26] sm:$0xff] %v1013_v25  ;;  %v1352_v26 = vpop.f32.mrb[0].mxu1  ;;  %v1015_v27 = vpop.f32.mrb[1].mxu0 }
 0x19e   : > { %1433 = vst [vmem:[%s2796_s26 + $0x10] sm:$0xff] %v1352_v26  ;;  %1432 = vst [vmem:[%s2796_s26 + $0x8] sm:$0xff] %v1015_v27  ;;  %v1354_v28 = vpop.f32.mrb[1].mxu1  ;;  %v1017_v29 = vpop.f32.mrb[2].mxu0 }
 0x19f   : > { %1434 = vst [vmem:[%s2796_s26 + $0x18] sm:$0xff] %v1354_v28  ;;  %1435 = vst [vmem:[%s2796_s26 + $0x20] sm:$0xff] %v1017_v29  ;;  %v1356_v30 = vpop.f32.mrb[2].mxu1  ;;  %v1019_v31 = vpop.f32.mrb[3].mxu0 }
 0x1a0   : > { %1437 = vst [vmem:[%s2796_s26 + $0x30] sm:$0xff] %v1356_v30  ;;  %1436 = vst [vmem:[%s2796_s26 + $0x28] sm:$0xff] %v1019_v31  ;;  %v1358_v32 = vpop.f32.mrb[3].mxu1 }
 0x1a1   : > { %1438 = vst [vmem:[%s2796_s26 + $0x38] sm:$0xff] %v1358_v32 }
 0x1a4   : > { %v1023_v33 = vpop.f32.mrb[4].mxu0 }
 0x1a5   : > { %1439 = vst [vmem:[%s2796_s26 + $0x40] sm:$0xff] %v1023_v33  ;;  %v1362_v34 = vpop.f32.mrb[4].mxu1  ;;  %v1025_v35 = vpop.f32.mrb[5].mxu0 }
 0x1a6   : > { %1441 = vst [vmem:[%s2796_s26 + $0x50] sm:$0xff] %v1362_v34  ;;  %1440 = vst [vmem:[%s2796_s26 + $0x48] sm:$0xff] %v1025_v35  ;;  %v1364_v36 = vpop.f32.mrb[5].mxu1  ;;  %v1027_v37 = vpop.f32.mrb[6].mxu0 }
 0x1a7   : > { %1442 = vst [vmem:[%s2796_s26 + $0x58] sm:$0xff] %v1364_v36  ;;  %1443 = vst [vmem:[%s2796_s26 + $0x60] sm:$0xff] %v1027_v37  ;;  %v1366_v38 = vpop.f32.mrb[6].mxu1  ;;  %v1029_v39 = vpop.f32.mrb[7].mxu0 }
 0x1a8   : > { %1445 = vst [vmem:[%s2796_s26 + $0x70] sm:$0xff] %v1366_v38  ;;  %1444 = vst [vmem:[%s2796_s26 + $0x68] sm:$0xff] %v1029_v39  ;;  %v1368_v40 = vpop.f32.mrb[7].mxu1 }
 0x1a9   : > { %1446 = vst [vmem:[%s2796_s26 + $0x78] sm:$0xff] %v1368_v40 }
 0x1ac   : > { %v1033_v41 = vpop.f32.mrb[8].mxu0 }
 0x1ad   : > { %1447 = vst [vmem:[%s2796_s26 + $0x80] sm:$0xff] %v1033_v41  ;;  %v1372_v42 = vpop.f32.mrb[8].mxu1  ;;  %v1035_v43 = vpop.f32.mrb[9].mxu0 }
 0x1ae   : > { %1449 = vst [vmem:[%s2796_s26 + $0x90] sm:$0xff] %v1372_v42  ;;  %1448 = vst [vmem:[%s2796_s26 + $0x88] sm:$0xff] %v1035_v43  ;;  %v1374_v44 = vpop.f32.mrb[9].mxu1  ;;  %v1037_v45 = vpop.f32.mrb[10].mxu0 }
 0x1af   : > { %1450 = vst [vmem:[%s2796_s26 + $0x98] sm:$0xff] %v1374_v44  ;;  %1451 = vst [vmem:[%s2796_s26 + $0xa0] sm:$0xff] %v1037_v45  ;;  %v1376_v46 = vpop.f32.mrb[10].mxu1  ;;  %v1039_v47 = vpop.f32.mrb[11].mxu0 }
 0x1b0   : > { %1453 = vst [vmem:[%s2796_s26 + $0xb0] sm:$0xff] %v1376_v46  ;;  %1452 = vst [vmem:[%s2796_s26 + $0xa8] sm:$0xff] %v1039_v47  ;;  %v1378_v48 = vpop.f32.mrb[11].mxu1 }
 0x1b1   : > { %1454 = vst [vmem:[%s2796_s26 + $0xb8] sm:$0xff] %v1378_v48 }
 0x1b4   : > { %v1043_v49 = vpop.f32.mrb[12].mxu0 }
 0x1b5   : > { %1455 = vst [vmem:[%s2796_s26 + $0xc0] sm:$0xff] %v1043_v49  ;;  %v1382_v50 = vpop.f32.mrb[12].mxu1  ;;  %v1045_v51 = vpop.f32.mrb[13].mxu0 }
 0x1b6   : > { %1457 = vst [vmem:[%s2796_s26 + $0xd0] sm:$0xff] %v1382_v50  ;;  %1456 = vst [vmem:[%s2796_s26 + $0xc8] sm:$0xff] %v1045_v51  ;;  %v1384_v52 = vpop.f32.mrb[13].mxu1  ;;  %v1047_v53 = vpop.f32.mrb[14].mxu0 }
 0x1b7   : > { %1458 = vst [vmem:[%s2796_s26 + $0xd8] sm:$0xff] %v1384_v52  ;;  %1459 = vst [vmem:[%s2796_s26 + $0xe0] sm:$0xff] %v1047_v53  ;;  %v1386_v54 = vpop.f32.mrb[14].mxu1  ;;  %v1049_v55 = vpop.f32.mrb[15].mxu0 }
 0x1b8   : > { %1461 = vst [vmem:[%s2796_s26 + $0xf0] sm:$0xff] %v1386_v54  ;;  %1460 = vst [vmem:[%s2796_s26 + $0xe8] sm:$0xff] %v1049_v55  ;;  %v1388_v56 = vpop.f32.mrb[15].mxu1 }
 0x1b9   : > { %1462 = vst [vmem:[%s2796_s26 + $0xf8] sm:$0xff] %v1388_v56 }
 0x1bc   : > { %v1053_v57 = vpop.f32.mrb[16].mxu0 }
 0x1bd   : > { %1463 = vst [vmem:[%s2796_s26 + $0x100] sm:$0xff] %v1053_v57  ;;  %v1392_v58 = vpop.f32.mrb[16].mxu1  ;;  %v1055_v59 = vpop.f32.mrb[17].mxu0 }
 0x1be   : > { %1465 = vst [vmem:[%s2796_s26 + $0x110] sm:$0xff] %v1392_v58  ;;  %1464 = vst [vmem:[%s2796_s26 + $0x108] sm:$0xff] %v1055_v59  ;;  %v1394_v60 = vpop.f32.mrb[17].mxu1  ;;  %v1057_v61 = vpop.f32.mrb[18].mxu0 }
 0x1bf   : > { %1466 = vst [vmem:[%s2796_s26 + $0x118] sm:$0xff] %v1394_v60  ;;  %1467 = vst [vmem:[%s2796_s26 + $0x120] sm:$0xff] %v1057_v61  ;;  %v1396_v62 = vpop.f32.mrb[18].mxu1  ;;  %v1059_v63 = vpop.f32.mrb[19].mxu0 }
 0x1c0   : > { %1469 = vst [vmem:[%s2796_s26 + $0x130] sm:$0xff] %v1396_v62  ;;  %1468 = vst [vmem:[%s2796_s26 + $0x128] sm:$0xff] %v1059_v63  ;;  %v1398_v0 = vpop.f32.mrb[19].mxu1 }
 0x1c1   : > { %1470 = vst [vmem:[%s2796_s26 + $0x138] sm:$0xff] %v1398_v0 }
 0x1c4   : > { %v1063_v1 = vpop.f32.mrb[20].mxu0 }
 0x1c5   : > { %1471 = vst [vmem:[%s2796_s26 + $0x140] sm:$0xff] %v1063_v1  ;;  %v1402_v2 = vpop.f32.mrb[20].mxu1  ;;  %v1065_v3 = vpop.f32.mrb[21].mxu0 }
 0x1c6   : > { %1473 = vst [vmem:[%s2796_s26 + $0x150] sm:$0xff] %v1402_v2  ;;  %1472 = vst [vmem:[%s2796_s26 + $0x148] sm:$0xff] %v1065_v3  ;;  %v1404_v4 = vpop.f32.mrb[21].mxu1  ;;  %v1067_v5 = vpop.f32.mrb[22].mxu0 }
 0x1c7   : > { %1474 = vst [vmem:[%s2796_s26 + $0x158] sm:$0xff] %v1404_v4  ;;  %1475 = vst [vmem:[%s2796_s26 + $0x160] sm:$0xff] %v1067_v5  ;;  %v1406_v6 = vpop.f32.mrb[22].mxu1  ;;  %v1069_v7 = vpop.f32.mrb[23].mxu0 }
 0x1c8   : > { %1477 = vst [vmem:[%s2796_s26 + $0x170] sm:$0xff] %v1406_v6  ;;  %1476 = vst [vmem:[%s2796_s26 + $0x168] sm:$0xff] %v1069_v7  ;;  %v1408_v8 = vpop.f32.mrb[23].mxu1 }
 0x1c9   : > { %1478 = vst [vmem:[%s2796_s26 + $0x178] sm:$0xff] %v1408_v8 }
 0x1cc   : > { %v1073_v9 = vpop.f32.mrb[24].mxu0 }
 0x1cd   : > { %1479 = vst [vmem:[%s2796_s26 + $0x180] sm:$0xff] %v1073_v9  ;;  %v1412_v10 = vpop.f32.mrb[24].mxu1  ;;  %v1075_v11 = vpop.f32.mrb[25].mxu0 }
 0x1ce   : > { %1481 = vst [vmem:[%s2796_s26 + $0x190] sm:$0xff] %v1412_v10  ;;  %1480 = vst [vmem:[%s2796_s26 + $0x188] sm:$0xff] %v1075_v11  ;;  %v1414_v12 = vpop.f32.mrb[25].mxu1  ;;  %v1077_v13 = vpop.f32.mrb[26].mxu0 }
 0x1cf   : > { %1482 = vst [vmem:[%s2796_s26 + $0x198] sm:$0xff] %v1414_v12  ;;  %1483 = vst [vmem:[%s2796_s26 + $0x1a0] sm:$0xff] %v1077_v13  ;;  %v1416_v14 = vpop.f32.mrb[26].mxu1  ;;  %v1079_v15 = vpop.f32.mrb[27].mxu0 }
 0x1d0   : > { %1485 = vst [vmem:[%s2796_s26 + $0x1b0] sm:$0xff] %v1416_v14  ;;  %1484 = vst [vmem:[%s2796_s26 + $0x1a8] sm:$0xff] %v1079_v15  ;;  %v1418_v16 = vpop.f32.mrb[27].mxu1 }
 0x1d1   : > { %1486 = vst [vmem:[%s2796_s26 + $0x1b8] sm:$0xff] %v1418_v16 }
 0x1d4   : > { %v1083_v17 = vpop.f32.mrb[28].mxu0 }
 0x1d5   : > { %1487 = vst [vmem:[%s2796_s26 + $0x1c0] sm:$0xff] %v1083_v17  ;;  %v1422_v18 = vpop.f32.mrb[28].mxu1  ;;  %v1085_v19 = vpop.f32.mrb[29].mxu0 }
 0x1d6   : > { %1489 = vst [vmem:[%s2796_s26 + $0x1d0] sm:$0xff] %v1422_v18  ;;  %1488 = vst [vmem:[%s2796_s26 + $0x1c8] sm:$0xff] %v1085_v19  ;;  %v1424_v20 = vpop.f32.mrb[29].mxu1  ;;  %v1087_v21 = vpop.f32.mrb[30].mxu0 }
 0x1d7   : > { %1490 = vst [vmem:[%s2796_s26 + $0x1d8] sm:$0xff] %v1424_v20  ;;  %1491 = vst [vmem:[%s2796_s26 + $0x1e0] sm:$0xff] %v1087_v21  ;;  %v1426_v22 = vpop.f32.mrb[30].mxu1  ;;  %v1089_v23 = vpop.f32.mrb[31].mxu0 }
 0x1d8   : > { %1493 = vst [vmem:[%s2796_s26 + $0x1f0] sm:$0xff] %v1426_v22  ;;  %1492 = vst [vmem:[%s2796_s26 + $0x1e8] sm:$0xff] %v1089_v23  ;;  %v1428_v24 = vpop.f32.mrb[31].mxu1 }
 0x1d9   : > { %1494 = vst [vmem:[%s2796_s26 + $0x1f8] sm:$0xff] %v1428_v24 }
 0x1da PF: > { %s12_s9 = sadd.s32 1, %s1710_s9  }
 0x1db   : > { %p9_p4 = scmp.ge.s32.totalorder %s12_s9, 4  }
 0x1dd   :  { %11 = sbr.rel (!%p9_p4) target bundleno = 1 (0x1), region = 58 }

// kernel: gat_classifier_forward.6
= control target key start
LH: loop header
LB: loop body
LE: loop exit
PB: predicated region body
PF: predicated region fallthrough
CT: control target
= control target key end

     0   :  { %s2268_s21 = smov 0   ;;  %s2270_s22 = smov 0   ;;  %s3323_s0 = inlined_call_operand.vmem [shape: f32[256,512], index: 0, kind: input, shape index: {}, may-alias: {0,1}]   ;;  %s3324_s1 = inlined_call_operand.vmem [shape: f32[256,512], index: 1, kind: input, shape index: {}, may-alias: {0,1}]   ;;  %s3325_s2 = inlined_call_operand.vmem [shape: f32[1,512], index: 2, kind: input, shape index: {}]   ;;  %s3326_s3 = inlined_call_operand.vmem [shape: f32[1,512], index: 3, kind: input, shape index: {}]   ;;  %s3327_s4 = inlined_call_operand.vmem [shape: s8[256,256], index: 4, kind: input, shape index: {}]   ;;  %s3328_s5 = inlined_call_operand.vmem [shape: f32[1,512], index: 5, kind: input, shape index: {}]   ;;  %s3329_s6 = inlined_call_operand.vmem [shape: f32[256,512], index: 6, kind: output, shape index: {}]  }
   0x1   :  { %s2272_s23 = smov 0   ;;  %s2274_s24 = smov 0  }
   0x2   :  { %s2276_s25 = smov 0   ;;  %s2278_s26 = smov 0  }
   0x3   :  { %s2280_s27 = smov 0   ;;  %s2282_s28 = smov 0  }
   0x4   :  { %s2284_s29 = smov 0  }
   0x5 LB: > { %s25_s30 = sadd.s32 1, %s2222_s27  ;;  %s28_s7 = sadd.s32 1, %s2226_s28  ;;  %s2230_s29 = sphi %s2284_s29, %s16_s29   ;;  %s2226_s28 = sphi %s2282_s28, %s3423_s28   ;;  %s2222_s27 = sphi %s2280_s27, %s3422_s27   ;;  %s2218_s26 = sphi %s2278_s26, %s3421_s26   ;;  %s2214_s25 = sphi %s2276_s25, %s3420_s25   ;;  %s2210_s24 = sphi %s2274_s24, %s3419_s24   ;;  %s2206_s23 = sphi %s2272_s23, %s3418_s23   ;;  %s2202_s22 = sphi %s2270_s22, %s3417_s22   ;;  %s2198_s21 = sphi %s2268_s21, %s3416_s21  }
   0x6   : > { %p26_p0 = scmp.ge.s32.totalorder %s25_s30, 2  ;;  %s1785_s8 = sadd.s32 4294967295, %s2230_s29  }
   0x7   : > { %p44_p1 = scmp.ne.s32.totalorder %s2210_s24, %s2206_s23  ;;  %s37_s9 = sadd.s32 1, %s2210_s24 }
   0x8   : > { %s3425_s30 = smov (%p26_p0, %s25_s30), 0  ;;  %s3427_s7 = smov (!%p26_p0, %s28_s7), %s2226_s28 }
   0x9   : > { %p45_p2 = scmp.eq.s32.totalorder %s2230_s29, 0  ;;  %p30_p3 = scmp.ge.s32.totalorder %s3427_s7, 4 }
   0xa   : > { %s32_s10 = ssub.s32 %s2222_s27, %s3425_s30  ;;  %p70_p5 = scmp.ne.s32.totalorder %s2202_s22, %s2198_s21 }
   0xb   : > { %p2328_p4 = por %p45_p2, %p44_p1  ;;  %s3429_s7 = smov (%p30_p3, %s3427_s7), 0 }
   0xc   : > { %3332 = sst [smem:[#allocation5_spill]] %s3429_s7  ;;  %p2336_p6 = por %p70_p5, %p45_p2 }
   0xd   : > { %p206_p7 = scmp.eq.s32.totalorder %s1785_s8, 7  ;;  %s33_s13 = ssub.s32 %s2226_s28, %s3429_s7 }
   0xe   : > { %s63_s14 = sadd.s32 1, %s2202_s22  ;;  %s34_s15 = sor.u32 %s33_s13, %s32_s10 }
   0xf   : > { %p61_p8 = scmp.eq.s32.totalorder %s33_s13, 0  ;;  %p35_p9 = scmp.eq.s32.totalorder %s34_s15, 0 }
  0x10   : > { %p2346_p10 = por %p206_p7, %p44_p1  ;;  %p1788_p11 = scmp.ge.s32.totalorder %s2230_s29, 8 }
  0x11   : > { %s2351_s17 = scalar_select %p61_p8, %s2202_s22, %s63_s14  }
  0x12   : > { %s2354_s18 = scalar_select %p35_p9, %s2210_s24, %s37_s9  }
  0x13   : > { %228 = sbr.rel (%p1788_p11) target bundleno = 84 (0x54), region = 16 }
  0x1a   : > { %231 = sbr.rel (!%p2328_p4) target bundleno = 48 (0x30), region = 20  ;;  %s233_s19 = sand.u32 (%p2328_p4), 1, %s2210_s24  }
  0x1b   : > { %s1826_s20 = sshll.u32 (%p2328_p4), %s2222_s27, 6  ;;  %s1789_s8 = sshll.u32 (%p2328_p4), %s233_s19, 7 }
  0x1c   : > { %s238_s10 = sadd.s32 (%p2328_p4), %s2226_s28, %s1826_s20  ;;  %s235_s9 = scalar_lea.vmem (%p2328_p4), [#allocation2], %s1789_s8 }
  0x1d   : > { %s1792_s13 = sshll.u32 (%p2328_p4), %s238_s10, 3 }
  0x1e   : > { %s2365_s14 = scalar_lea.vmem (%p2328_p4), %s3323_s0, %s1792_s13 }
  0x1f   : > { %v298_v0 = vld [vmem:[%s2365_s14] sm:$0xff] (%p2328_p4) }
  0x20   : > { %v300_v1 = vld [vmem:[%s2365_s14 + $0x20] sm:$0xff] (%p2328_p4)  ;;  %299 = vst [vmem:[%s235_s9] sm:$0xff] (%p2328_p4), %v298_v0 }
  0x21   : > { %v302_v2 = vld [vmem:[%s2365_s14 + $0x40] sm:$0xff]  ;;  %301 = vst [vmem:[%s235_s9 + $0x8] sm:$0xff] %v300_v1 }
  0x22   : > { %303 = vst [vmem:[%s235_s9 + $0x10] sm:$0xff] %v302_v2  ;;  %v304_v3 = vld [vmem:[%s2365_s14 + $0x60] sm:$0xff] }
  0x23   : > { %v306_v4 = vld [vmem:[%s2365_s14 + $0x80] sm:$0xff]  ;;  %305 = vst [vmem:[%s235_s9 + $0x18] sm:$0xff] %v304_v3 }
  0x24   : > { %v308_v5 = vld [vmem:[%s2365_s14 + $0xa0] sm:$0xff]  ;;  %307 = vst [vmem:[%s235_s9 + $0x20] sm:$0xff] %v306_v4 }
  0x25   : > { %309 = vst [vmem:[%s235_s9 + $0x28] sm:$0xff] %v308_v5  ;;  %v310_v6 = vld [vmem:[%s2365_s14 + $0xc0] sm:$0xff] }
  0x26   : > { %v312_v7 = vld [vmem:[%s2365_s14 + $0xe0] sm:$0xff]  ;;  %311 = vst [vmem:[%s235_s9 + $0x30] sm:$0xff] %v310_v6 }
  0x27   : > { %v314_v8 = vld [vmem:[%s2365_s14 + $0x100] sm:$0xff]  ;;  %313 = vst [vmem:[%s235_s9 + $0x38] sm:$0xff] %v312_v7 }
  0x28   : > { %315 = vst [vmem:[%s235_s9 + $0x40] sm:$0xff] %v314_v8  ;;  %v316_v9 = vld [vmem:[%s2365_s14 + $0x120] sm:$0xff] }
  0x29   : > { %v318_v10 = vld [vmem:[%s2365_s14 + $0x140] sm:$0xff]  ;;  %317 = vst [vmem:[%s235_s9 + $0x48] sm:$0xff] %v316_v9 }
  0x2a   : > { %v320_v11 = vld [vmem:[%s2365_s14 + $0x160] sm:$0xff]  ;;  %319 = vst [vmem:[%s235_s9 + $0x50] sm:$0xff] %v318_v10 }
  0x2b   : > { %321 = vst [vmem:[%s235_s9 + $0x58] sm:$0xff] %v320_v11  ;;  %v322_v12 = vld [vmem:[%s2365_s14 + $0x180] sm:$0xff] }
  0x2c   : > { %v324_v13 = vld [vmem:[%s2365_s14 + $0x1a0] sm:$0xff]  ;;  %323 = vst [vmem:[%s235_s9 + $0x60] sm:$0xff] %v322_v12 }
  0x2d   : > { %v326_v14 = vld [vmem:[%s2365_s14 + $0x1c0] sm:$0xff]  ;;  %325 = vst [vmem:[%s235_s9 + $0x68] sm:$0xff] %v324_v13 }
  0x2e   : > { %327 = vst [vmem:[%s235_s9 + $0x70] sm:$0xff] %v326_v14  ;;  %v328_v15 = vld [vmem:[%s2365_s14 + $0x1e0] sm:$0xff] }
  0x2f   : > { %329 = vst [vmem:[%s235_s9 + $0x78] sm:$0xff] %v328_v15 }
  0x30 PF: > { %335 = sbr.rel (!%p2336_p6) target bundleno = 84 (0x54), region = 58  ;;  %s337_s7 = sand.u32 (%p2336_p6), 1, %s2202_s22  }
  0x31   : > { %s1794_s11 = sshll.u32 (%p2336_p6), %s2226_s28, 3  ;;  %s1793_s19 = sshll.u32 (%p2336_p6), %s337_s7, 8 }
  0x32   : > { %s2390_s10 = scalar_lea.vmem (%p2336_p6), %s3324_s1, %s1794_s11  ;;  %s2395_s12 = scalar_lea.vmem (%p2336_p6), [#allocation3], %s1793_s19 }
  0x33   : > { %v431_v16 = vld [vmem:[%s2390_s10] sm:$0xff] (%p2336_p6) }
  0x34   : > { %v433_v17 = vld [vmem:[%s2390_s10 + $0x20] sm:$0xff] (%p2336_p6)  ;;  %432 = vst [vmem:[%s2395_s12] sm:$0xff] (%p2336_p6), %v431_v16 }
  0x35   : > { %v435_v18 = vld [vmem:[%s2390_s10 + $0x40] sm:$0xff] (%p2336_p6)  ;;  %434 = vst [vmem:[%s2395_s12 + $0x8] sm:$0xff] (%p2336_p6), %v433_v17 }
  0x36   : > { %436 = vst [vmem:[%s2395_s12 + $0x10] sm:$0xff] (%p2336_p6), %v435_v18  ;;  %v437_v19 = vld [vmem:[%s2390_s10 + $0x60] sm:$0xff] (%p2336_p6) }
  0x37   : > { %v439_v20 = vld [vmem:[%s2390_s10 + $0x80] sm:$0xff]  ;;  %438 = vst [vmem:[%s2395_s12 + $0x18] sm:$0xff] %v437_v19 }
  0x38   : > { %v441_v21 = vld [vmem:[%s2390_s10 + $0xa0] sm:$0xff]  ;;  %440 = vst [vmem:[%s2395_s12 + $0x20] sm:$0xff] %v439_v20 }
  0x39   : > { %442 = vst [vmem:[%s2395_s12 + $0x28] sm:$0xff] %v441_v21  ;;  %v443_v22 = vld [vmem:[%s2390_s10 + $0xc0] sm:$0xff] }
  0x3a   : > { %v445_v23 = vld [vmem:[%s2390_s10 + $0xe0] sm:$0xff]  ;;  %444 = vst [vmem:[%s2395_s12 + $0x30] sm:$0xff] %v443_v22 }
  0x3b   : > { %v447_v24 = vld [vmem:[%s2390_s10 + $0x100] sm:$0xff]  ;;  %446 = vst [vmem:[%s2395_s12 + $0x38] sm:$0xff] %v445_v23 }
  0x3c   : > { %448 = vst [vmem:[%s2395_s12 + $0x40] sm:$0xff] %v447_v24  ;;  %v449_v25 = vld [vmem:[%s2390_s10 + $0x120] sm:$0xff] }
  0x3d   : > { %v451_v26 = vld [vmem:[%s2390_s10 + $0x140] sm:$0xff]  ;;  %450 = vst [vmem:[%s2395_s12 + $0x48] sm:$0xff] %v449_v25 }
  0x3e   : > { %v453_v27 = vld [vmem:[%s2390_s10 + $0x160] sm:$0xff]  ;;  %452 = vst [vmem:[%s2395_s12 + $0x50] sm:$0xff] %v451_v26 }
  0x3f   : > { %454 = vst [vmem:[%s2395_s12 + $0x58] sm:$0xff] %v453_v27  ;;  %v455_v28 = vld [vmem:[%s2390_s10 + $0x180] sm:$0xff] }
  0x40   : > { %v457_v29 = vld [vmem:[%s2390_s10 + $0x1a0] sm:$0xff]  ;;  %456 = vst [vmem:[%s2395_s12 + $0x60] sm:$0xff] %v455_v28 }
  0x41   : > { %v459_v30 = vld [vmem:[%s2390_s10 + $0x1c0] sm:$0xff]  ;;  %458 = vst [vmem:[%s2395_s12 + $0x68] sm:$0xff] %v457_v29 }
  0x42   : > { %460 = vst [vmem:[%s2395_s12 + $0x70] sm:$0xff] %v459_v30  ;;  %v461_v31 = vld [vmem:[%s2390_s10 + $0x1e0] sm:$0xff] }
  0x43   : > { %v463_v32 = vld [vmem:[%s2390_s10 + $0x200] sm:$0xff]  ;;  %462 = vst [vmem:[%s2395_s12 + $0x78] sm:$0xff] %v461_v31 }
  0x44   : > { %v465_v33 = vld [vmem:[%s2390_s10 + $0x220] sm:$0xff]  ;;  %464 = vst [vmem:[%s2395_s12 + $0x80] sm:$0xff] %v463_v32 }
  0x45   : > { %466 = vst [vmem:[%s2395_s12 + $0x88] sm:$0xff] %v465_v33  ;;  %v467_v34 = vld [vmem:[%s2390_s10 + $0x240] sm:$0xff] }
  0x46   : > { %v469_v35 = vld [vmem:[%s2390_s10 + $0x260] sm:$0xff]  ;;  %468 = vst [vmem:[%s2395_s12 + $0x90] sm:$0xff] %v467_v34 }
  0x47   : > { %v471_v36 = vld [vmem:[%s2390_s10 + $0x280] sm:$0xff]  ;;  %470 = vst [vmem:[%s2395_s12 + $0x98] sm:$0xff] %v469_v35 }
  0x48   : > { %472 = vst [vmem:[%s2395_s12 + $0xa0] sm:$0xff] %v471_v36  ;;  %v473_v37 = vld [vmem:[%s2390_s10 + $0x2a0] sm:$0xff] }
  0x49   : > { %v475_v38 = vld [vmem:[%s2390_s10 + $0x2c0] sm:$0xff]  ;;  %474 = vst [vmem:[%s2395_s12 + $0xa8] sm:$0xff] %v473_v37 }
  0x4a   : > { %v477_v39 = vld [vmem:[%s2390_s10 + $0x2e0] sm:$0xff]  ;;  %476 = vst [vmem:[%s2395_s12 + $0xb0] sm:$0xff] %v475_v38 }
  0x4b   : > { %478 = vst [vmem:[%s2395_s12 + $0xb8] sm:$0xff] %v477_v39  ;;  %v479_v40 = vld [vmem:[%s2390_s10 + $0x300] sm:$0xff] }
  0x4c   : > { %v481_v41 = vld [vmem:[%s2390_s10 + $0x320] sm:$0xff]  ;;  %480 = vst [vmem:[%s2395_s12 + $0xc0] sm:$0xff] %v479_v40 }
  0x4d   : > { %v483_v42 = vld [vmem:[%s2390_s10 + $0x340] sm:$0xff]  ;;  %482 = vst [vmem:[%s2395_s12 + $0xc8] sm:$0xff] %v481_v41 }
  0x4e   : > { %484 = vst [vmem:[%s2395_s12 + $0xd0] sm:$0xff] %v483_v42  ;;  %v485_v43 = vld [vmem:[%s2390_s10 + $0x360] sm:$0xff] }
  0x4f   : > { %v487_v44 = vld [vmem:[%s2390_s10 + $0x380] sm:$0xff]  ;;  %486 = vst [vmem:[%s2395_s12 + $0xd8] sm:$0xff] %v485_v43 }
  0x50   : > { %v489_v45 = vld [vmem:[%s2390_s10 + $0x3a0] sm:$0xff]  ;;  %488 = vst [vmem:[%s2395_s12 + $0xe0] sm:$0xff] %v487_v44 }
  0x51   : > { %490 = vst [vmem:[%s2395_s12 + $0xe8] sm:$0xff] %v489_v45  ;;  %v491_v46 = vld [vmem:[%s2390_s10 + $0x3c0] sm:$0xff] }
  0x52   : > { %v493_v47 = vld [vmem:[%s2390_s10 + $0x3e0] sm:$0xff]  ;;  %492 = vst [vmem:[%s2395_s12 + $0xf0] sm:$0xff] %v491_v46 }
  0x53   : > { %494 = vst [vmem:[%s2395_s12 + $0xf8] sm:$0xff] %v493_v47 }
  0x54 PF: > { %p1795_p12 = scmp.ge.s32.totalorder %s2230_s29, 1  ;;  %p527_p13 = scmp.lt.s32.totalorder %s2230_s29, 9 }
  0x56   : > { %p528_p0 = pnand %p1795_p12, %p527_p13 }
  0x57   : > { %s541_s13 = sand.u32 (!%p528_p0), 1, %s2198_s21   ;;  %p589_p1 = scmp.lt.s32.totalorder (!%p528_p0), %s2218_s26, 3 }
  0x58   : > { %531 = sbr.rel (%p528_p0) target bundleno = 853 (0x355), region = 112  ;;  %s1797_s15 = sshll.u32 (!%p528_p0), %s541_s13, 8 }
  0x59   : > { %s2461_s14 = scalar_lea.vmem (!%p528_p0), [#allocation3], %s1797_s15  ;;  %s534_s21 = sand.u32 (!%p528_p0), 1, %s2206_s23  }
  0x5a   : > { %v641_v48 = vld [vmem:[%s2461_s14 + $0x80] sm:$0xff] (!%p528_p0)  ;;  %v642_v49 = vld [vmem:[%s2461_s14 + $0x88] sm:$0xff] (!%p528_p0)  ;;  %v643_v53 = vld [vmem:[%s2461_s14 + $0x90] sm:$0xff] (!%p528_p0)  ;;  %s2480_s23 = sshll.u32 (!%p528_p0), %s534_s21, 7  ;;  %s1799_s13 = sshll.u32 (!%p528_p0), %s2214_s25, 4 }
  0x5b   : > { %v625_v50 = vld [vmem:[%s2461_s14] sm:$0xff] (!%p528_p0)  ;;  %v1927_v51 = vpack.c.bf16 (!%p528_p0), %v642_v49, %v641_v48  ;;  %v626_v52 = vld [vmem:[%s2461_s14 + $0x8] sm:$0xff] (!%p528_p0)  ;;  %v644_v54 = vld [vmem:[%s2461_s14 + $0x98] sm:$0xff] (!%p528_p0)  ;;  %s2501_s12 = scalar_lea.vmem (!%p528_p0), [#allocation2], %s2480_s23  ;;  %p596_p2 = scmp.lt.s32.totalorder (!%p528_p0), %s1799_s13, 31 }
  0x5c   : > { %v1929_v55 = vpack.c.bf16 (!%p528_p0), %v626_v52, %v625_v50  ;;  %v1931_v56 = vpack.c.bf16 (!%p528_p0), %v644_v54, %v643_v53  ;;  %v627_v57 = vld [vmem:[%s2461_s14 + $0x10] sm:$0xff] (!%p528_p0)  ;;  %v628_v58 = vld [vmem:[%s2461_s14 + $0x18] sm:$0xff] (!%p528_p0)  ;;  %v645_v59 = vld [vmem:[%s2461_s14 + $0xa0] sm:$0xff] (!%p528_p0) }
  0x5d   : > { %1928 = vmatprep.subr.bf16.mxu0 (!%p528_p0), %v1927_v51  ;;  %1863 = vmatprep.subr.bf16.mxu1 (!%p528_p0), %v1927_v51  ;;  %v646_v60 = vld [vmem:[%s2461_s14 + $0xa8] sm:$0xff] (!%p528_p0)  ;;  %v1933_v61 = vpack.c.bf16 (!%p528_p0), %v628_v58, %v627_v57  ;;  %v629_v63 = vld [vmem:[%s2461_s14 + $0x20] sm:$0xff] (!%p528_p0)  ;;  %v647_v1 = vld [vmem:[%s2461_s14 + $0xb0] sm:$0xff] (!%p528_p0) }
  0x5e   : > { %1930 = vmatpush3.bf16.xpose.msra.mxu0 (!%p528_p0), %v1929_v55  ;;  %1864 = vmatpush3.bf16.msra.mxu1 (!%p528_p0), %v1929_v55  ;;  %v1935_v62 = vpack.c.bf16 (!%p528_p0), %v646_v60, %v645_v59  ;;  %v630_v0 = vld [vmem:[%s2461_s14 + $0x28] sm:$0xff] (!%p528_p0)  ;;  %v648_v2 = vld [vmem:[%s2461_s14 + $0xb8] sm:$0xff] (!%p528_p0)  ;;  %v631_v3 = vld [vmem:[%s2461_s14 + $0x30] sm:$0xff] (!%p528_p0) }
  0x5f   : > { %s2478_s9 = scalar_select %p589_p1, %s2218_s26, 3  ;;  %1932 = vmatprep.subr.bf16.mxu0 %v1931_v56  ;;  %1865 = vmatprep.subr.bf16.mxu1 %v1931_v56  ;;  %v1937_v5 = vpack.c.bf16 %v630_v0, %v629_v63  ;;  %v632_v6 = vld [vmem:[%s2461_s14 + $0x38] sm:$0xff]  ;;  %v611_v8 = vld [vmem:[%s2501_s12 + $0x10] sm:$0xff]  ;;  %v1939_v9 = vpack.c.bf16 %v648_v2, %v647_v1  ;;  %v609_v11 = vld [vmem:[%s2501_s12] sm:$0xff] }
  0x60   : > { %v612_v12 = vld [vmem:[%s2501_s12 + $0x18] sm:$0xff]  ;;  %v610_v13 = vld [vmem:[%s2501_s12 + $0x8] sm:$0xff]  ;;  %v649_v14 = vld [vmem:[%s2461_s14 + $0xc0] sm:$0xff]  ;;  %v1941_v18 = vpack.c.bf16 %v632_v6, %v631_v3  ;;  %s3431_s13 = smov (!%p596_p2, %s1799_s13), 31 }
  0x61   : > { %s594_s19 = scalar_lea.vmem %s3326_s3, %s2478_s9  ;;  %s591_s10 = scalar_lea.vmem %s3325_s2, %s2478_s9  ;;  %v650_v15 = vld [vmem:[%s2461_s14 + $0xc8] sm:$0xff]  ;;  %v633_v22 = vld [vmem:[%s2461_s14 + $0x40] sm:$0xff]  ;;  %v651_v25 = vld [vmem:[%s2461_s14 + $0xd0] sm:$0xff] }
  0x62   : > { %1866 = vmatpush3.bf16.msra.mxu1 %v1933_v61  ;;  %v2495_v4 = vld [vmem:[%s594_s19] ss:$0 sm:$0xff]  ;;  %v614_v20 = vld [vmem:[%s2501_s12 + $0x28] sm:$0xff]  ;;  %v1943_v21 = vpack.c.bf16 %v650_v15, %v649_v14  ;;  %v652_v26 = vld [vmem:[%s2461_s14 + $0xd8] sm:$0xff]  ;;  %s1827_s15 = sshll.u32 %s3431_s13, 2  ;;  %s604_s20 = scalar_lea.vmem %s3328_s5, %s2478_s9 }
  0x63   : > { %1867 = vmatprep.subr.bf16.mxu1 %v1935_v62  ;;  %v2498_v7 = vld [vmem:[%s591_s10] sm:$0x1]  ;;  %v698_v10 = vmul.f32 %v2495_v4, %v611_v8  ;;  %v696_v16 = vmul.f32 %v2495_v4, %v609_v11  ;;  %v699_v17 = vmul.f32 %v2495_v4, %v612_v12  ;;  %v697_v19 = vmul.f32 %v2495_v4, %v610_v13  ;;  %v634_v23 = vld [vmem:[%s2461_s14 + $0x48] sm:$0xff]  ;;  %v616_v30 = vld [vmem:[%s2501_s12 + $0x38] sm:$0xff]  ;;  %s2573_s7 = scalar_lea.vmem %s3327_s4, %s1827_s15  ;;  %s3204_s9 = scalar_lea.vmem [#allocation4], %s2480_s23 }
  0x64   : > { %1861 = vmatprep.mubr.f32.mxu0 %v2498_v7  ;;  %v613_v24 = vld [vmem:[%s2501_s12 + $0x20] sm:$0xff]  ;;  %v701_v27 = vmul.f32 %v2495_v4, %v614_v20  ;;  %v1945_v28 = vpack.c.bf16 %v634_v23, %v633_v22  ;;  %v1947_v31 = vpack.c.bf16 %v652_v26, %v651_v25  ;;  %v635_v32 = vld [vmem:[%s2461_s14 + $0x50] sm:$0xff]  ;;  %v636_v33 = vld [vmem:[%s2461_s14 + $0x58] sm:$0xff]  ;;  %v703_v37 = vmul.f32 %v2495_v4, %v616_v30  ;;  %s1828_s23 = sshll.u32 (%p2346_p10), %s2214_s25, 6 }
  0x65   : > { %716 = vadd.xlane.f32.xlu1 %v698_v10  ;;  %712 = vadd.xlane.f32.xlu0 %v696_v16  ;;  %v700_v29 = vmul.f32 %v2495_v4, %v613_v24  ;;  %v615_v34 = vld [vmem:[%s2501_s12 + $0x30] sm:$0xff]  ;;  %v653_v35 = vld [vmem:[%s2461_s14 + $0xe0] sm:$0xff]  ;;  %v654_v36 = vld [vmem:[%s2461_s14 + $0xe8] sm:$0xff]  ;;  %v1949_v38 = vpack.c.bf16 %v636_v33, %v635_v32  ;;  %v2232_v20 = vmov 0   ;;  %s1561_s16 = sadd.s32 (%p2346_p10), %s2218_s26, %s1828_s23 }
  0x66   : > { %1934 = vmatpush3.bf16.xpose.msra.mxu0 %v1933_v61  ;;  %1868 = vmatpush3.bf16.msra.mxu1 %v1937_v5  ;;  %v702_v39 = vmul.f32 %v2495_v4, %v615_v34  ;;  %v618_v40 = vld [vmem:[%s2501_s12 + $0x48] sm:$0xff]  ;;  %v1951_v41 = vpack.c.bf16 %v654_v36, %v653_v35  ;;  %v637_v42 = vld [vmem:[%s2461_s14 + $0x60] sm:$0xff]  ;;  %v655_v45 = vld [vmem:[%s2461_s14 + $0xf0] sm:$0xff]  ;;  %s1823_s8 = sshll.u32 (%p2346_p10), %s1561_s16, 3 }
  0x67   : > { %1936 = vmatprep.subr.bf16.mxu0 %v1935_v62  ;;  %1869 = vmatprep.subr.bf16.mxu1 %v1939_v9  ;;  %v638_v43 = vld [vmem:[%s2461_s14 + $0x68] sm:$0xff]  ;;  %v617_v44 = vld [vmem:[%s2501_s12 + $0x40] sm:$0xff]  ;;  %v656_v46 = vld [vmem:[%s2461_s14 + $0xf8] sm:$0xff]  ;;  %v705_v47 = vmul.f32 %v2495_v4, %v618_v40  ;;  %s1563_s13 = scalar_lea.vmem (%p2346_p10), %s3329_s6, %s1823_s8 }
  0x68   : > { %v1953_v48 = vpack.c.bf16 %v638_v43, %v637_v42  ;;  %v704_v49 = vmul.f32 %v2495_v4, %v617_v44  ;;  %v620_v50 = vld [vmem:[%s2501_s12 + $0x58] sm:$0xff]  ;;  %v1955_v51 = vpack.c.bf16 %v656_v46, %v655_v45  ;;  %v639_v52 = vld [vmem:[%s2461_s14 + $0x70] sm:$0xff]  ;;  %v622_v58 = vld [vmem:[%s2501_s12 + $0x68] sm:$0xff] }
  0x69   : > { %718 = vadd.xlane.f32.xlu1 %v699_v17  ;;  %714 = vadd.xlane.f32.xlu0 %v697_v19  ;;  %v640_v53 = vld [vmem:[%s2461_s14 + $0x78] sm:$0xff]  ;;  %v619_v54 = vld [vmem:[%s2501_s12 + $0x50] sm:$0xff]  ;;  %v707_v55 = vmul.f32 %v2495_v4, %v620_v50  ;;  %v621_v59 = vld [vmem:[%s2501_s12 + $0x60] sm:$0xff]  ;;  %v709_v60 = vmul.f32 %v2495_v4, %v622_v58 }
  0x6a   : > { %1870 = vmatpush3.bf16.msra.mxu1 %v1941_v18  ;;  %v1957_v56 = vpack.c.bf16 %v640_v53, %v639_v52  ;;  %v706_v57 = vmul.f32 %v2495_v4, %v619_v54  ;;  %v708_v61 = vmul.f32 %v2495_v4, %v621_v59  ;;  %v624_v62 = vld [vmem:[%s2501_s12 + $0x78] sm:$0xff]  ;;  %v623_v63 = vld [vmem:[%s2501_s12 + $0x70] sm:$0xff]  ;;  %v657_v11 = vld [vmem:[%s2573_s7] sm:$0xf] }
  0x6b   : > { %1871 = vmatprep.subr.bf16.mxu1 %v1943_v21  ;;  %v711_v0 = vmul.f32 %v2495_v4, %v624_v62  ;;  %v710_v1 = vmul.f32 %v2495_v4, %v623_v63  ;;  %v658_v12 = vld [vmem:[%s2573_s7 + $0x4] sm:$0xf]  ;;  %v659_v15 = vld [vmem:[%s2573_s7 + $0x8] sm:$0xf]  ;;  %v660_v16 = vld [vmem:[%s2573_s7 + $0xc] sm:$0xf]  ;;  %vm673_vm0 = vnez %v657_v11 }
  0x6c   : > { %vm674_vm1 = vnez %v658_v12  ;;  %v661_v19 = vld [vmem:[%s2573_s7 + $0x10] sm:$0xf]  ;;  %vm675_vm2 = vnez %v659_v15  ;;  %vm676_vm3 = vnez %v660_v16  ;;  %v664_v23 = vld [vmem:[%s2573_s7 + $0x1c] sm:$0xf]  ;;  %v663_v26 = vld [vmem:[%s2573_s7 + $0x18] sm:$0xf] }
  0x6d   : > { %722 = vadd.xlane.f32.xlu1 %v701_v27  ;;  %720 = vadd.xlane.f32.xlu0 %v700_v29  ;;  %v2591_v22 = vsel %vm674_vm1, 16843009, %v2232_v20  ;;  %vm677_vm5 = vnez %v661_v19  ;;  %v2604_v29 = vsel %vm676_vm3, 16843009, %v2232_v20  ;;  %v666_v30 = vld [vmem:[%s2573_s7 + $0x24] sm:$0xf]  ;;  %vm680_vm6 = vnez %v664_v23 }
  0x6e   : > { %1938 = vmatpush3.bf16.xpose.msra.mxu0 %v1937_v5  ;;  %1872 = vmatpush3.bf16.msra.mxu1 %v1945_v28  ;;  %v970_v32 = vunpack.c.0.s8 %v2591_v22  ;;  %v665_v34 = vld [vmem:[%s2573_s7 + $0x20] sm:$0xf]  ;;  %v971_v36 = vunpack.c.1.s8 %v2591_v22  ;;  %vm679_vm7 = vnez %v663_v26  ;;  %vm682_vm8 = vnez %v666_v30  ;;  %v667_v42 = vld [vmem:[%s2573_s7 + $0x28] sm:$0xf]  ;;  %v670_v43 = vld [vmem:[%s2573_s7 + $0x34] sm:$0xf] }
  0x6f   : > { %1940 = vmatprep.subr.bf16.mxu0 %v1939_v9  ;;  %1873 = vmatprep.subr.bf16.mxu1 %v1947_v31  ;;  %v975_v44 = vunpack.c.1.s8 %v2604_v29  ;;  %v2627_v46 = vsel %vm680_vm6, 16843009, %v2232_v20  ;;  %vm681_vm9 = vnez %v665_v34  ;;  %v2637_v52 = vsel %vm679_vm7, 16843009, %v2232_v20  ;;  %v671_v53 = vld [vmem:[%s2573_s7 + $0x38] sm:$0xf] }
  0x70   : > { %vm683_vm11 = vnez %v667_v42  ;;  %vm686_vm12 = vnez %v670_v43  ;;  %v2649_v58 = vsel %vm681_vm9, 16843009, %v2232_v20  ;;  %v983_v59 = vunpack.c.1.s8 %v2627_v46 }
  0x71   : > { %726 = vadd.xlane.f32.xlu1 %v703_v37  ;;  %724 = vadd.xlane.f32.xlu0 %v702_v39  ;;  %v2616_v37 = vsel %vm677_vm5, 16843009, %v2232_v20  ;;  %vm687_vm15 = vnez %v671_v53  ;;  %vm2691_vm3 = vcmp.ne.s32.totalorder %v971_v36, 0  ;;  %vm2759_vm9 = vcmp.ne.s32.totalorder %v975_v44, 0 }
  0x72   : > { %1874 = vmatpush3.bf16.msra.mxu1 %v1949_v38  ;;  %v2689_v30 = vsel %vm687_vm15, 16843009, %v2232_v20 }
  0x73   : > { %1875 = vmatprep.subr.bf16.mxu1 %v1951_v41 }
  0x75   : > { %730 = vadd.xlane.f32.xlu1 %v705_v47  ;;  %728 = vadd.xlane.f32.xlu0 %v704_v49  ;;  %v669_v47 = vld [vmem:[%s2573_s7 + $0x30] sm:$0xf] }
  0x76   : > { %1942 = vmatpush3.bf16.xpose.msra.mxu0 %v1941_v18  ;;  %1876 = vmatpush3.bf16.msra.mxu1 %v1953_v48  ;;  %v662_v18 = vld [vmem:[%s2573_s7 + $0x14] sm:$0xf]  ;;  %vm685_vm13 = vnez %v669_v47 }
  0x77   : > { %1944 = vmatprep.subr.bf16.mxu0 %v1943_v21  ;;  %1877 = vmatprep.subr.bf16.mxu1 %v1955_v51  ;;  %v2588_v21 = vsel %vm673_vm0, 16843009, %v2232_v20  ;;  %vm678_vm4 = vnez %v662_v18  ;;  %v2667_v12 = vsel %vm685_vm13, 16843009, %v2232_v20 }
  0x78   : > { %v2610_v33 = vsel %vm678_vm4, 16843009, %v2232_v20  ;;  %v969_v35 = vunpack.c.1.s8 %v2588_v21 }
  0x79   : > { %734 = vadd.xlane.f32.xlu1 %v707_v55  ;;  %732 = vadd.xlane.f32.xlu0 %v706_v57  ;;  %v978_v45 = vunpack.c.0.s8 %v2610_v33  ;;  %v979_v50 = vunpack.c.1.s8 %v2610_v33  ;;  %v977_v55 = vunpack.c.1.s8 %v2616_v37  ;;  %v982_v57 = vunpack.c.0.s8 %v2627_v46 }
  0x7a   : > { %1878 = vmatpush3.bf16.msra.mxu1 %v1957_v56  ;;  %vm2676_vm1 = vcmp.ne.s32.totalorder %v969_v35, 0 }
  0x7b   : > { %vm2781_vm13 = vcmp.ne.s32.totalorder %v978_v45, 0 }
  0x7d   : > { %738 = vadd.xlane.f32.xlu1 %v709_v60  ;;  %736 = vadd.xlane.f32.xlu0 %v708_v61 }
  0x7e   : > { %1946 = vmatpush3.bf16.xpose.msra.mxu0 %v1945_v28  ;;  %v2601_v28 = vsel %vm675_vm2, 16843009, %v2232_v20  ;;  %vm2680_vm2 = vcmp.ne.s32.totalorder %v970_v32, 0 }
  0x7f   : > { %1948 = vmatprep.subr.bf16.mxu0 %v1947_v31  ;;  %v968_v31 = vunpack.c.0.s8 %v2588_v21  ;;  %v972_v39 = vunpack.c.0.s8 %v2601_v28  ;;  %v973_v40 = vunpack.c.1.s8 %v2601_v28 }
  0x81   : > { %742 = vadd.xlane.f32.xlu1 %v711_v0  ;;  %740 = vadd.xlane.f32.xlu0 %v710_v1  ;;  %v2659_v0 = vsel %vm683_vm11, 16843009, %v2232_v20  ;;  %v2662_v1 = vsel %vm686_vm12, 16843009, %v2232_v20  ;;  %vm2672_vm0 = vcmp.ne.s32.totalorder %v968_v31, 0  ;;  %vm2725_vm4 = vcmp.ne.s32.totalorder %v972_v39, 0 }
  0x82   : > { %vm2741_vm5 = vcmp.ne.s32.totalorder %v973_v40, 0  ;;  %v3387_v53 = vunpack.c.0.s8 %v2659_v0 }
  0x86   : > { %1950 = vmatpush3.bf16.xpose.msra.mxu0 %v1949_v38  ;;  %v668_v38 = vld [vmem:[%s2573_s7 + $0x2c] sm:$0xf] }
  0x87   : > { %1952 = vmatprep.subr.bf16.mxu0 %v1951_v41  ;;  %v974_v41 = vunpack.c.0.s8 %v2604_v29  ;;  %vm684_vm10 = vnez %v668_v38 }
  0x88   : > { %v2654_v61 = vsel %vm684_vm10, 16843009, %v2232_v20 }
  0x8e   : > { %1954 = vmatpush3.bf16.xpose.msra.mxu0 %v1953_v48  ;;  %v672_v48 = vld [vmem:[%s2573_s7 + $0x3c] sm:$0xf] }
  0x8f   : > { %1956 = vmatprep.subr.bf16.mxu0 %v1955_v51  ;;  %v976_v51 = vunpack.c.0.s8 %v2616_v37  ;;  %vm688_vm14 = vnez %v672_v48 }
  0x90   : > { %v2670_v15 = vsel %vm688_vm14, 16843009, %v2232_v20  ;;  %vm2787_vm14 = vcmp.ne.s32.totalorder %v979_v50, 0 }
  0x91   : > { %vm2806_vm15 = vcmp.ne.s32.totalorder %v976_v51, 0 }
  0x96   : > { %1958 = vmatpush3.bf16.xpose.msra.mxu0 %v1957_v56  ;;  %v2645_v56 = vsel %vm682_vm8, 16843009, %v2232_v20  ;;  %vm2753_vm8 = vcmp.ne.s32.totalorder %v974_v41, 0 }
  0x9d   : > { %1862 = vmatmul.mubr.f32.vlgmr.msra.gmra.mrb[0].mxu0 %v2498_v7  ;;  %v816_v7 = vlaneseq }
  0x9f   : > { %v2583_v17 = vshrl.u32 %v816_v7, 7 }
  0xa1   : > { %v818_v25 = vsub.s32 0, %v2583_v17 }
  0xf2   : > { %v2553_v2 = vpop.xlane.xlu1 %716  ;;  %v2555_v3 = vpop.xlane.xlu0 %712 }
  0xf6   : > { %v2557_v5 = vpop.xlane.xlu1 %718  ;;  %v2560_v6 = vpop.xlane.xlu0 %714 }
  0xfa   : > { %v2562_v4 = vpop.xlane.xlu1 %722  ;;  %v2564_v8 = vpop.xlane.xlu0 %720 }
  0xfe   : > { %v2566_v9 = vpop.xlane.xlu1 %726  ;;  %v2568_v10 = vpop.xlane.xlu0 %724 }
 0x102   : > { %v2577_v13 = vpop.xlane.xlu1 %730  ;;  %v2579_v14 = vpop.xlane.xlu0 %728 }
 0x106   : > { %v2594_v24 = vpop.xlane.xlu1 %734  ;;  %v2598_v27 = vpop.xlane.xlu0 %732 }
 0x10a   : > { %v2631_v49 = vpop.xlane.xlu1 %738  ;;  %v2640_v54 = vpop.xlane.xlu0 %736 }
 0x10e   : > { %v743_v16 = vpop.xlane.xlu1 %742  ;;  %v741_v34 = vpop.xlane.xlu0 %740 }
 0x170   : > { %v811_v31 = vpop.f32.mrb[0].mxu0 }
 0x171   : > { %v2701_v47 = vrot.slane %v811_v31, %v818_v25  ;;  %v813_v20 = vpop.f32.mrb[1].mxu0 }
 0x172   : > { %v2708_v32 = vrot.slane %v813_v20, %v818_v25 }
 0x173   : > { %v2714_v31 = vadd.f32 %v2701_v47, %v743_v16  ;;  %v2717_v26 = vadd.f32 %v2701_v47, %v741_v34  ;;  %v824_v36 = vadd.f32 %v2701_v47, %v2555_v3  ;;  %v826_v17 = vadd.f32 %v2701_v47, %v2560_v6 }
 0x174   : > { %v2730_v20 = vadd.f32 %v2708_v32, %v743_v16  ;;  %v2733_v43 = vadd.f32 %v2708_v32, %v741_v34  ;;  %v825_v42 = vadd.f32 %v2708_v32, %v2555_v3  ;;  %v827_v38 = vadd.f32 %v2708_v32, %v2560_v6 }
 0x175   : > { %v2746_v39 = vmul.f32 0.2, %v2714_v31  ;;  %v2749_v16 = vmul.f32 0.2, %v2717_v26  ;;  %vm856_vm6 = vcmp.gt.f32.partialorder %v824_v36, 0.0  ;;  %vm858_vm7 = vcmp.gt.f32.partialorder %v826_v17, 0.0 }
 0x176   : > { %v2764_v28 = vmul.f32 0.2, %v2730_v20  ;;  %v2767_v40 = vmul.f32 0.2, %v2733_v43  ;;  %vm857_vm10 = vcmp.gt.f32.partialorder %v825_v42, 0.0  ;;  %vm859_vm11 = vcmp.gt.f32.partialorder %v827_v38, 0.0 }
 0x177   : > { %v888_v34 = vmul.f32 0.2, %v824_v36  ;;  %v889_v48 = vmul.f32 0.2, %v825_v42  ;;  %v890_v41 = vmul.f32 0.2, %v826_v17  ;;  %v828_v23 = vadd.f32 %v2701_v47, %v2553_v2 }
 0x178   : > { %v891_v22 = vmul.f32 0.2, %v827_v38  ;;  %v829_v29 = vadd.f32 %v2708_v32, %v2553_v2  ;;  %v830_v44 = vadd.f32 %v2701_v47, %v2557_v5  ;;  %v831_v11 = vadd.f32 %v2708_v32, %v2557_v5 }
 0x179   : > { %v920_v7 = vsel %vm856_vm6, %v824_v36, %v888_v34  ;;  %v921_v63 = vsel %vm857_vm10, %v825_v42, %v889_v48  ;;  %v922_v62 = vsel %vm858_vm7, %v826_v17, %v890_v41  ;;  %vm860_vm12 = vcmp.gt.f32.partialorder %v828_v23, 0.0 }
 0x17a   : > { %v2793_v5 = vsel %vm2672_vm0, %v920_v7, -1e+30  ;;  %v2797_v42 = vsel %vm2676_vm1, %v921_v63, -1e+30  ;;  %v923_v48 = vsel %vm859_vm11, %v827_v38, %v891_v22  ;;  %v2802_v45 = vsel %vm2680_vm2, %v922_v62, -1e+30 }
 0x17b   : > { %v1064_v50 = vmax.f32 %v2793_v5, %v2797_v42  ;;  %v2814_v7 = vsel %vm2691_vm3, %v923_v48, -1e+30  ;;  %vm861_vm0 = vcmp.gt.f32.partialorder %v829_v29, 0.0  ;;  %v892_v63 = vmul.f32 0.2, %v828_v23 }
 0x17c   : > { %vm2818_vm1 = vcmp.ne.s32.totalorder %v977_v55, 0  ;;  %v1067_v51 = vmax.f32 %v2802_v45, %v2814_v7  ;;  %v893_v18 = vmul.f32 0.2, %v829_v29  ;;  %vm862_vm2 = vcmp.gt.f32.partialorder %v830_v44, 0.0 }
 0x17d   : > { %vm863_vm6 = vcmp.gt.f32.partialorder %v831_v11, 0.0  ;;  %1065 = vmax.xlane.f32.xlu0 %v1064_v50  ;;  %v924_v19 = vsel %vm860_vm12, %v828_v23, %v892_v63  ;;  %v894_v21 = vmul.f32 0.2, %v830_v44  ;;  %v895_v22 = vmul.f32 0.2, %v831_v11 }
 0x17e   : > { %v834_v35 = vadd.f32 %v2701_v47, %v2562_v4  ;;  %1068 = vmax.xlane.f32.xlu1 %v1067_v51  ;;  %v925_v37 = vsel %vm861_vm0, %v829_v29, %v893_v18  ;;  %v2829_v55 = vsel %vm2725_vm4, %v924_v19, -1e+30  ;;  %v835_v38 = vadd.f32 %v2708_v32, %v2562_v4 }
 0x17f   : > { %v832_v36 = vadd.f32 %v2701_v47, %v2564_v8  ;;  %vm2837_vm3 = vcmp.ne.s32.totalorder %v982_v57, 0  ;;  %vm2843_vm7 = vcmp.ne.s32.totalorder %v983_v59, 0  ;;  %v2849_v25 = vsel %vm2741_vm5, %v925_v37, -1e+30 }
 0x180   : > { %v926_v4 = vsel %vm862_vm2, %v830_v44, %v894_v21  ;;  %v927_v34 = vsel %vm863_vm6, %v831_v11, %v895_v22  ;;  %vm866_vm4 = vcmp.gt.f32.partialorder %v834_v35, 0.0  ;;  %v1070_v41 = vmax.f32 %v2829_v55, %v2849_v25 }
 0x181   : > { %v2855_v57 = vsel %vm2753_vm8, %v926_v4, -1e+30  ;;  %v2859_v46 = vsel %vm2759_vm9, %v927_v34, -1e+30  ;;  %vm867_vm10 = vcmp.gt.f32.partialorder %v835_v38, 0.0  ;;  %v3363_v59 = vunpack.c.0.s8 %v2637_v52 }
 0x182   : > { %v1073_v11 = vmax.f32 %v2855_v57, %v2859_v46  ;;  %v898_v29 = vmul.f32 0.2, %v834_v35  ;;  %v899_v44 = vmul.f32 0.2, %v835_v38  ;;  %v833_v3 = vadd.f32 %v2708_v32, %v2564_v8  ;;  %1071 = vmax.xlane.f32.xlu0 %v1070_v41 }
 0x183   : > { %vm2863_vm11 = vcmp.ne.s32.totalorder %v3363_v59, 0  ;;  %vm864_vm5 = vcmp.gt.f32.partialorder %v832_v36, 0.0  ;;  %v896_v6 = vmul.f32 0.2, %v832_v36  ;;  %v838_v48 = vadd.f32 %v2701_v47, %v2566_v9 }
 0x184   : > { %v839_v50 = vadd.f32 %v2708_v32, %v2566_v9  ;;  %v3366_v63 = vunpack.c.1.s8 %v2637_v52  ;;  %1074 = vmax.xlane.f32.xlu1 %v1073_v11  ;;  %v930_v18 = vsel %vm866_vm4, %v834_v35, %v898_v29  ;;  %v931_v19 = vsel %vm867_vm10, %v835_v38, %v899_v44 }
 0x185   : > { %vm865_vm9 = vcmp.gt.f32.partialorder %v833_v3, 0.0  ;;  %v897_v8 = vmul.f32 0.2, %v833_v3  ;;  %v3369_v21 = vunpack.c.0.s8 %v2645_v56  ;;  %v3372_v9 = vunpack.c.1.s8 %v2645_v56 }
 0x186   : > { %vm2877_vm8 = vcmp.ne.s32.totalorder %v3366_v63, 0  ;;  %v2896_v37 = vsel %vm2781_vm13, %v930_v18, -1e+30  ;;  %v2900_v35 = vsel %vm2787_vm14, %v931_v19, -1e+30  ;;  %v928_v38 = vsel %vm864_vm5, %v832_v36, %v896_v6 }
 0x187   : > { %vm2884_vm12 = vcmp.ne.s32.totalorder %v3369_v21, 0  ;;  %vm2890_vm0 = vcmp.ne.s32.totalorder %v3372_v9, 0  ;;  %vm870_vm2 = vcmp.gt.f32.partialorder %v838_v48, 0.0  ;;  %v1079_v4 = vmax.f32 %v2896_v37, %v2900_v35 }
 0x188   : > { %v929_v34 = vsel %vm865_vm9, %v833_v3, %v897_v8  ;;  %v2906_v56 = vsel %vm2806_vm15, %v928_v38, -1e+30  ;;  %vm871_vm6 = vcmp.gt.f32.partialorder %v839_v50, 0.0  ;;  %v902_v41 = vmul.f32 0.2, %v838_v48 }
 0x189   : > { %v2910_v60 = vsel %vm2818_vm1, %v929_v34, -1e+30  ;;  %v903_v59 = vmul.f32 0.2, %v839_v50  ;;  %v836_v2 = vadd.f32 %v2701_v47, %v2568_v10  ;;  %1080 = vmax.xlane.f32.xlu1 %v1079_v4  ;;  %v837_v11 = vadd.f32 %v2708_v32, %v2568_v10 }
 0x18a   : > { %v1076_v36 = vmax.f32 %v2906_v56, %v2910_v60  ;;  %v842_v33 = vadd.f32 %v2701_v47, %v2577_v13  ;;  %v843_v62 = vadd.f32 %v2708_v32, %v2577_v13  ;;  %v3375_v29 = vunpack.c.0.s8 %v2649_v58 }
 0x18b   : > { %v3378_v3 = vunpack.c.1.s8 %v2649_v58  ;;  %v934_v10 = vsel %vm870_vm2, %v838_v48, %v902_v41  ;;  %v935_v63 = vsel %vm871_vm6, %v839_v50, %v903_v59  ;;  %vm868_vm15 = vcmp.gt.f32.partialorder %v836_v2, 0.0 }
 0x18c   : > { %vm2924_vm13 = vcmp.ne.s32.totalorder %v3375_v29, 0  ;;  %v900_v18 = vmul.f32 0.2, %v836_v2  ;;  %v3381_v19 = vunpack.c.0.s8 %v2654_v61  ;;  %v3384_v8 = vunpack.c.1.s8 %v2654_v61  ;;  %1077 = vmax.xlane.f32.xlu0 %v1076_v36 }
 0x18d   : > { %vm2930_vm14 = vcmp.ne.s32.totalorder %v3378_v3, 0  ;;  %v2949_v58 = vsel %vm2837_vm3, %v934_v10, -1e+30  ;;  %v2953_v48 = vsel %vm2843_vm7, %v935_v63, -1e+30  ;;  %vm869_vm10 = vcmp.gt.f32.partialorder %v837_v11, 0.0 }
 0x18e   : > { %vm2937_vm1 = vcmp.ne.s32.totalorder %v3381_v19, 0  ;;  %vm2943_vm4 = vcmp.ne.s32.totalorder %v3384_v8, 0  ;;  %vm874_vm5 = vcmp.gt.f32.partialorder %v842_v33, 0.0  ;;  %v1085_v50 = vmax.f32 %v2949_v58, %v2953_v48 }
 0x18f   : > { %v901_v9 = vmul.f32 0.2, %v837_v11  ;;  %v932_v61 = vsel %vm868_vm15, %v836_v2, %v900_v18  ;;  %vm875_vm9 = vcmp.gt.f32.partialorder %v843_v62, 0.0  ;;  %v906_v4 = vmul.f32 0.2, %v842_v33 }
 0x190   : > { %v2959_v38 = vsel %vm2863_vm11, %v932_v61, -1e+30  ;;  %v907_v23 = vmul.f32 0.2, %v843_v62  ;;  %v840_v34 = vadd.f32 %v2701_v47, %v2579_v14  ;;  %1086 = vmax.xlane.f32.xlu1 %v1085_v50  ;;  %v841_v41 = vadd.f32 %v2708_v32, %v2579_v14 }
 0x191   : > { %v933_v17 = vsel %vm869_vm10, %v837_v11, %v901_v9  ;;  %v846_v59 = vadd.f32 %v2701_v47, %v2594_v24  ;;  %v847_v2 = vadd.f32 %v2708_v32, %v2594_v24  ;;  %vm2971_vm3 = vcmp.ne.s32.totalorder %v3387_v53, 0 }
 0x192   : > { %v3390_v29 = vunpack.c.1.s8 %v2659_v0  ;;  %v2983_v14 = vsel %vm2877_vm8, %v933_v17, -1e+30  ;;  %v938_v11 = vsel %vm874_vm5, %v842_v33, %v906_v4  ;;  %v939_v10 = vsel %vm875_vm9, %v843_v62, %v907_v23 }
 0x193   : > { %vm872_vm11 = vcmp.gt.f32.partialorder %v840_v34, 0.0  ;;  %v3393_v24 = vunpack.c.0.s8 %v2662_v1  ;;  %v1082_v0 = vmax.f32 %v2959_v38, %v2983_v14  ;;  %v2996_v18 = vsel %vm2884_vm12, %v938_v11, -1e+30 }
 0x194   : > { %vm2977_vm7 = vcmp.ne.s32.totalorder %v3390_v29, 0  ;;  %v3000_v51 = vsel %vm2890_vm0, %v939_v10, -1e+30  ;;  %vm873_vm8 = vcmp.gt.f32.partialorder %v841_v41, 0.0  ;;  %v904_v62 = vmul.f32 0.2, %v840_v34 }
 0x195   : > { %vm2988_vm2 = vcmp.ne.s32.totalorder %v3393_v24, 0  ;;  %v1091_v33 = vmax.f32 %v2996_v18, %v3000_v51  ;;  %v905_v19 = vmul.f32 0.2, %v841_v41  ;;  %vm878_vm6 = vcmp.gt.f32.partialorder %v846_v59, 0.0  ;;  %1083 = vmax.xlane.f32.xlu0 %v1082_v0 }
 0x196   : > { %vm879_vm15 = vcmp.gt.f32.partialorder %v847_v2, 0.0  ;;  %v910_v8 = vmul.f32 0.2, %v846_v59  ;;  %v911_v50 = vmul.f32 0.2, %v847_v2  ;;  %v844_v22 = vadd.f32 %v2701_v47, %v2598_v27 }
 0x197   : > { %v3396_v9 = vunpack.c.1.s8 %v2662_v1  ;;  %1092 = vmax.xlane.f32.xlu1 %v1091_v33  ;;  %v936_v61 = vsel %vm872_vm11, %v840_v34, %v904_v62  ;;  %v937_v4 = vsel %vm873_vm8, %v841_v41, %v905_v19  ;;  %v845_v23 = vadd.f32 %v2708_v32, %v2598_v27 }
 0x198   : > { %v850_v17 = vadd.f32 %v2701_v47, %v2631_v49  ;;  %v3399_v53 = vunpack.c.0.s8 %v2667_v12  ;;  %v3402_v1 = vunpack.c.1.s8 %v2667_v12  ;;  %v3405_v34 = vunpack.c.0.s8 %v2670_v15 }
 0x199   : > { %vm3008_vm12 = vcmp.ne.s32.totalorder %v3396_v9, 0  ;;  %v3037_v27 = vsel %vm2924_vm13, %v936_v61, -1e+30  ;;  %v3041_v10 = vsel %vm2930_vm14, %v937_v4, -1e+30  ;;  %v942_v12 = vsel %vm878_vm6, %v846_v59, %v910_v8 }
 0x19a   : > { %vm3019_vm0 = vcmp.ne.s32.totalorder %v3399_v53, 0  ;;  %vm3025_vm10 = vcmp.ne.s32.totalorder %v3402_v1, 0  ;;  %vm3031_vm5 = vcmp.ne.s32.totalorder %v3405_v34, 0  ;;  %v943_v24 = vsel %vm879_vm15, %v847_v2, %v911_v50 }
 0x19b   : > { %v3408_v0 = vunpack.c.1.s8 %v2670_v15  ;;  %v1088_v62 = vmax.f32 %v3037_v27, %v3041_v10  ;;  %v3055_v44 = vsel %vm2937_vm1, %v942_v12, -1e+30  ;;  %v3059_v6 = vsel %vm2943_vm4, %v943_v24, -1e+30 }
 0x19c   : > { %vm876_vm13 = vcmp.gt.f32.partialorder %v844_v22, 0.0  ;;  %v3411_v59 = vunpack.c.0.s8 %v2689_v30  ;;  %v1097_v2 = vmax.f32 %v3055_v44, %v3059_v6  ;;  %vm877_vm11 = vcmp.gt.f32.partialorder %v845_v23, 0.0 }
 0x19d   : > { %vm3047_vm9 = vcmp.ne.s32.totalorder %v3408_v0, 0  ;;  %v908_v19 = vmul.f32 0.2, %v844_v22  ;;  %v909_v8 = vmul.f32 0.2, %v845_v23  ;;  %1089 = vmax.xlane.f32.xlu0 %v1088_v62  ;;  %v851_v13 = vadd.f32 %v2708_v32, %v2631_v49 }
 0x19e   : > { %vm3063_vm14 = vcmp.ne.s32.totalorder %v3411_v59, 0  ;;  %vm882_vm1 = vcmp.gt.f32.partialorder %v850_v17, 0.0  ;;  %v914_v21 = vmul.f32 0.2, %v850_v17  ;;  %v848_v50 = vadd.f32 %v2701_v47, %v2640_v54  ;;  %1098 = vmax.xlane.f32.xlu1 %v1097_v2 }
 0x19f   : > { %v940_v9 = vsel %vm876_vm13, %v844_v22, %v908_v19  ;;  %v941_v61 = vsel %vm877_vm11, %v845_v23, %v909_v8  ;;  %v849_v4 = vadd.f32 %v2708_v32, %v2640_v54  ;;  %vm886_vm4 = vcmp.gt.f32.partialorder %v2714_v31, 0.0 }
 0x1a0   : > { %v3078_v53 = vsel %vm2971_vm3, %v940_v9, -1e+30  ;;  %v3082_v49 = vsel %vm2977_vm7, %v941_v61, -1e+30  ;;  %vm883_vm8 = vcmp.gt.f32.partialorder %v851_v13, 0.0  ;;  %v946_v1 = vsel %vm882_vm1, %v850_v17, %v914_v21 }
 0x1a1   : > { %v1094_v47 = vmax.f32 %v3078_v53, %v3082_v49  ;;  %v915_v22 = vmul.f32 0.2, %v851_v13  ;;  %v3088_v23 = vsel %vm2988_vm2, %v946_v1, -1e+30  ;;  %vm880_vm6 = vcmp.gt.f32.partialorder %v848_v50, 0.0 }
 0x1a2   : > { %vm881_vm15 = vcmp.gt.f32.partialorder %v849_v4, 0.0  ;;  %v912_v54 = vmul.f32 0.2, %v848_v50  ;;  %v913_v32 = vmul.f32 0.2, %v849_v4  ;;  %vm887_vm3 = vcmp.gt.f32.partialorder %v2730_v20, 0.0 }
 0x1a3   : > { %1095 = vmax.xlane.f32.xlu0 %v1094_v47  ;;  %v947_v36 = vsel %vm883_vm8, %v851_v13, %v915_v22  ;;  %v950_v3 = vsel %vm886_vm4, %v2714_v31, %v2746_v39  ;;  %v951_v17 = vsel %vm887_vm3, %v2730_v20, %v2764_v28  ;;  %vm884_vm7 = vcmp.gt.f32.partialorder %v2717_v26, 0.0 }
 0x1a4   : > { %v3098_v63 = vsel %vm3008_vm12, %v947_v36, -1e+30  ;;  %v944_v34 = vsel %vm880_vm6, %v848_v50, %v912_v54  ;;  %v945_v12 = vsel %vm881_vm15, %v849_v4, %v913_v32  ;;  %v3414_v24 = vunpack.c.1.s8 %v2689_v30 }
 0x1a5   : > { %v1103_v0 = vmax.f32 %v3088_v23, %v3098_v63  ;;  %v3106_v31 = vsel %vm3019_vm0, %v944_v34, -1e+30  ;;  %v3110_v20 = vsel %vm3025_vm10, %v945_v12, -1e+30  ;;  %v3114_v39 = vsel %vm3031_vm5, %v950_v3, -1e+30 }
 0x1a6   : > { %vm1029_vm2 = vcmp.ne.s32.totalorder %v3414_v24, 0  ;;  %v1100_v28 = vmax.f32 %v3106_v31, %v3110_v20  ;;  %v3120_v30 = vsel %vm3047_vm9, %v951_v17, -1e+30  ;;  %vm885_vm12 = vcmp.gt.f32.partialorder %v2733_v43, 0.0 }
 0x1a7   : > { %v948_v52 = vsel %vm884_vm7, %v2717_v26, %v2749_v16  ;;  %1104 = vmax.xlane.f32.xlu1 %v1103_v0  ;;  %v949_v29 = vsel %vm885_vm12, %v2733_v43, %v2767_v40  ;;  %v1109_v33 = vmax.f32 %v3114_v39, %v3120_v30 }
 0x1a8   : > { %v3129_v11 = vsel %vm3063_vm14, %v948_v52, -1e+30  ;;  %1101 = vmax.xlane.f32.xlu0 %v1100_v28  ;;  %v3131_v41 = vsel %vm1029_vm2, %v949_v29, -1e+30 }
 0x1a9   : > { %v1106_v62 = vmax.f32 %v3129_v11, %v3131_v41 }
 0x1ab   : > { %1110 = vmax.xlane.f32.xlu1 %v1109_v33 }
 0x1ac   : > { %1107 = vmax.xlane.f32.xlu0 %v1106_v62 }
 0x20a   : > { %v1066_v26 = vpop.xlane.xlu0 %1065 }
 0x20b   : > { %v1069_v16 = vpop.xlane.xlu1 %1068  ;;  %v1112_v59 = vsub.f32 %v2793_v5, %v1066_v26  ;;  %v1113_v43 = vsub.f32 %v2797_v42, %v1066_v26 }
 0x20c   : > { %v1114_v40 = vsub.f32 %v2802_v45, %v1069_v16  ;;  %v1115_v15 = vsub.f32 %v2814_v7, %v1069_v16 }
 0x20d   : > { %v1144_v2 = vmul.f32 1.442695, %v1112_v59  ;;  %v1146_v13 = vmul.f32 1.442695, %v1113_v43 }
 0x20e   : > { %v1148_v19 = vmul.f32 1.442695, %v1114_v40  ;;  %v1150_v8 = vmul.f32 1.442695, %v1115_v15 }
 0x20f   : > { %2032 = vpow2.f32 %v1144_v2  ;;  %v1072_v21 = vpop.xlane.xlu0 %1071 }
 0x210   : > { %2034 = vpow2.f32 %v1148_v19  ;;  %v1116_v9 = vsub.f32 %v2829_v55, %v1072_v21  ;;  %v1117_v61 = vsub.f32 %v2849_v25, %v1072_v21 }
 0x211   : > { %v1075_v50 = vpop.xlane.xlu1 %1074  ;;  %2036 = vpow2.f32 %v1150_v8 }
 0x212   : > { %v1118_v5 = vsub.f32 %v2855_v57, %v1075_v50  ;;  %v1119_v42 = vsub.f32 %v2859_v46, %v1075_v50  ;;  %2038 = vpow2.f32 %v1146_v13  ;;  %v1152_v45 = vmul.f32 1.442695, %v1116_v9 }
 0x213   : > { %v1154_v1 = vmul.f32 1.442695, %v1117_v61 }
 0x214   : > { %v1156_v7 = vmul.f32 1.442695, %v1118_v5  ;;  %v1158_v4 = vmul.f32 1.442695, %v1119_v42  ;;  %2040 = vpow2.f32 %v1152_v45 }
 0x216   : > { %v1081_v47 = vpop.xlane.xlu1 %1080  ;;  %2042 = vpow2.f32 %v1156_v7 }
 0x217   : > { %v1122_v22 = vsub.f32 %v2896_v37, %v1081_v47  ;;  %v1123_v54 = vsub.f32 %v2900_v35, %v1081_v47  ;;  %2044 = vpow2.f32 %v1158_v4 }
 0x218   : > { %2046 = vpow2.f32 %v1154_v1 }
 0x219   : > { %v1078_v55 = vpop.xlane.xlu0 %1077  ;;  %v1164_v25 = vmul.f32 1.442695, %v1122_v22  ;;  %v1166_v32 = vmul.f32 1.442695, %v1123_v54  ;;  %v2033_v36 = vpop.eup %2032 }
 0x21a   : > { %v1120_v57 = vsub.f32 %v2906_v56, %v1078_v55  ;;  %v1121_v46 = vsub.f32 %v2910_v60, %v1078_v55  ;;  %v2035_v34 = vpop.eup %2034 }
 0x21b   : > { %2048 = vpow2.f32 %v1164_v25  ;;  %v2037_v24 = vpop.eup %2036  ;;  %v1256_v0 = vpack.c.bf16 %v2035_v34, %v2033_v36 }
 0x21c   : > { %v1160_v3 = vmul.f32 1.442695, %v1120_v57  ;;  %2050 = vpow2.f32 %v1166_v32  ;;  %v1162_v12 = vmul.f32 1.442695, %v1121_v46  ;;  %v2039_v28 = vpop.eup %2038  ;;  %v1211_v29 = vadd.f32 %v2037_v24, %v2035_v34 }
 0x21d   : > { %v1087_v17 = vpop.xlane.xlu1 %1086  ;;  %v1257_v33 = vpack.c.bf16 %v2037_v24, %v2039_v28  ;;  %v1208_v62 = vadd.f32 %v2039_v28, %v2033_v36 }
 0x21e   : > { %v1126_v37 = vsub.f32 %v2949_v58, %v1087_v17  ;;  %v1127_v35 = vsub.f32 %v2953_v48, %v1087_v17  ;;  %2052 = vpow2.f32 %v1160_v3  ;;  %v2041_v26 = vpop.eup %2040  ;;  %1212 = vadd.xlane.f32.xlu1 %v1211_v29 }
 0x21f   : > { %2054 = vpow2.f32 %v1162_v12  ;;  %1320 = vmatprep.mubr.bf16.mxu1 %v1257_v33  ;;  %1209 = vadd.xlane.f32.xlu0 %v1208_v62 }
 0x220   : > { %v1172_v52 = vmul.f32 1.442695, %v1126_v37  ;;  %v1174_v56 = vmul.f32 1.442695, %v1127_v35  ;;  %v2043_v48 = vpop.eup %2042  ;;  %1321 = vmatmul.mubr.bf16.vlgmr.msra.gmra.mrb[0].mxu1 %v1256_v0 }
 0x221   : > { %v2045_v15 = vpop.eup %2044 }
 0x222   : > { %v1084_v60 = vpop.xlane.xlu0 %1083  ;;  %2056 = vpow2.f32 %v1172_v52  ;;  %v2047_v8 = vpop.eup %2046 }
 0x223   : > { %v1124_v16 = vsub.f32 %v2959_v38, %v1084_v60  ;;  %v1125_v59 = vsub.f32 %v2983_v14, %v1084_v60  ;;  %2058 = vpow2.f32 %v1174_v56  ;;  %v1217_v38 = vadd.f32 %v2045_v15, %v2043_v48 }
 0x224   : > { %v1093_v58 = vpop.xlane.xlu1 %1092  ;;  %v1259_v50 = vpack.c.bf16 %v2045_v15, %v2047_v8  ;;  %v1214_v9 = vadd.f32 %v2047_v8, %v2041_v26 }
 0x225   : > { %v1130_v43 = vsub.f32 %v2996_v18, %v1093_v58  ;;  %v1131_v40 = vsub.f32 %v3000_v51, %v1093_v58  ;;  %v1168_v2 = vmul.f32 1.442695, %v1124_v16  ;;  %v1170_v19 = vmul.f32 1.442695, %v1125_v59  ;;  %v3155_v61 = vpop.eup %2048  ;;  %1218 = vadd.xlane.f32.xlu1 %v1217_v38 }
 0x226   : > { %v2051_v42 = vpop.eup %2050  ;;  %1328 = vmatprep.mubr.bf16.mxu1 %v1259_v50  ;;  %1215 = vadd.xlane.f32.xlu0 %v1214_v9 }
 0x227   : > { %v1180_v13 = vmul.f32 1.442695, %v1130_v43  ;;  %v1182_v21 = vmul.f32 1.442695, %v1131_v40  ;;  %2060 = vpow2.f32 %v1168_v2  ;;  %v1223_v22 = vadd.f32 %v2051_v42, %v3155_v61 }
 0x228   : > { %2062 = vpow2.f32 %v1170_v19  ;;  %v2053_v4 = vpop.eup %2052 }
 0x229   : > { %2064 = vpow2.f32 %v1180_v13  ;;  %v2055_v54 = vpop.eup %2054  ;;  %1224 = vadd.xlane.f32.xlu1 %v1223_v22  ;;  %v1260_v33 = vpack.c.bf16 %v3155_v61, %v2053_v4 }
 0x22a   : > { %v1090_v14 = vpop.xlane.xlu0 %1089  ;;  %2066 = vpow2.f32 %v1182_v21  ;;  %v1220_v32 = vadd.f32 %v2055_v54, %v2053_v4  ;;  %v1261_v57 = vpack.c.bf16 %v2051_v42, %v2055_v54 }
 0x22b   : > { %v1128_v18 = vsub.f32 %v3037_v27, %v1090_v14  ;;  %v1129_v51 = vsub.f32 %v3041_v10, %v1090_v14  ;;  %v1099_v5 = vpop.xlane.xlu1 %1098  ;;  %v1258_v10 = vpack.c.bf16 %v2043_v48, %v2041_v26 }
 0x22c   : > { %v1134_v45 = vsub.f32 %v3055_v44, %v1099_v5  ;;  %v1135_v7 = vsub.f32 %v3059_v6, %v1099_v5  ;;  %v3162_v44 = vpop.eup %2056  ;;  %1221 = vadd.xlane.f32.xlu0 %v1220_v32 }
 0x22d   : > { %v1176_v1 = vmul.f32 1.442695, %v1128_v18  ;;  %v1178_v47 = vmul.f32 1.442695, %v1129_v51  ;;  %1329 = vmatmul.mubr.bf16.gmra.mrb[4].mxu1 %v1258_v10  ;;  %v2059_v36 = vpop.eup %2058 }
 0x22e   : > { %v1188_v27 = vmul.f32 1.442695, %v1134_v45  ;;  %v1190_v55 = vmul.f32 1.442695, %v1135_v7  ;;  %1336 = vmatprep.mubr.bf16.mxu1 %v1261_v57  ;;  %v1229_v34 = vadd.f32 %v2059_v36, %v3162_v44 }
 0x22f   : > { %2068 = vpow2.f32 %v1176_v1 }
 0x230   : > { %v1096_v25 = vpop.xlane.xlu0 %1095  ;;  %2070 = vpow2.f32 %v1178_v47  ;;  %1230 = vadd.xlane.f32.xlu1 %v1229_v34 }
 0x231   : > { %v1132_v6 = vsub.f32 %v3078_v53, %v1096_v25  ;;  %v1133_v46 = vsub.f32 %v3082_v49, %v1096_v25  ;;  %2072 = vpow2.f32 %v1188_v27  ;;  %v2061_v37 = vpop.eup %2060 }
 0x232   : > { %2074 = vpow2.f32 %v1190_v55  ;;  %v2063_v49 = vpop.eup %2062 }
 0x233   : > { %v1184_v3 = vmul.f32 1.442695, %v1132_v6  ;;  %v1186_v17 = vmul.f32 1.442695, %v1133_v46  ;;  %v2065_v52 = vpop.eup %2064  ;;  %v1226_v60 = vadd.f32 %v2063_v49, %v2061_v37  ;;  %v1263_v59 = vpack.c.bf16 %v2059_v36, %v2063_v49 }
 0x234   : > { %v1105_v12 = vpop.xlane.xlu1 %1104  ;;  %v2067_v62 = vpop.eup %2066 }
 0x235   : > { %2076 = vpow2.f32 %v1184_v3  ;;  %v1138_v35 = vsub.f32 %v3088_v23, %v1105_v12  ;;  %v1139_v24 = vsub.f32 %v3098_v63, %v1105_v12  ;;  %v1102_v53 = vpop.xlane.xlu0 %1101  ;;  %1227 = vadd.xlane.f32.xlu0 %v1226_v60  ;;  %1337 = vmatmul.mubr.bf16.gmra.mrb[8].mxu1 %v1260_v33 }
 0x236   : > { %2078 = vpow2.f32 %v1186_v17  ;;  %v1136_v0 = vsub.f32 %v3106_v31, %v1102_v53  ;;  %v1137_v28 = vsub.f32 %v3110_v20, %v1102_v53  ;;  %v1235_v31 = vadd.f32 %v2067_v62, %v2065_v52  ;;  %1344 = vmatprep.mubr.bf16.mxu1 %v1263_v59 }
 0x237   : > { %v1196_v56 = vmul.f32 1.442695, %v1138_v35  ;;  %v1198_v29 = vmul.f32 1.442695, %v1139_v24  ;;  %v3181_v24 = vld [vmem:[%s604_s20] ss:$0 sm:$0xff] }
 0x238   : > { %v1192_v26 = vmul.f32 1.442695, %v1136_v0  ;;  %v1194_v16 = vmul.f32 1.442695, %v1137_v28  ;;  %v1111_v23 = vpop.xlane.xlu1 %1110  ;;  %1236 = vadd.xlane.f32.xlu1 %v1235_v31 }
 0x239   : > { %2080 = vpow2.f32 %v1196_v56  ;;  %v1142_v63 = vsub.f32 %v3114_v39, %v1111_v23  ;;  %v1143_v58 = vsub.f32 %v3120_v30, %v1111_v23  ;;  %v1108_v48 = vpop.xlane.xlu0 %1107  ;;  %v2069_v20 = vpop.eup %2068 }
 0x23a   : > { %2082 = vpow2.f32 %v1198_v29  ;;  %v1140_v43 = vsub.f32 %v3129_v11, %v1108_v48  ;;  %v1141_v40 = vsub.f32 %v3131_v41, %v1108_v48  ;;  %v2071_v15 = vpop.eup %2070  ;;  %v1262_v11 = vpack.c.bf16 %v3162_v44, %v2061_v37 }
 0x23b   : > { %2084 = vpow2.f32 %v1192_v26  ;;  %v1204_v2 = vmul.f32 1.442695, %v1142_v63  ;;  %v1206_v19 = vmul.f32 1.442695, %v1143_v58  ;;  %v2073_v8 = vpop.eup %2072  ;;  %v1232_v13 = vadd.f32 %v2071_v15, %v2069_v20 }
 0x23c   : > { %2086 = vpow2.f32 %v1194_v16  ;;  %v1200_v39 = vmul.f32 1.442695, %v1140_v43  ;;  %v1202_v30 = vmul.f32 1.442695, %v1141_v40  ;;  %v2075_v21 = vpop.eup %2074  ;;  %v1265_v50 = vpack.c.bf16 %v2067_v62, %v2071_v15 }
 0x23d   : > { %2088 = vpow2.f32 %v1204_v2  ;;  %1233 = vadd.xlane.f32.xlu0 %v1232_v13  ;;  %v1241_v38 = vadd.f32 %v2075_v21, %v2073_v8  ;;  %1345 = vmatmul.mubr.bf16.gmra.mrb[12].mxu1 %v1262_v11  ;;  %v1264_v4 = vpack.c.bf16 %v2065_v52, %v2069_v20 }
 0x23e   : > { %2090 = vpow2.f32 %v1206_v19  ;;  %1352 = vmatprep.mubr.bf16.mxu1 %v1265_v50 }
 0x23f   : > { %v2077_v14 = vpop.eup %2076  ;;  %2092 = vpow2.f32 %v1200_v39  ;;  %1242 = vadd.xlane.f32.xlu1 %v1241_v38 }
 0x240   : > { %v2079_v41 = vpop.eup %2078  ;;  %2094 = vpow2.f32 %v1202_v30  ;;  %v1266_v10 = vpack.c.bf16 %v2073_v8, %v2077_v14 }
 0x241   : > { %v1238_v9 = vadd.f32 %v2079_v41, %v2077_v14  ;;  %v1267_v47 = vpack.c.bf16 %v2075_v21, %v2079_v41 }
 0x243   : > { %v2081_v61 = vpop.eup %2080  ;;  %1239 = vadd.xlane.f32.xlu0 %v1238_v9 }
 0x244   : > { %v2083_v18 = vpop.eup %2082 }
 0x245   : > { %v2085_v51 = vpop.eup %2084  ;;  %v1247_v5 = vadd.f32 %v2083_v18, %v2081_v61  ;;  %1353 = vmatmul.mubr.bf16.gmra.mrb[16].mxu1 %v1264_v4 }
 0x246   : > { %v2087_v42 = vpop.eup %2086  ;;  %1360 = vmatprep.mubr.bf16.mxu1 %v1267_v47  ;;  %v1268_v32 = vpack.c.bf16 %v2081_v61, %v2085_v51 }
 0x247   : > { %v2089_v45 = vpop.eup %2088  ;;  %1248 = vadd.xlane.f32.xlu1 %v1247_v5  ;;  %v1244_v7 = vadd.f32 %v2087_v42, %v2085_v51  ;;  %v1269_v25 = vpack.c.bf16 %v2083_v18, %v2087_v42 }
 0x248   : > { %v2091_v1 = vpop.eup %2090 }
 0x249   : > { %v2093_v22 = vpop.eup %2092  ;;  %1245 = vadd.xlane.f32.xlu0 %v1244_v7  ;;  %v1253_v54 = vadd.f32 %v2091_v1, %v2089_v45 }
 0x24a   : > { %v2095_v27 = vpop.eup %2094  ;;  %v1270_v44 = vpack.c.bf16 %v2089_v45, %v2093_v22 }
 0x24b   : > { %1254 = vadd.xlane.f32.xlu1 %v1253_v54  ;;  %v1250_v55 = vadd.f32 %v2095_v27, %v2093_v22  ;;  %v1271_v57 = vpack.c.bf16 %v2091_v1, %v2095_v27 }
 0x24d   : > { %1251 = vadd.xlane.f32.xlu0 %v1250_v55  ;;  %1361 = vmatmul.mubr.bf16.gmra.mrb[20].mxu1 %v1266_v10 }
 0x24e   : > { %1368 = vmatprep.mubr.bf16.mxu1 %v1269_v25 }
 0x255   : > { %1369 = vmatmul.mubr.bf16.gmra.mrb[24].mxu1 %v1268_v32 }
 0x256   : > { %1376 = vmatprep.mubr.bf16.mxu1 %v1271_v57 }
 0x25d   : > { %1377 = vmatmul.mubr.bf16.gmra.mrb[28].mxu1 %v1270_v44 }
 0x2ab   : > { %v1213_v46 = vpop.xlane.xlu1 %1212 }
 0x2ac   : > { %v1210_v6 = vpop.xlane.xlu0 %1209 }
 0x2ad   : > { %2096 = vrcp.f32 %v1210_v6 }
 0x2ae   : > { %2098 = vrcp.f32 %v1213_v46 }
 0x2b2   : > { %v1219_v3 = vpop.xlane.xlu1 %1218 }
 0x2b3   : > { %v1216_v36 = vpop.xlane.xlu0 %1215 }
 0x2b4   : > { %2100 = vrcp.f32 %v1216_v36 }
 0x2b5   : > { %2102 = vrcp.f32 %v1219_v3 }
 0x2b6   : > { %v1225_v60 = vpop.xlane.xlu1 %1224 }
 0x2b7   : > { %v2097_v35 = vpop.eup %2096 }
 0x2b8   : > { %v2099_v28 = vpop.eup %2098 }
 0x2b9   : > { %v1222_v52 = vpop.xlane.xlu0 %1221 }
 0x2ba   : > { %2104 = vrcp.f32 %v1222_v52 }
 0x2bb   : > { %2106 = vrcp.f32 %v1225_v60 }
 0x2bd   : > { %v1231_v39 = vpop.xlane.xlu1 %1230 }
 0x2be   : > { %v2101_v48 = vpop.eup %2100 }
 0x2bf   : > { %v2103_v15 = vpop.eup %2102 }
 0x2c2   : > { %v1228_v2 = vpop.xlane.xlu0 %1227 }
 0x2c4   : > { %v2105_v9 = vpop.eup %2104 }
 0x2c5   : > { %v2107_v42 = vpop.eup %2106  ;;  %v1237_v54 = vpop.xlane.xlu1 %1236 }
 0x2ca   : > { %v1234_v7 = vpop.xlane.xlu0 %1233 }
 0x2cc   : > { %v1243_v60 = vpop.xlane.xlu1 %1242 }
 0x2f3   : > { %v1879_v17 = vpop.f32.mrb[0].mxu1 }
 0x2f4   : > { %v1880_v34 = vpop.f32.mrb[1].mxu1 }
 0x2f5   : > { %v1881_v12 = vadd.f32 %v1880_v34, %v1879_v17  ;;  %v1882_v37 = vpop.f32.mrb[2].mxu1 }
 0x2f6   : > { %v1883_v53 = vpop.f32.mrb[3].mxu1 }
 0x2f7   : > { %v1401_v49 = vmul.f32 %v2097_v35, %v1881_v12  ;;  %v1884_v0 = vadd.f32 %v1883_v53, %v1882_v37 }
 0x2f9   : > { %v1424_v56 = vadd.f32 %v3181_v24, %v1401_v49  ;;  %v1402_v29 = vmul.f32 %v2099_v28, %v1884_v0  ;;  %v1240_v0 = vpop.xlane.xlu0 %1239 }
 0x2fb   : > { %v1456_v33 = vmin.f32 %v1424_v56, 0.0  ;;  %v3185_v62 = vadd.f32 %v3181_v24, %v1402_v29  ;;  %vm1440_vm0 = vcmp.gt.f32.partialorder %v1424_v56, 0.0 }
 0x2fd   : > { %v1472_v23 = vmul.f32 1.442695, %v1456_v33  ;;  %v1457_v59 = vmin.f32 %v3185_v62, 0.0  ;;  %vm1441_vm10 = vcmp.gt.f32.partialorder %v3185_v62, 0.0 }
 0x2ff   : > { %2108 = vpow2.f32 %v1472_v23  ;;  %v1474_v20 = vmul.f32 1.442695, %v1457_v59 }
 0x300   : > { %v1885_v26 = vpop.f32.mrb[4].mxu1 }
 0x301   : > { %v1886_v16 = vpop.f32.mrb[5].mxu1  ;;  %2110 = vpow2.f32 %v1474_v20 }
 0x302   : > { %v1887_v63 = vadd.f32 %v1886_v16, %v1885_v26  ;;  %v1888_v58 = vpop.f32.mrb[6].mxu1  ;;  %2112 = vrcp.f32 %v1228_v2 }
 0x303   : > { %v1889_v31 = vpop.f32.mrb[7].mxu1  ;;  %2114 = vrcp.f32 %v1231_v39 }
 0x304   : > { %v1403_v43 = vmul.f32 %v2101_v48, %v1887_v63  ;;  %v1890_v40 = vadd.f32 %v1889_v31, %v1888_v58 }
 0x306   : > { %v3189_v19 = vadd.f32 %v3181_v24, %v1403_v43  ;;  %v1404_v8 = vmul.f32 %v2103_v15, %v1890_v40 }
 0x308   : > { %v1458_v30 = vmin.f32 %v3189_v19, 0.0  ;;  %v3193_v13 = vadd.f32 %v3181_v24, %v1404_v8  ;;  %v1891_v21 = vpop.f32.mrb[8].mxu1  ;;  %vm1442_vm5 = vcmp.gt.f32.partialorder %v3189_v19, 0.0 }
 0x309   : > { %v1892_v38 = vpop.f32.mrb[9].mxu1  ;;  %v2109_v45 = vpop.eup %2108 }
 0x30a   : > { %v1476_v14 = vmul.f32 1.442695, %v1458_v30  ;;  %v1459_v11 = vmin.f32 %v3193_v13, 0.0  ;;  %v1893_v41 = vadd.f32 %v1892_v38, %v1891_v21  ;;  %v1894_v50 = vpop.f32.mrb[10].mxu1  ;;  %v1804_v47 = vadd.f32 -1.0, %v2109_v45  ;;  %v1246_v30 = vpop.xlane.xlu0 %1245 }
 0x30b   : > { %v1895_v61 = vpop.f32.mrb[11].mxu1  ;;  %v2111_v22 = vpop.eup %2110  ;;  %vm1443_vm9 = vcmp.gt.f32.partialorder %v3193_v13, 0.0 }
 0x30c   : > { %2116 = vpow2.f32 %v1476_v14  ;;  %v1478_v18 = vmul.f32 1.442695, %v1459_v11  ;;  %v1405_v51 = vmul.f32 %v2105_v9, %v1893_v41  ;;  %v1896_v5 = vadd.f32 %v1895_v61, %v1894_v50  ;;  %v2113_v3 = vpop.eup %2112  ;;  %v1249_v41 = vpop.xlane.xlu1 %1248 }
 0x30d   : > { %v1520_v25 = vsel %vm1440_vm0, %v1424_v56, %v1804_v47  ;;  %v1805_v32 = vadd.f32 -1.0, %v2111_v22  ;;  %v2115_v53 = vpop.eup %2114 }
 0x30e   : > { %2118 = vpow2.f32 %v1478_v18  ;;  %v3197_v4 = vadd.f32 %v3181_v24, %v1405_v51  ;;  %v1406_v1 = vmul.f32 %v2107_v42, %v1896_v5  ;;  %1536 = vst [vmem:[%s3204_s9] sm:$0xff] %v1520_v25 }
 0x30f   : > { %2120 = vrcp.f32 %v1234_v7  ;;  %v1521_v17 = vsel %vm1441_vm10, %v3185_v62, %v1805_v32  ;;  %v1252_v32 = vpop.xlane.xlu0 %1251 }
 0x310   : > { %v1460_v27 = vmin.f32 %v3197_v4, 0.0  ;;  %v3201_v55 = vadd.f32 %v3181_v24, %v1406_v1  ;;  %v1897_v10 = vpop.f32.mrb[12].mxu1  ;;  %2122 = vrcp.f32 %v1237_v54  ;;  %1537 = vst [vmem:[%s3204_s9 + $0x8] sm:$0xff] %v1521_v17  ;;  %vm1444_vm13 = vcmp.gt.f32.partialorder %v3197_v4, 0.0 }
 0x311   : > { %v1898_v57 = vpop.f32.mrb[13].mxu1 }
 0x312   : > { %v1480_v44 = vmul.f32 1.442695, %v1460_v27  ;;  %v1461_v6 = vmin.f32 %v3201_v55, 0.0  ;;  %v1899_v46 = vadd.f32 %v1898_v57, %v1897_v10  ;;  %v1900_v36 = vpop.f32.mrb[14].mxu1  ;;  %vm1445_vm14 = vcmp.gt.f32.partialorder %v3201_v55, 0.0 }
 0x313   : > { %v1901_v34 = vpop.f32.mrb[15].mxu1 }
 0x314   : > { %2124 = vpow2.f32 %v1480_v44  ;;  %v1482_v12 = vmul.f32 1.442695, %v1461_v6  ;;  %v1407_v37 = vmul.f32 %v2113_v3, %v1899_v46  ;;  %v1902_v35 = vadd.f32 %v1901_v34, %v1900_v36  ;;  %v1255_v36 = vpop.xlane.xlu1 %1254 }
 0x316   : > { %v2117_v49 = vpop.eup %2116  ;;  %2126 = vpow2.f32 %v1482_v12  ;;  %v3212_v28 = vadd.f32 %v3181_v24, %v1407_v37  ;;  %v1408_v52 = vmul.f32 %v2115_v53, %v1902_v35 }
 0x317   : > { %v1806_v56 = vadd.f32 -1.0, %v2117_v49  ;;  %2128 = vrcp.f32 %v1240_v0 }
 0x318   : > { %v2119_v29 = vpop.eup %2118  ;;  %v1462_v33 = vmin.f32 %v3212_v28, 0.0  ;;  %v3217_v62 = vadd.f32 %v3181_v24, %v1408_v52  ;;  %v1903_v26 = vpop.f32.mrb[16].mxu1  ;;  %2130 = vrcp.f32 %v1243_v60  ;;  %vm1446_vm11 = vcmp.gt.f32.partialorder %v3212_v28, 0.0 }
 0x319   : > { %v1522_v16 = vsel %vm1442_vm5, %v3189_v19, %v1806_v56  ;;  %v1807_v23 = vadd.f32 -1.0, %v2119_v29  ;;  %v1904_v59 = vpop.f32.mrb[17].mxu1  ;;  %v2121_v20 = vpop.eup %2120 }
 0x31a   : > { %1538 = vst [vmem:[%s3204_s9 + $0x10] sm:$0xff] %v1522_v16  ;;  %v1484_v63 = vmul.f32 1.442695, %v1462_v33  ;;  %v1463_v58 = vmin.f32 %v3217_v62, 0.0  ;;  %v1905_v48 = vadd.f32 %v1904_v59, %v1903_v26  ;;  %v1906_v31 = vpop.f32.mrb[18].mxu1  ;;  %v2123_v8 = vpop.eup %2122  ;;  %vm1447_vm1 = vcmp.gt.f32.partialorder %v3217_v62, 0.0 }
 0x31b   : > { %v1523_v43 = vsel %vm1443_vm9, %v3193_v13, %v1807_v23  ;;  %v1907_v40 = vpop.f32.mrb[19].mxu1 }
 0x31c   : > { %1539 = vst [vmem:[%s3204_s9 + $0x18] sm:$0xff] %v1523_v43  ;;  %2132 = vpow2.f32 %v1484_v63  ;;  %v1486_v15 = vmul.f32 1.442695, %v1463_v58  ;;  %v1409_v2 = vmul.f32 %v2121_v20, %v1905_v48  ;;  %v1908_v19 = vadd.f32 %v1907_v40, %v1906_v31 }
 0x31e   : > { %v2125_v39 = vpop.eup %2124  ;;  %2134 = vpow2.f32 %v1486_v15  ;;  %v3226_v21 = vadd.f32 %v3181_v24, %v1409_v2  ;;  %v1410_v38 = vmul.f32 %v2123_v8, %v1908_v19 }
 0x31f   : > { %v1808_v14 = vadd.f32 -1.0, %v2125_v39  ;;  %2136 = vrcp.f32 %v1246_v30 }
 0x320   : > { %v2127_v11 = vpop.eup %2126  ;;  %v1464_v13 = vmin.f32 %v3226_v21, 0.0  ;;  %v3231_v50 = vadd.f32 %v3181_v24, %v1410_v38  ;;  %v1909_v9 = vpop.f32.mrb[20].mxu1  ;;  %2138 = vrcp.f32 %v1249_v41  ;;  %vm1448_vm4 = vcmp.gt.f32.partialorder %v3226_v21, 0.0 }
 0x321   : > { %v1524_v61 = vsel %vm1444_vm13, %v3197_v4, %v1808_v14  ;;  %v1809_v18 = vadd.f32 -1.0, %v2127_v11  ;;  %v1910_v51 = vpop.f32.mrb[21].mxu1  ;;  %v2129_v1 = vpop.eup %2128 }
 0x322   : > { %1540 = vst [vmem:[%s3204_s9 + $0x20] sm:$0xff] %v1524_v61  ;;  %v1488_v5 = vmul.f32 1.442695, %v1464_v13  ;;  %v1465_v42 = vmin.f32 %v3231_v50, 0.0  ;;  %v1911_v45 = vadd.f32 %v1910_v51, %v1909_v9  ;;  %v1912_v7 = vpop.f32.mrb[22].mxu1  ;;  %v2131_v10 = vpop.eup %2130  ;;  %vm1449_vm8 = vcmp.gt.f32.partialorder %v3231_v50, 0.0 }
 0x323   : > { %v1525_v47 = vsel %vm1445_vm14, %v3201_v55, %v1809_v18  ;;  %v1913_v22 = vpop.f32.mrb[23].mxu1 }
 0x324   : > { %1541 = vst [vmem:[%s3204_s9 + $0x28] sm:$0xff] %v1525_v47  ;;  %2140 = vpow2.f32 %v1488_v5  ;;  %v1490_v54 = vmul.f32 1.442695, %v1465_v42  ;;  %v1411_v27 = vmul.f32 %v2129_v1, %v1911_v45  ;;  %v1914_v4 = vadd.f32 %v1913_v22, %v1912_v7 }
 0x326   : > { %v2133_v25 = vpop.eup %2132  ;;  %2142 = vpow2.f32 %v1490_v54  ;;  %v3240_v57 = vadd.f32 %v3181_v24, %v1411_v27  ;;  %v1412_v44 = vmul.f32 %v2131_v10, %v1914_v4 }
 0x327   : > { %v1810_v6 = vadd.f32 -1.0, %v2133_v25  ;;  %2144 = vrcp.f32 %v1252_v32 }
 0x328   : > { %v2135_v46 = vpop.eup %2134  ;;  %v1466_v55 = vmin.f32 %v3240_v57, 0.0  ;;  %v3245_v3 = vadd.f32 %v3181_v24, %v1412_v44  ;;  %v1915_v17 = vpop.f32.mrb[24].mxu1  ;;  %2146 = vrcp.f32 %v1255_v36  ;;  %vm1450_vm6 = vcmp.gt.f32.partialorder %v3240_v57, 0.0 }
 0x329   : > { %v1526_v34 = vsel %vm1446_vm11, %v3212_v28, %v1810_v6  ;;  %v1811_v12 = vadd.f32 -1.0, %v2135_v46  ;;  %v1916_v37 = vpop.f32.mrb[25].mxu1  ;;  %v2137_v52 = vpop.eup %2136 }
 0x32a   : > { %1542 = vst [vmem:[%s3204_s9 + $0x30] sm:$0xff] %v1526_v34  ;;  %v1492_v35 = vmul.f32 1.442695, %v1466_v55  ;;  %v1467_v53 = vmin.f32 %v3245_v3, 0.0  ;;  %v1917_v49 = vadd.f32 %v1916_v37, %v1915_v17  ;;  %v1918_v0 = vpop.f32.mrb[26].mxu1  ;;  %v2139_v26 = vpop.eup %2138  ;;  %vm1451_vm15 = vcmp.gt.f32.partialorder %v3245_v3, 0.0 }
 0x32b   : > { %v1527_v56 = vsel %vm1447_vm1, %v3217_v62, %v1811_v12  ;;  %v1919_v29 = vpop.f32.mrb[27].mxu1  ;;  %v1621_v55 = vld [vmem:[%s3204_s9] sm:$0xff] (%p2346_p10)  ;;  %v1625_v17 = vld [vmem:[%s3204_s9 + $0x10] sm:$0xff] (%p2346_p10)  ;;  %v1627_v34 = vld [vmem:[%s3204_s9 + $0x18] sm:$0xff] (%p2346_p10) }
 0x32c   : > { %1543 = vst [vmem:[%s3204_s9 + $0x38] sm:$0xff] %v1527_v56  ;;  %2148 = vpow2.f32 %v1492_v35  ;;  %v1494_v60 = vmul.f32 1.442695, %v1467_v53  ;;  %v1413_v33 = vmul.f32 %v2137_v52, %v1917_v49  ;;  %v1920_v28 = vadd.f32 %v1919_v29, %v1918_v0  ;;  %v1629_v12 = vld [vmem:[%s3204_s9 + $0x20] sm:$0xff] (%p2346_p10)  ;;  %v1631_v37 = vld [vmem:[%s3204_s9 + $0x28] sm:$0xff] (%p2346_p10)  ;;  %1622 = vst [vmem:[%s1563_s13] sm:$0xff] (%p2346_p10), %v1621_v55 }
 0x32d   : > { %1626 = vst [vmem:[%s1563_s13 + $0x40] sm:$0xff] (%p2346_p10), %v1625_v17  ;;  %1628 = vst [vmem:[%s1563_s13 + $0x60] sm:$0xff] (%p2346_p10), %v1627_v34 }
 0x32e   : > { %v2141_v16 = vpop.eup %2140  ;;  %2150 = vpow2.f32 %v1494_v60  ;;  %v1436_v23 = vadd.f32 %v3181_v24, %v1413_v33  ;;  %v1414_v59 = vmul.f32 %v2139_v26, %v1920_v28  ;;  %1630 = vst [vmem:[%s1563_s13 + $0x80] sm:$0xff] (%p2346_p10), %v1629_v12  ;;  %1632 = vst [vmem:[%s1563_s13 + $0xa0] sm:$0xff] (%p2346_p10), %v1631_v37 }
 0x32f   : > { %v1812_v63 = vadd.f32 -1.0, %v2141_v16 }
 0x330   : > { %v2143_v58 = vpop.eup %2142  ;;  %v1468_v48 = vmin.f32 %v1436_v23, 0.0  ;;  %v1437_v62 = vadd.f32 %v3181_v24, %v1414_v59  ;;  %v1921_v31 = vpop.f32.mrb[28].mxu1  ;;  %vm1452_vm3 = vcmp.gt.f32.partialorder %v1436_v23, 0.0 }
 0x331   : > { %v1528_v20 = vsel %vm1448_vm4, %v3226_v21, %v1812_v63  ;;  %v1813_v43 = vadd.f32 -1.0, %v2143_v58  ;;  %v1922_v40 = vpop.f32.mrb[29].mxu1  ;;  %v2145_v39 = vpop.eup %2144  ;;  %v1633_v35 = vld [vmem:[%s3204_s9 + $0x30] sm:$0xff] (%p2346_p10) }
 0x332   : > { %1544 = vst [vmem:[%s3204_s9 + $0x40] sm:$0xff] %v1528_v20  ;;  %v1496_v15 = vmul.f32 1.442695, %v1468_v48  ;;  %v1469_v2 = vmin.f32 %v1437_v62, 0.0  ;;  %v1923_v19 = vadd.f32 %v1922_v40, %v1921_v31  ;;  %v1924_v8 = vpop.f32.mrb[30].mxu1  ;;  %v2147_v21 = vpop.eup %2146  ;;  %vm1453_vm7 = vcmp.gt.f32.partialorder %v1437_v62, 0.0 }
 0x333   : > { %v1529_v30 = vsel %vm1449_vm8, %v3231_v50, %v1813_v43  ;;  %v1925_v38 = vpop.f32.mrb[31].mxu1  ;;  %v1635_v53 = vld [vmem:[%s3204_s9 + $0x38] sm:$0xff] (%p2346_p10)  ;;  %1634 = vst [vmem:[%s1563_s13 + $0xc0] sm:$0xff] (%p2346_p10), %v1633_v35 }
 0x334   : > { %1545 = vst [vmem:[%s3204_s9 + $0x48] sm:$0xff] %v1529_v30  ;;  %2152 = vpow2.f32 %v1496_v15  ;;  %v1498_v14 = vmul.f32 1.442695, %v1469_v2  ;;  %v1415_v11 = vmul.f32 %v2145_v39, %v1923_v19  ;;  %v1926_v41 = vadd.f32 %v1925_v38, %v1924_v8  ;;  %1636 = vst [vmem:[%s1563_s13 + $0xe0] sm:$0xff] (%p2346_p10), %v1635_v53 }
 0x336   : > { %v2149_v13 = vpop.eup %2148  ;;  %2154 = vpow2.f32 %v1498_v14  ;;  %v1438_v9 = vadd.f32 %v3181_v24, %v1415_v11  ;;  %v1416_v61 = vmul.f32 %v2147_v21, %v1926_v41 }
 0x337   : > { %v1814_v18 = vadd.f32 -1.0, %v2149_v13 }
 0x338   : > { %v2151_v51 = vpop.eup %2150  ;;  %v1470_v5 = vmin.f32 %v1438_v9, 0.0  ;;  %v1439_v50 = vadd.f32 %v3181_v24, %v1416_v61  ;;  %vm1454_vm2 = vcmp.gt.f32.partialorder %v1438_v9, 0.0 }
 0x339   : > { %v1530_v42 = vsel %vm1450_vm6, %v3240_v57, %v1814_v18  ;;  %v1815_v45 = vadd.f32 -1.0, %v2151_v51  ;;  %v1637_v49 = vld [vmem:[%s3204_s9 + $0x40] sm:$0xff] (%p2346_p10) }
 0x33a   : > { %1546 = vst [vmem:[%s3204_s9 + $0x50] sm:$0xff] %v1530_v42  ;;  %v1500_v7 = vmul.f32 1.442695, %v1470_v5  ;;  %v1471_v1 = vmin.f32 %v1439_v50, 0.0  ;;  %vm1455_vm12 = vcmp.gt.f32.partialorder %v1439_v50, 0.0  ;;  %1638 = vst [vmem:[%s1563_s13 + $0x100] sm:$0xff] (%p2346_p10), %v1637_v49 }
 0x33b   : > { %v1531_v47 = vsel %vm1451_vm15, %v3245_v3, %v1815_v45  ;;  %v1623_v3 = vld [vmem:[%s3204_s9 + $0x8] sm:$0xff] (%p2346_p10) }
 0x33c   : > { %1547 = vst [vmem:[%s3204_s9 + $0x58] sm:$0xff] %v1531_v47  ;;  %2156 = vpow2.f32 %v1500_v7  ;;  %v1502_v22 = vmul.f32 1.442695, %v1471_v1  ;;  %v1639_v0 = vld [vmem:[%s3204_s9 + $0x48] sm:$0xff] (%p2346_p10)  ;;  %1624 = vst [vmem:[%s1563_s13 + $0x20] sm:$0xff] (%p2346_p10), %v1623_v3 }
 0x33d   : > { %1640 = vst [vmem:[%s1563_s13 + $0x120] sm:$0xff] (%p2346_p10), %v1639_v0 }
 0x33e   : > { %v2153_v54 = vpop.eup %2152  ;;  %2158 = vpow2.f32 %v1502_v22 }
 0x33f   : > { %v1816_v27 = vadd.f32 -1.0, %v2153_v54 }
 0x340   : > { %v2155_v24 = vpop.eup %2154 }
 0x341   : > { %v1532_v4 = vsel %vm1452_vm3, %v1436_v23, %v1816_v27  ;;  %v1817_v10 = vadd.f32 -1.0, %v2155_v24  ;;  %v1641_v52 = vld [vmem:[%s3204_s9 + $0x50] sm:$0xff] (%p2346_p10) }
 0x342   : > { %1548 = vst [vmem:[%s3204_s9 + $0x60] sm:$0xff] %v1532_v4  ;;  %1642 = vst [vmem:[%s1563_s13 + $0x140] sm:$0xff] (%p2346_p10), %v1641_v52 }
 0x343   : > { %v1533_v25 = vsel %vm1453_vm7, %v1437_v62, %v1817_v10  ;;  %v1643_v56 = vld [vmem:[%s3204_s9 + $0x58] sm:$0xff] (%p2346_p10) }
 0x344   : > { %1549 = vst [vmem:[%s3204_s9 + $0x68] sm:$0xff] %v1533_v25  ;;  %1644 = vst [vmem:[%s1563_s13 + $0x160] sm:$0xff] (%p2346_p10), %v1643_v56 }
 0x346   : > { %v2157_v32 = vpop.eup %2156  ;;  %1558 = sbr.rel (!%p2346_p10) target bundleno = 853 (0x355), region = 124 }
 0x347   : > { %v1818_v57 = vadd.f32 -1.0, %v2157_v32 }
 0x348   : > { %v2159_v44 = vpop.eup %2158 }
 0x349   : > { %v1534_v6 = vsel %vm1454_vm2, %v1438_v9, %v1818_v57  ;;  %v1819_v46 = vadd.f32 -1.0, %v2159_v44  ;;  %v1645_v29 = vld [vmem:[%s3204_s9 + $0x60] sm:$0xff] (%p2346_p10) }
 0x34a   : > { %1550 = vst [vmem:[%s3204_s9 + $0x70] sm:$0xff] %v1534_v6  ;;  %1646 = vst [vmem:[%s1563_s13 + $0x180] sm:$0xff] (%p2346_p10), %v1645_v29 }
 0x34b   : > { %v1535_v36 = vsel %vm1455_vm12, %v1439_v50, %v1819_v46  ;;  %v1647_v60 = vld [vmem:[%s3204_s9 + $0x68] sm:$0xff] (%p2346_p10) }
 0x34c   : > { %1551 = vst [vmem:[%s3204_s9 + $0x78] sm:$0xff] %v1535_v36  ;;  %1648 = vst [vmem:[%s1563_s13 + $0x1a0] sm:$0xff] (%p2346_p10), %v1647_v60 }
 0x351   : > { %v1649_v33 = vld [vmem:[%s3204_s9 + $0x70] sm:$0xff] }
 0x352   : > { %1650 = vst [vmem:[%s1563_s13 + $0x1c0] sm:$0xff] %v1649_v33 }
 0x353   : > { %v1651_v28 = vld [vmem:[%s3204_s9 + $0x78] sm:$0xff] }
 0x354   : > { %1652 = vst [vmem:[%s1563_s13 + $0x1e0] sm:$0xff] %v1651_v28 }
 0x355 PF: > { %s16_s29 = sadd.s32 1, %s2230_s29   ;;  %s3415_s15 = sld [smem:[#allocation5_spill]] }
 0x356   : > { %p13_p3 = scmp.ge.s32.totalorder %s16_s29, 10   ;;  %s3416_s21 = smov %s2202_s22 }
 0x357   : > { %s3417_s22 = smov %s2351_s17  ;;  %s3418_s23 = smov %s2210_s24 }
 0x358   : > { %s3419_s24 = smov %s2354_s18  ;;  %s3420_s25 = smov %s2222_s27 }
 0x359   : > { %s3421_s26 = smov %s2226_s28  ;;  %s3422_s27 = smov %s3425_s30 }
 0x35a   :  { %15 = sbr.rel (!%p13_p3) target bundleno = 5 (0x5), region = 213 }
 0x35b   : > { %s3423_s28 = smov %s3415_s15 }

// kernel: gat_classifier_forward.7
= control target key start
LH: loop header
LB: loop body
LE: loop exit
PB: predicated region body
PF: predicated region fallthrough
CT: control target
= control target key end

     0   :  { %s781_s9 = smov 0   ;;  %s1084_s0 = inlined_call_operand.vmem [shape: f32[256,512], index: 0, kind: input, shape index: {}]   ;;  %s1085_s1 = inlined_call_operand.vmem [shape: f32[512,128], index: 1, kind: input, shape index: {}]   ;;  %s1086_s2 = inlined_call_operand.vmem [shape: f32[256,128], index: 2, kind: output, shape index: {}]  }
   0x1 LB: > { %s609_s10 = sadd.s32 4294967295, %s764_s9   ;;  %p613_p0 = scmp.ge.s32.totalorder %s764_s9, 1  ;;  %s764_s9 = sphi %s781_s9, %s12_s9  }
   0x2   : > { %p114_p1 = scmp.lt.s32.totalorder %s764_s9, 3 }
   0x4   : > { %p115_p2 = pnand %p613_p0, %p114_p1 }
   0x5   : > { %v263_v0 = vld [vmem:[%s1085_s1 + $0x80] sm:$0xff] (!%p115_p2)  ;;  %v264_v1 = vld [vmem:[%s1085_s1 + $0x88] sm:$0xff] (!%p115_p2)  ;;  %v265_v11 = vld [vmem:[%s1085_s1 + $0x90] sm:$0xff] (!%p115_p2)  ;;  %s834_s15 = sshll.u32 (!%p115_p2), %s609_s10, 4 }
   0x6   : > { %118 = sbr.rel (%p115_p2) target bundleno = 318 (0x13e), region = 28  ;;  %v295_v2 = vld [vmem:[%s1085_s1 + $0x180] sm:$0xff] (!%p115_p2)  ;;  %v319_v3 = vpack.c.bf16 (!%p115_p2), %v264_v1, %v263_v0  ;;  %v296_v4 = vld [vmem:[%s1085_s1 + $0x188] sm:$0xff] (!%p115_p2)  ;;  %v266_v13 = vld [vmem:[%s1085_s1 + $0x98] sm:$0xff] (!%p115_p2)  ;;  %p138_p3 = scmp.lt.s32.totalorder (!%p115_p2), %s834_s15, 31 }
   0x7   : > { %v247_v5 = vld [vmem:[%s1085_s1] sm:$0xff] (!%p115_p2)  ;;  %v248_v6 = vld [vmem:[%s1085_s1 + $0x8] sm:$0xff] (!%p115_p2)  ;;  %v335_v7 = vpack.c.bf16 (!%p115_p2), %v296_v4, %v295_v2  ;;  %v297_v14 = vld [vmem:[%s1085_s1 + $0x190] sm:$0xff] (!%p115_p2)  ;;  %v320_v16 = vpack.c.bf16 (!%p115_p2), %v266_v13, %v265_v11 }
   0x8   : > { %v311_v8 = vpack.c.bf16 (!%p115_p2), %v248_v6, %v247_v5  ;;  %v279_v9 = vld [vmem:[%s1085_s1 + $0x100] sm:$0xff] (!%p115_p2)  ;;  %v280_v10 = vld [vmem:[%s1085_s1 + $0x108] sm:$0xff] (!%p115_p2)  ;;  %622 = vmatprep.subr.bf16.mxu0 (!%p115_p2), %v319_v3  ;;  %v298_v15 = vld [vmem:[%s1085_s1 + $0x198] sm:$0xff] (!%p115_p2) }
   0x9   : > { %v327_v12 = vpack.c.bf16 (!%p115_p2), %v280_v10, %v279_v9  ;;  %686 = vmatprep.subr.bf16.mxu1 (!%p115_p2), %v335_v7  ;;  %v336_v17 = vpack.c.bf16 (!%p115_p2), %v298_v15, %v297_v14  ;;  %v249_v18 = vld [vmem:[%s1085_s1 + $0x10] sm:$0xff] (!%p115_p2)  ;;  %v250_v19 = vld [vmem:[%s1085_s1 + $0x18] sm:$0xff] (!%p115_p2)  ;;  %v267_v23 = vld [vmem:[%s1085_s1 + $0xa0] sm:$0xff] (!%p115_p2) }
   0xa   : > { %623 = vmatpush3.bf16.msra.mxu0 (!%p115_p2), %v311_v8  ;;  %v281_v20 = vld [vmem:[%s1085_s1 + $0x110] sm:$0xff] (!%p115_p2)  ;;  %v312_v21 = vpack.c.bf16 (!%p115_p2), %v250_v19, %v249_v18  ;;  %v282_v22 = vld [vmem:[%s1085_s1 + $0x118] sm:$0xff] (!%p115_p2)  ;;  %v268_v24 = vld [vmem:[%s1085_s1 + $0xa8] sm:$0xff] (!%p115_p2) }
   0xb   : > { %687 = vmatpush3.bf16.msra.mxu1 (!%p115_p2), %v327_v12  ;;  %624 = vmatprep.subr.bf16.mxu0 (!%p115_p2), %v320_v16  ;;  %v328_v25 = vpack.c.bf16 (!%p115_p2), %v282_v22, %v281_v20  ;;  %v321_v26 = vpack.c.bf16 (!%p115_p2), %v268_v24, %v267_v23  ;;  %v299_v27 = vld [vmem:[%s1085_s1 + $0x1a0] sm:$0xff] (!%p115_p2)  ;;  %v300_v28 = vld [vmem:[%s1085_s1 + $0x1a8] sm:$0xff] (!%p115_p2)  ;;  %v269_v35 = vld [vmem:[%s1085_s1 + $0xb0] sm:$0xff] (!%p115_p2) }
   0xc   : > { %688 = vmatprep.subr.bf16.mxu1 (!%p115_p2), %v336_v17  ;;  %v251_v29 = vld [vmem:[%s1085_s1 + $0x20] sm:$0xff] (!%p115_p2)  ;;  %v337_v30 = vpack.c.bf16 (!%p115_p2), %v300_v28, %v299_v27  ;;  %v252_v31 = vld [vmem:[%s1085_s1 + $0x28] sm:$0xff] (!%p115_p2)  ;;  %v270_v36 = vld [vmem:[%s1085_s1 + $0xb8] sm:$0xff] (!%p115_p2) }
   0xd   : > { %v283_v32 = vld [vmem:[%s1085_s1 + $0x120] sm:$0xff]  ;;  %v284_v33 = vld [vmem:[%s1085_s1 + $0x128] sm:$0xff]  ;;  %v313_v34 = vpack.c.bf16 %v252_v31, %v251_v29  ;;  %v301_v37 = vld [vmem:[%s1085_s1 + $0x1b0] sm:$0xff]  ;;  %v322_v39 = vpack.c.bf16 %v270_v36, %v269_v35  ;;  %s1088_s15 = smov (!%p138_p3, %s834_s15), 31 }
   0xe   : > { %625 = vmatpush3.bf16.msra.mxu0 %v312_v21  ;;  %v329_v38 = vpack.c.bf16 %v284_v33, %v283_v32  ;;  %v302_v40 = vld [vmem:[%s1085_s1 + $0x1b8] sm:$0xff]  ;;  %v253_v41 = vld [vmem:[%s1085_s1 + $0x30] sm:$0xff]  ;;  %v271_v46 = vld [vmem:[%s1085_s1 + $0xc0] sm:$0xff]  ;;  %s621_s10 = sshll.u32 %s1088_s15, 5  ;;  %s618_s14 = sshll.u32 %s1088_s15, 3 }
   0xf   : > { %689 = vmatpush3.bf16.msra.mxu1 %v328_v25  ;;  %626 = vmatprep.subr.bf16.mxu0 %v321_v26  ;;  %v254_v42 = vld [vmem:[%s1085_s1 + $0x38] sm:$0xff]  ;;  %v338_v43 = vpack.c.bf16 %v302_v40, %v301_v37  ;;  %v285_v44 = vld [vmem:[%s1085_s1 + $0x130] sm:$0xff]  ;;  %v272_v47 = vld [vmem:[%s1085_s1 + $0xc8] sm:$0xff]  ;;  %s951_s8 = scalar_lea.vmem %s1084_s0, %s621_s10  ;;  %s1063_s18 = scalar_lea.vmem %s1086_s2, %s618_s14 }
  0x10   : > { %690 = vmatprep.subr.bf16.mxu1 %v337_v30  ;;  %v286_v45 = vld [vmem:[%s1085_s1 + $0x138] sm:$0xff]  ;;  %v303_v48 = vld [vmem:[%s1085_s1 + $0x1c0] sm:$0xff]  ;;  %v304_v49 = vld [vmem:[%s1085_s1 + $0x1c8] sm:$0xff]  ;;  %v314_v50 = vpack.c.bf16 %v254_v42, %v253_v41  ;;  %v323_v52 = vpack.c.bf16 %v272_v47, %v271_v46 }
  0x11   : > { %v330_v51 = vpack.c.bf16 %v286_v45, %v285_v44  ;;  %v255_v53 = vld [vmem:[%s1085_s1 + $0x40] sm:$0xff]  ;;  %v256_v54 = vld [vmem:[%s1085_s1 + $0x48] sm:$0xff]  ;;  %v339_v56 = vpack.c.bf16 %v304_v49, %v303_v48  ;;  %v273_v58 = vld [vmem:[%s1085_s1 + $0xd0] sm:$0xff] }
  0x12   : > { %627 = vmatpush3.bf16.msra.mxu0 %v313_v34  ;;  %v287_v55 = vld [vmem:[%s1085_s1 + $0x140] sm:$0xff]  ;;  %v288_v57 = vld [vmem:[%s1085_s1 + $0x148] sm:$0xff]  ;;  %v274_v59 = vld [vmem:[%s1085_s1 + $0xd8] sm:$0xff]  ;;  %v315_v62 = vpack.c.bf16 %v256_v54, %v255_v53 }
  0x13   : > { %691 = vmatpush3.bf16.msra.mxu1 %v329_v38  ;;  %628 = vmatprep.subr.bf16.mxu0 %v322_v39  ;;  %v305_v60 = vld [vmem:[%s1085_s1 + $0x1d0] sm:$0xff]  ;;  %v306_v61 = vld [vmem:[%s1085_s1 + $0x1d8] sm:$0xff]  ;;  %v331_v63 = vpack.c.bf16 %v288_v57, %v287_v55  ;;  %v324_v0 = vpack.c.bf16 %v274_v59, %v273_v58  ;;  %v275_v6 = vld [vmem:[%s1085_s1 + $0xe0] sm:$0xff] }
  0x14   : > { %692 = vmatprep.subr.bf16.mxu1 %v338_v43  ;;  %v257_v1 = vld [vmem:[%s1085_s1 + $0x50] sm:$0xff]  ;;  %v258_v2 = vld [vmem:[%s1085_s1 + $0x58] sm:$0xff]  ;;  %v340_v4 = vpack.c.bf16 %v306_v61, %v305_v60  ;;  %v276_v7 = vld [vmem:[%s1085_s1 + $0xe8] sm:$0xff] }
  0x15   : > { %v289_v3 = vld [vmem:[%s1085_s1 + $0x150] sm:$0xff]  ;;  %v290_v5 = vld [vmem:[%s1085_s1 + $0x158] sm:$0xff]  ;;  %v307_v8 = vld [vmem:[%s1085_s1 + $0x1e0] sm:$0xff]  ;;  %v316_v11 = vpack.c.bf16 %v258_v2, %v257_v1  ;;  %v325_v16 = vpack.c.bf16 %v276_v7, %v275_v6 }
  0x16   : > { %629 = vmatpush3.bf16.msra.mxu0 %v314_v50  ;;  %v308_v9 = vld [vmem:[%s1085_s1 + $0x1e8] sm:$0xff]  ;;  %v259_v10 = vld [vmem:[%s1085_s1 + $0x60] sm:$0xff]  ;;  %v332_v15 = vpack.c.bf16 %v290_v5, %v289_v3  ;;  %v277_v17 = vld [vmem:[%s1085_s1 + $0xf0] sm:$0xff] }
  0x17   : > { %693 = vmatpush3.bf16.msra.mxu1 %v330_v51  ;;  %630 = vmatprep.subr.bf16.mxu0 %v323_v52  ;;  %v260_v12 = vld [vmem:[%s1085_s1 + $0x68] sm:$0xff]  ;;  %v291_v13 = vld [vmem:[%s1085_s1 + $0x160] sm:$0xff]  ;;  %v341_v20 = vpack.c.bf16 %v308_v9, %v307_v8  ;;  %v278_v21 = vld [vmem:[%s1085_s1 + $0xf8] sm:$0xff] }
  0x18   : > { %694 = vmatprep.subr.bf16.mxu1 %v339_v56  ;;  %v292_v14 = vld [vmem:[%s1085_s1 + $0x168] sm:$0xff]  ;;  %v154_v23 = vld [vmem:[%s951_s8 + $0x18] sm:$0xff]  ;;  %v309_v25 = vld [vmem:[%s1085_s1 + $0x1f0] sm:$0xff]  ;;  %v317_v28 = vpack.c.bf16 %v260_v12, %v259_v10  ;;  %v326_v30 = vpack.c.bf16 %v278_v21, %v277_v17 }
  0x19   : > { %v152_v18 = vld [vmem:[%s951_s8 + $0x8] sm:$0xff]  ;;  %v158_v24 = vld [vmem:[%s951_s8 + $0x38] sm:$0xff]  ;;  %v333_v29 = vpack.c.bf16 %v292_v14, %v291_v13  ;;  %v261_v31 = vld [vmem:[%s1085_s1 + $0x70] sm:$0xff] }
  0x1a   : > { %631 = vmatpush3.bf16.msra.mxu0 %v315_v62  ;;  %v156_v19 = vld [vmem:[%s951_s8 + $0x28] sm:$0xff]  ;;  %v310_v26 = vld [vmem:[%s1085_s1 + $0x1f8] sm:$0xff]  ;;  %v218_v27 = vpack.c.bf16 %v158_v24, %v154_v23  ;;  %v293_v34 = vld [vmem:[%s1085_s1 + $0x170] sm:$0xff] }
  0x1b   : > { %695 = vmatpush3.bf16.msra.mxu1 %v331_v63  ;;  %632 = vmatprep.subr.bf16.mxu0 %v324_v0  ;;  %v216_v22 = vpack.c.bf16 %v156_v19, %v152_v18  ;;  %v262_v32 = vld [vmem:[%s1085_s1 + $0x78] sm:$0xff]  ;;  %v342_v33 = vpack.c.bf16 %v310_v26, %v309_v25  ;;  %v151_v37 = vld [vmem:[%s951_s8] sm:$0xff]  ;;  %v153_v39 = vld [vmem:[%s951_s8 + $0x10] sm:$0xff] }
  0x1c   : > { %696 = vmatprep.subr.bf16.mxu1 %v340_v4  ;;  %v294_v35 = vld [vmem:[%s1085_s1 + $0x178] sm:$0xff]  ;;  %472 = vmatprep.mubr.bf16.mxu1 %v218_v27  ;;  %v318_v36 = vpack.c.bf16 %v262_v32, %v261_v31  ;;  %v155_v38 = vld [vmem:[%s951_s8 + $0x20] sm:$0xff]  ;;  %v157_v41 = vld [vmem:[%s951_s8 + $0x30] sm:$0xff] }
  0x1d   : > { %375 = vmatprep.mubr.bf16.mxu0 %v216_v22  ;;  %v334_v40 = vpack.c.bf16 %v294_v35, %v293_v34  ;;  %v160_v42 = vld [vmem:[%s951_s8 + $0x48] sm:$0xff]  ;;  %v162_v44 = vld [vmem:[%s951_s8 + $0x58] sm:$0xff]  ;;  %v215_v46 = vpack.c.bf16 %v155_v38, %v151_v37  ;;  %v217_v47 = vpack.c.bf16 %v157_v41, %v153_v39  ;;  %v159_v50 = vld [vmem:[%s951_s8 + $0x40] sm:$0xff] }
  0x1e   : > { %633 = vmatpush3.bf16.msra.mxu0 %v316_v11  ;;  %v164_v43 = vld [vmem:[%s951_s8 + $0x68] sm:$0xff]  ;;  %v166_v45 = vld [vmem:[%s951_s8 + $0x78] sm:$0xff]  ;;  %v163_v51 = vld [vmem:[%s951_s8 + $0x60] sm:$0xff] }
  0x1f   : > { %697 = vmatpush3.bf16.msra.mxu1 %v332_v15  ;;  %634 = vmatprep.subr.bf16.mxu0 %v325_v16  ;;  %v220_v48 = vpack.c.bf16 %v164_v43, %v160_v42  ;;  %v222_v49 = vpack.c.bf16 %v166_v45, %v162_v44  ;;  %v161_v52 = vld [vmem:[%s951_s8 + $0x50] sm:$0xff]  ;;  %v168_v54 = vld [vmem:[%s951_s8 + $0x88] sm:$0xff]  ;;  %v170_v56 = vld [vmem:[%s951_s8 + $0x98] sm:$0xff]  ;;  %v219_v58 = vpack.c.bf16 %v163_v51, %v159_v50 }
  0x20   : > { %698 = vmatprep.subr.bf16.mxu1 %v341_v20  ;;  %v165_v53 = vld [vmem:[%s951_s8 + $0x70] sm:$0xff]  ;;  %v172_v55 = vld [vmem:[%s951_s8 + $0xa8] sm:$0xff]  ;;  %v174_v57 = vld [vmem:[%s951_s8 + $0xb8] sm:$0xff] }
  0x21   : > { %v221_v59 = vpack.c.bf16 %v165_v53, %v161_v52  ;;  %v224_v60 = vpack.c.bf16 %v172_v55, %v168_v54  ;;  %v226_v61 = vpack.c.bf16 %v174_v57, %v170_v56  ;;  %v167_v62 = vld [vmem:[%s951_s8 + $0x80] sm:$0xff]  ;;  %v169_v0 = vld [vmem:[%s951_s8 + $0x90] sm:$0xff]  ;;  %v176_v2 = vld [vmem:[%s951_s8 + $0xc8] sm:$0xff] }
  0x22   : > { %635 = vmatpush3.bf16.msra.mxu0 %v317_v28  ;;  %v171_v63 = vld [vmem:[%s951_s8 + $0xa0] sm:$0xff]  ;;  %v173_v1 = vld [vmem:[%s951_s8 + $0xb0] sm:$0xff]  ;;  %v180_v3 = vld [vmem:[%s951_s8 + $0xe8] sm:$0xff] }
  0x23   : > { %699 = vmatpush3.bf16.msra.mxu1 %v333_v29  ;;  %636 = vmatprep.subr.bf16.mxu0 %v326_v30  ;;  %v178_v4 = vld [vmem:[%s951_s8 + $0xd8] sm:$0xff]  ;;  %v223_v6 = vpack.c.bf16 %v171_v63, %v167_v62  ;;  %v225_v7 = vpack.c.bf16 %v173_v1, %v169_v0  ;;  %v228_v8 = vpack.c.bf16 %v180_v3, %v176_v2  ;;  %v175_v10 = vld [vmem:[%s951_s8 + $0xc0] sm:$0xff]  ;;  %v177_v12 = vld [vmem:[%s951_s8 + $0xd0] sm:$0xff] }
  0x24   : > { %700 = vmatprep.subr.bf16.mxu1 %v342_v33  ;;  %v182_v5 = vld [vmem:[%s951_s8 + $0xf8] sm:$0xff]  ;;  %v179_v11 = vld [vmem:[%s951_s8 + $0xe0] sm:$0xff]  ;;  %v181_v13 = vld [vmem:[%s951_s8 + $0xf0] sm:$0xff] }
  0x25   : > { %v230_v9 = vpack.c.bf16 %v182_v5, %v178_v4  ;;  %v184_v14 = vld [vmem:[%s951_s8 + $0x108] sm:$0xff]  ;;  %v186_v16 = vld [vmem:[%s951_s8 + $0x118] sm:$0xff]  ;;  %v227_v18 = vpack.c.bf16 %v179_v11, %v175_v10  ;;  %v229_v19 = vpack.c.bf16 %v181_v13, %v177_v12  ;;  %v183_v22 = vld [vmem:[%s951_s8 + $0x100] sm:$0xff] }
  0x26   : > { %637 = vmatpush3.bf16.msra.mxu0 %v318_v36  ;;  %v188_v15 = vld [vmem:[%s951_s8 + $0x128] sm:$0xff]  ;;  %v190_v17 = vld [vmem:[%s951_s8 + $0x138] sm:$0xff]  ;;  %v187_v23 = vld [vmem:[%s951_s8 + $0x120] sm:$0xff] }
  0x27   : > { %701 = vmatpush3.bf16.msra.mxu1 %v334_v40  ;;  %v232_v20 = vpack.c.bf16 %v188_v15, %v184_v14  ;;  %v234_v21 = vpack.c.bf16 %v190_v17, %v186_v16  ;;  %v185_v24 = vld [vmem:[%s951_s8 + $0x110] sm:$0xff]  ;;  %v192_v26 = vld [vmem:[%s951_s8 + $0x148] sm:$0xff]  ;;  %v194_v28 = vld [vmem:[%s951_s8 + $0x158] sm:$0xff]  ;;  %v231_v30 = vpack.c.bf16 %v187_v23, %v183_v22 }
  0x28   : > { %v189_v25 = vld [vmem:[%s951_s8 + $0x130] sm:$0xff]  ;;  %v196_v27 = vld [vmem:[%s951_s8 + $0x168] sm:$0xff]  ;;  %v198_v29 = vld [vmem:[%s951_s8 + $0x178] sm:$0xff] }
  0x29   : > { %376 = vmatmul.mubr.bf16.vlgmr.msra.gmra.mrb[0].mxu0 %v215_v46  ;;  %v233_v31 = vpack.c.bf16 %v189_v25, %v185_v24  ;;  %v236_v32 = vpack.c.bf16 %v196_v27, %v192_v26  ;;  %v238_v33 = vpack.c.bf16 %v198_v29, %v194_v28  ;;  %v191_v34 = vld [vmem:[%s951_s8 + $0x140] sm:$0xff]  ;;  %v193_v36 = vld [vmem:[%s951_s8 + $0x150] sm:$0xff]  ;;  %v200_v38 = vld [vmem:[%s951_s8 + $0x188] sm:$0xff] }
  0x2a   : > { %473 = vmatmul.mubr.bf16.vlgmr.msra.gmra.mrb[0].mxu1 %v217_v47  ;;  %383 = vmatprep.mubr.bf16.mxu0 %v220_v48  ;;  %v195_v35 = vld [vmem:[%s951_s8 + $0x160] sm:$0xff]  ;;  %v197_v37 = vld [vmem:[%s951_s8 + $0x170] sm:$0xff]  ;;  %v204_v39 = vld [vmem:[%s951_s8 + $0x1a8] sm:$0xff] }
  0x2b   : > { %480 = vmatprep.mubr.bf16.mxu1 %v222_v49  ;;  %v202_v40 = vld [vmem:[%s951_s8 + $0x198] sm:$0xff]  ;;  %v235_v42 = vpack.c.bf16 %v195_v35, %v191_v34  ;;  %v237_v43 = vpack.c.bf16 %v197_v37, %v193_v36  ;;  %v240_v44 = vpack.c.bf16 %v204_v39, %v200_v38  ;;  %v199_v46 = vld [vmem:[%s951_s8 + $0x180] sm:$0xff]  ;;  %v201_v48 = vld [vmem:[%s951_s8 + $0x190] sm:$0xff] }
  0x2c   : > { %v206_v41 = vld [vmem:[%s951_s8 + $0x1b8] sm:$0xff]  ;;  %v203_v47 = vld [vmem:[%s951_s8 + $0x1a0] sm:$0xff]  ;;  %v205_v49 = vld [vmem:[%s951_s8 + $0x1b0] sm:$0xff] }
  0x2d   : > { %v242_v45 = vpack.c.bf16 %v206_v41, %v202_v40  ;;  %v208_v50 = vld [vmem:[%s951_s8 + $0x1c8] sm:$0xff]  ;;  %v210_v52 = vld [vmem:[%s951_s8 + $0x1d8] sm:$0xff]  ;;  %v239_v54 = vpack.c.bf16 %v203_v47, %v199_v46  ;;  %v241_v55 = vpack.c.bf16 %v205_v49, %v201_v48 }
  0x2e   : > { %v212_v51 = vld [vmem:[%s951_s8 + $0x1e8] sm:$0xff]  ;;  %v214_v53 = vld [vmem:[%s951_s8 + $0x1f8] sm:$0xff] }
  0x2f   : > { %v244_v56 = vpack.c.bf16 %v212_v51, %v208_v50  ;;  %v246_v57 = vpack.c.bf16 %v214_v53, %v210_v52 }
  0x31   : > { %384 = vmatmul.mubr.bf16.gmra.mrb[4].mxu0 %v219_v58  ;;  %v207_v58 = vld [vmem:[%s951_s8 + $0x1c0] sm:$0xff] }
  0x32   : > { %481 = vmatmul.mubr.bf16.gmra.mrb[4].mxu1 %v221_v59  ;;  %391 = vmatprep.mubr.bf16.mxu0 %v224_v60  ;;  %v211_v59 = vld [vmem:[%s951_s8 + $0x1e0] sm:$0xff]  ;;  %v209_v60 = vld [vmem:[%s951_s8 + $0x1d0] sm:$0xff] }
  0x33   : > { %488 = vmatprep.mubr.bf16.mxu1 %v226_v61  ;;  %v213_v61 = vld [vmem:[%s951_s8 + $0x1f0] sm:$0xff]  ;;  %v243_v62 = vpack.c.bf16 %v211_v59, %v207_v58 }
  0x34   : > { %v245_v63 = vpack.c.bf16 %v213_v61, %v209_v60 }
  0x39   : > { %392 = vmatmul.mubr.bf16.gmra.mrb[8].mxu0 %v223_v6 }
  0x3a   : > { %489 = vmatmul.mubr.bf16.gmra.mrb[8].mxu1 %v225_v7  ;;  %399 = vmatprep.mubr.bf16.mxu0 %v228_v8 }
  0x3b   : > { %496 = vmatprep.mubr.bf16.mxu1 %v230_v9 }
  0x41   : > { %400 = vmatmul.mubr.bf16.gmra.mrb[12].mxu0 %v227_v18 }
  0x42   : > { %497 = vmatmul.mubr.bf16.gmra.mrb[12].mxu1 %v229_v19  ;;  %407 = vmatprep.mubr.bf16.mxu0 %v232_v20 }
  0x43   : > { %504 = vmatprep.mubr.bf16.mxu1 %v234_v21 }
  0x49   : > { %408 = vmatmul.mubr.bf16.gmra.mrb[16].mxu0 %v231_v30 }
  0x4a   : > { %505 = vmatmul.mubr.bf16.gmra.mrb[16].mxu1 %v233_v31  ;;  %415 = vmatprep.mubr.bf16.mxu0 %v236_v32 }
  0x4b   : > { %512 = vmatprep.mubr.bf16.mxu1 %v238_v33 }
  0x51   : > { %416 = vmatmul.mubr.bf16.gmra.mrb[20].mxu0 %v235_v42 }
  0x52   : > { %513 = vmatmul.mubr.bf16.gmra.mrb[20].mxu1 %v237_v43  ;;  %423 = vmatprep.mubr.bf16.mxu0 %v240_v44 }
  0x53   : > { %520 = vmatprep.mubr.bf16.mxu1 %v242_v45 }
  0x59   : > { %424 = vmatmul.mubr.bf16.gmra.mrb[24].mxu0 %v239_v54 }
  0x5a   : > { %521 = vmatmul.mubr.bf16.gmra.mrb[24].mxu1 %v241_v55  ;;  %431 = vmatprep.mubr.bf16.mxu0 %v244_v56 }
  0x5b   : > { %528 = vmatprep.mubr.bf16.mxu1 %v246_v57 }
  0x61   : > { %432 = vmatmul.mubr.bf16.gmra.mrb[28].mxu0 %v243_v62 }
  0x62   : > { %529 = vmatmul.mubr.bf16.gmra.mrb[28].mxu1 %v245_v63 }
  0xfc   : > { %v638_v0 = vpop.f32.mrb[0].mxu0 }
  0xfd   : > { %v702_v1 = vpop.f32.mrb[0].mxu1  ;;  %v639_v2 = vpop.f32.mrb[1].mxu0 }
  0xfe   : > { %v640_v3 = vadd.f32 %v639_v2, %v638_v0  ;;  %v703_v4 = vpop.f32.mrb[1].mxu1  ;;  %v641_v5 = vpop.f32.mrb[2].mxu0 }
  0xff   : > { %v704_v6 = vadd.f32 %v703_v4, %v702_v1  ;;  %v705_v7 = vpop.f32.mrb[2].mxu1  ;;  %v642_v8 = vpop.f32.mrb[3].mxu0 }
 0x100   : > { %v643_v9 = vadd.f32 %v642_v8, %v641_v5  ;;  %v706_v10 = vpop.f32.mrb[3].mxu1 }
 0x101   : > { %v475_v11 = vadd.f32 %v704_v6, %v640_v3  ;;  %v707_v12 = vadd.f32 %v706_v10, %v705_v7 }
 0x103   : > { %537 = vst [vmem:[%s1063_s18] sm:$0xff] %v475_v11  ;;  %v478_v13 = vadd.f32 %v707_v12, %v643_v9 }
 0x104   : > { %v644_v14 = vpop.f32.mrb[4].mxu0 }
 0x105   : > { %538 = vst [vmem:[%s1063_s18 + $0x8] sm:$0xff] %v478_v13  ;;  %v708_v15 = vpop.f32.mrb[4].mxu1  ;;  %v645_v16 = vpop.f32.mrb[5].mxu0 }
 0x106   : > { %v646_v17 = vadd.f32 %v645_v16, %v644_v14  ;;  %v709_v18 = vpop.f32.mrb[5].mxu1  ;;  %v647_v19 = vpop.f32.mrb[6].mxu0 }
 0x107   : > { %v710_v20 = vadd.f32 %v709_v18, %v708_v15  ;;  %v711_v21 = vpop.f32.mrb[6].mxu1  ;;  %v648_v22 = vpop.f32.mrb[7].mxu0 }
 0x108   : > { %v649_v23 = vadd.f32 %v648_v22, %v647_v19  ;;  %v712_v24 = vpop.f32.mrb[7].mxu1 }
 0x109   : > { %v483_v25 = vadd.f32 %v710_v20, %v646_v17  ;;  %v713_v26 = vadd.f32 %v712_v24, %v711_v21 }
 0x10b   : > { %539 = vst [vmem:[%s1063_s18 + $0x10] sm:$0xff] %v483_v25  ;;  %v486_v27 = vadd.f32 %v713_v26, %v649_v23 }
 0x10c   : > { %v650_v28 = vpop.f32.mrb[8].mxu0 }
 0x10d   : > { %540 = vst [vmem:[%s1063_s18 + $0x18] sm:$0xff] %v486_v27  ;;  %v714_v29 = vpop.f32.mrb[8].mxu1  ;;  %v651_v30 = vpop.f32.mrb[9].mxu0 }
 0x10e   : > { %v652_v31 = vadd.f32 %v651_v30, %v650_v28  ;;  %v715_v32 = vpop.f32.mrb[9].mxu1  ;;  %v653_v33 = vpop.f32.mrb[10].mxu0 }
 0x10f   : > { %v716_v34 = vadd.f32 %v715_v32, %v714_v29  ;;  %v717_v35 = vpop.f32.mrb[10].mxu1  ;;  %v654_v36 = vpop.f32.mrb[11].mxu0 }
 0x110   : > { %v655_v37 = vadd.f32 %v654_v36, %v653_v33  ;;  %v718_v38 = vpop.f32.mrb[11].mxu1 }
 0x111   : > { %v491_v39 = vadd.f32 %v716_v34, %v652_v31  ;;  %v719_v40 = vadd.f32 %v718_v38, %v717_v35 }
 0x113   : > { %541 = vst [vmem:[%s1063_s18 + $0x20] sm:$0xff] %v491_v39  ;;  %v494_v41 = vadd.f32 %v719_v40, %v655_v37 }
 0x114   : > { %v656_v42 = vpop.f32.mrb[12].mxu0 }
 0x115   : > { %542 = vst [vmem:[%s1063_s18 + $0x28] sm:$0xff] %v494_v41  ;;  %v720_v43 = vpop.f32.mrb[12].mxu1  ;;  %v657_v44 = vpop.f32.mrb[13].mxu0 }
 0x116   : > { %v658_v45 = vadd.f32 %v657_v44, %v656_v42  ;;  %v721_v46 = vpop.f32.mrb[13].mxu1  ;;  %v659_v47 = vpop.f32.mrb[14].mxu0 }
 0x117   : > { %v722_v48 = vadd.f32 %v721_v46, %v720_v43  ;;  %v723_v49 = vpop.f32.mrb[14].mxu1  ;;  %v660_v50 = vpop.f32.mrb[15].mxu0 }
 0x118   : > { %v661_v51 = vadd.f32 %v660_v50, %v659_v47  ;;  %v724_v52 = vpop.f32.mrb[15].mxu1 }
 0x119   : > { %v499_v53 = vadd.f32 %v722_v48, %v658_v45  ;;  %v725_v54 = vadd.f32 %v724_v52, %v723_v49 }
 0x11b   : > { %543 = vst [vmem:[%s1063_s18 + $0x30] sm:$0xff] %v499_v53  ;;  %v502_v55 = vadd.f32 %v725_v54, %v661_v51 }
 0x11c   : > { %v662_v56 = vpop.f32.mrb[16].mxu0 }
 0x11d   : > { %544 = vst [vmem:[%s1063_s18 + $0x38] sm:$0xff] %v502_v55  ;;  %v726_v57 = vpop.f32.mrb[16].mxu1  ;;  %v663_v58 = vpop.f32.mrb[17].mxu0 }
 0x11e   : > { %v664_v59 = vadd.f32 %v663_v58, %v662_v56  ;;  %v727_v60 = vpop.f32.mrb[17].mxu1  ;;  %v665_v61 = vpop.f32.mrb[18].mxu0 }
 0x11f   : > { %v728_v62 = vadd.f32 %v727_v60, %v726_v57  ;;  %v729_v63 = vpop.f32.mrb[18].mxu1  ;;  %v666_v0 = vpop.f32.mrb[19].mxu0 }
 0x120   : > { %v667_v1 = vadd.f32 %v666_v0, %v665_v61  ;;  %v730_v2 = vpop.f32.mrb[19].mxu1 }
 0x121   : > { %v507_v3 = vadd.f32 %v728_v62, %v664_v59  ;;  %v731_v4 = vadd.f32 %v730_v2, %v729_v63 }
 0x123   : > { %545 = vst [vmem:[%s1063_s18 + $0x40] sm:$0xff] %v507_v3  ;;  %v510_v5 = vadd.f32 %v731_v4, %v667_v1 }
 0x124   : > { %v668_v6 = vpop.f32.mrb[20].mxu0 }
 0x125   : > { %546 = vst [vmem:[%s1063_s18 + $0x48] sm:$0xff] %v510_v5  ;;  %v732_v7 = vpop.f32.mrb[20].mxu1  ;;  %v669_v8 = vpop.f32.mrb[21].mxu0 }
 0x126   : > { %v670_v9 = vadd.f32 %v669_v8, %v668_v6  ;;  %v733_v10 = vpop.f32.mrb[21].mxu1  ;;  %v671_v11 = vpop.f32.mrb[22].mxu0 }
 0x127   : > { %v734_v12 = vadd.f32 %v733_v10, %v732_v7  ;;  %v735_v13 = vpop.f32.mrb[22].mxu1  ;;  %v672_v14 = vpop.f32.mrb[23].mxu0 }
 0x128   : > { %v673_v15 = vadd.f32 %v672_v14, %v671_v11  ;;  %v736_v16 = vpop.f32.mrb[23].mxu1 }
 0x129   : > { %v515_v17 = vadd.f32 %v734_v12, %v670_v9  ;;  %v737_v18 = vadd.f32 %v736_v16, %v735_v13 }
 0x12b   : > { %547 = vst [vmem:[%s1063_s18 + $0x50] sm:$0xff] %v515_v17  ;;  %v518_v19 = vadd.f32 %v737_v18, %v673_v15 }
 0x12c   : > { %v674_v20 = vpop.f32.mrb[24].mxu0 }
 0x12d   : > { %548 = vst [vmem:[%s1063_s18 + $0x58] sm:$0xff] %v518_v19  ;;  %v738_v21 = vpop.f32.mrb[24].mxu1  ;;  %v675_v22 = vpop.f32.mrb[25].mxu0 }
 0x12e   : > { %v676_v23 = vadd.f32 %v675_v22, %v674_v20  ;;  %v739_v24 = vpop.f32.mrb[25].mxu1  ;;  %v677_v25 = vpop.f32.mrb[26].mxu0 }
 0x12f   : > { %v740_v26 = vadd.f32 %v739_v24, %v738_v21  ;;  %v741_v27 = vpop.f32.mrb[26].mxu1  ;;  %v678_v28 = vpop.f32.mrb[27].mxu0 }
 0x130   : > { %v679_v29 = vadd.f32 %v678_v28, %v677_v25  ;;  %v742_v30 = vpop.f32.mrb[27].mxu1 }
 0x131   : > { %v523_v31 = vadd.f32 %v740_v26, %v676_v23  ;;  %v743_v32 = vadd.f32 %v742_v30, %v741_v27 }
 0x133   : > { %549 = vst [vmem:[%s1063_s18 + $0x60] sm:$0xff] %v523_v31  ;;  %v526_v33 = vadd.f32 %v743_v32, %v679_v29 }
 0x134   : > { %v680_v34 = vpop.f32.mrb[28].mxu0 }
 0x135   : > { %550 = vst [vmem:[%s1063_s18 + $0x68] sm:$0xff] %v526_v33  ;;  %v744_v35 = vpop.f32.mrb[28].mxu1  ;;  %v681_v36 = vpop.f32.mrb[29].mxu0 }
 0x136   : > { %v682_v37 = vadd.f32 %v681_v36, %v680_v34  ;;  %v745_v38 = vpop.f32.mrb[29].mxu1  ;;  %v683_v39 = vpop.f32.mrb[30].mxu0 }
 0x137   : > { %v746_v40 = vadd.f32 %v745_v38, %v744_v35  ;;  %v747_v41 = vpop.f32.mrb[30].mxu1  ;;  %v684_v42 = vpop.f32.mrb[31].mxu0 }
 0x138   : > { %v685_v43 = vadd.f32 %v684_v42, %v683_v39  ;;  %v748_v44 = vpop.f32.mrb[31].mxu1 }
 0x139   : > { %v531_v45 = vadd.f32 %v746_v40, %v682_v37  ;;  %v749_v46 = vadd.f32 %v748_v44, %v747_v41 }
 0x13b   : > { %551 = vst [vmem:[%s1063_s18 + $0x70] sm:$0xff] %v531_v45  ;;  %v534_v47 = vadd.f32 %v749_v46, %v685_v43 }
 0x13d   : > { %552 = vst [vmem:[%s1063_s18 + $0x78] sm:$0xff] %v534_v47 }
 0x13e PF: > { %s12_s9 = sadd.s32 1, %s764_s9  }
 0x13f   : > { %p9_p4 = scmp.ge.s32.totalorder %s12_s9, 4  }
 0x141   :  { %11 = sbr.rel (!%p9_p4) target bundleno = 1 (0x1), region = 58 }

// kernel: gat_classifier_forward.8
= control target key start
LH: loop header
LB: loop body
LE: loop exit
PB: predicated region body
PF: predicated region fallthrough
CT: control target
= control target key end

     0   :  { %s1709_s21 = smov 0   ;;  %s1711_s22 = smov 0   ;;  %s2560_s0 = inlined_call_operand.vmem [shape: f32[256,128], index: 0, kind: input, shape index: {}, may-alias: {0,1}]   ;;  %s2561_s1 = inlined_call_operand.vmem [shape: f32[256,128], index: 1, kind: input, shape index: {}, may-alias: {0,1}]   ;;  %s2562_s2 = inlined_call_operand.vmem [shape: f32[1,128], index: 2, kind: input, shape index: {}]   ;;  %s2563_s3 = inlined_call_operand.vmem [shape: f32[1,128], index: 3, kind: input, shape index: {}]   ;;  %s2564_s4 = inlined_call_operand.vmem [shape: s8[256,256], index: 4, kind: input, shape index: {}]   ;;  %s2565_s5 = inlined_call_operand.vmem [shape: f32[1,128], index: 5, kind: input, shape index: {}]   ;;  %s2566_s6 = inlined_call_operand.vmem [shape: f32[256,128], index: 6, kind: output, shape index: {}]  }
   0x1   :  { %s1713_s23 = smov 0  }
   0x2 LB: > { %s25_s24 = sadd.s32 1, %s1667_s22  ;;  %p1385_p0 = scmp.ge.s32.totalorder %s1671_s23, 1  ;;  %s1671_s23 = sphi %s1713_s23, %s16_s23   ;;  %s1667_s22 = sphi %s1711_s22, %s2650_s22   ;;  %s1663_s21 = sphi %s1709_s21, %s2649_s21  }
   0x3   : > { %p26_p1 = scmp.ge.s32.totalorder %s25_s24, 2  ;;  %p277_p2 = scmp.lt.s32.totalorder %s1671_s23, 3 }
   0x5   : > { %s2652_s24 = smov (%p26_p1, %s25_s24), 0  ;;  %p278_p3 = pnand %p1385_p0, %p277_p2 }
   0x6   : > { %v405_v0 = vld [vmem:[%s2561_s1 + $0x80] sm:$0xff] (!%p278_p3)  ;;  %v406_v1 = vld [vmem:[%s2561_s1 + $0x88] sm:$0xff] (!%p278_p3)  ;;  %s1386_s7 = sshll.u32 (!%p278_p3), %s1663_s21, 4  ;;  %v407_v5 = vld [vmem:[%s2561_s1 + $0x90] sm:$0xff] (!%p278_p3) }
   0x7   : > { %281 = sbr.rel (%p278_p3) target bundleno = 746 (0x2ea), region = 44  ;;  %v389_v2 = vld [vmem:[%s2561_s1] sm:$0xff] (!%p278_p3)  ;;  %v1496_v3 = vpack.c.bf16 (!%p278_p3), %v406_v1, %v405_v0  ;;  %v390_v4 = vld [vmem:[%s2561_s1 + $0x8] sm:$0xff] (!%p278_p3)  ;;  %v408_v6 = vld [vmem:[%s2561_s1 + $0x98] sm:$0xff] (!%p278_p3)  ;;  %p333_p4 = scmp.lt.s32.totalorder (!%p278_p3), %s1386_s7, 31 }
   0x8   : > { %v1498_v7 = vpack.c.bf16 (!%p278_p3), %v390_v4, %v389_v2  ;;  %v1500_v8 = vpack.c.bf16 (!%p278_p3), %v408_v6, %v407_v5  ;;  %v391_v9 = vld [vmem:[%s2561_s1 + $0x10] sm:$0xff] (!%p278_p3)  ;;  %v392_v10 = vld [vmem:[%s2561_s1 + $0x18] sm:$0xff] (!%p278_p3)  ;;  %v409_v11 = vld [vmem:[%s2561_s1 + $0xa0] sm:$0xff] (!%p278_p3) }
   0x9   : > { %1497 = vmatprep.subr.bf16.mxu0 (!%p278_p3), %v1496_v3  ;;  %1432 = vmatprep.subr.bf16.mxu1 (!%p278_p3), %v1496_v3  ;;  %v410_v12 = vld [vmem:[%s2561_s1 + $0xa8] sm:$0xff] (!%p278_p3)  ;;  %v1502_v13 = vpack.c.bf16 (!%p278_p3), %v392_v10, %v391_v9  ;;  %v393_v15 = vld [vmem:[%s2561_s1 + $0x20] sm:$0xff] (!%p278_p3)  ;;  %v411_v17 = vld [vmem:[%s2561_s1 + $0xb0] sm:$0xff] (!%p278_p3) }
   0xa   : > { %1499 = vmatpush3.bf16.xpose.msra.mxu0 (!%p278_p3), %v1498_v7  ;;  %1433 = vmatpush3.bf16.msra.mxu1 (!%p278_p3), %v1498_v7  ;;  %v1504_v14 = vpack.c.bf16 (!%p278_p3), %v410_v12, %v409_v11  ;;  %v394_v16 = vld [vmem:[%s2561_s1 + $0x28] sm:$0xff] (!%p278_p3)  ;;  %v412_v18 = vld [vmem:[%s2561_s1 + $0xb8] sm:$0xff] (!%p278_p3)  ;;  %v395_v19 = vld [vmem:[%s2561_s1 + $0x30] sm:$0xff] (!%p278_p3) }
   0xb   : > { %1501 = vmatprep.subr.bf16.mxu0 (!%p278_p3), %v1500_v8  ;;  %1434 = vmatprep.subr.bf16.mxu1 (!%p278_p3), %v1500_v8  ;;  %v1506_v20 = vpack.c.bf16 (!%p278_p3), %v394_v16, %v393_v15  ;;  %v396_v21 = vld [vmem:[%s2561_s1 + $0x38] sm:$0xff] (!%p278_p3)  ;;  %v413_v22 = vld [vmem:[%s2561_s1 + $0xc0] sm:$0xff] (!%p278_p3)  ;;  %v1508_v24 = vpack.c.bf16 (!%p278_p3), %v412_v18, %v411_v17  ;;  %v414_v28 = vld [vmem:[%s2561_s1 + $0xc8] sm:$0xff] (!%p278_p3) }
   0xc   : > { %v1791_v23 = vld [vmem:[%s2562_s2] sm:$0x1] (!%p278_p3)  ;;  %v1510_v33 = vpack.c.bf16 (!%p278_p3), %v396_v21, %v395_v19  ;;  %v1512_v37 = vpack.c.bf16 (!%p278_p3), %v414_v28, %v413_v22  ;;  %v398_v38 = vld [vmem:[%s2561_s1 + $0x48] sm:$0xff] (!%p278_p3)  ;;  %v415_v41 = vld [vmem:[%s2561_s1 + $0xd0] sm:$0xff] (!%p278_p3) }
   0xd   : > { %1430 = vmatprep.mubr.f32.mxu0 (!%p278_p3), %v1791_v23  ;;  %v1798_v26 = vld [vmem:[%s2563_s3] ss:$0 sm:$0xff] (!%p278_p3)  ;;  %v416_v42 = vld [vmem:[%s2561_s1 + $0xd8] sm:$0xff] (!%p278_p3)  ;;  %v399_v44 = vld [vmem:[%s2561_s1 + $0x50] sm:$0xff] (!%p278_p3) }
   0xe   : > { %s2654_s7 = smov (!%p333_p4, %s1386_s7), 31  ;;  %1435 = vmatpush3.bf16.msra.mxu1 %v1502_v13  ;;  %v397_v34 = vld [vmem:[%s2561_s1 + $0x40] sm:$0xff]  ;;  %v1516_v47 = vpack.c.bf16 %v416_v42, %v415_v41  ;;  %v400_v48 = vld [vmem:[%s2561_s1 + $0x58] sm:$0xff]  ;;  %v418_v52 = vld [vmem:[%s2561_s1 + $0xe8] sm:$0xff] }
   0xf   : > { %s1387_s25 = sshll.u32 %s2654_s7, 3  ;;  %1436 = vmatprep.subr.bf16.mxu1 %v1504_v14  ;;  %v1514_v43 = vpack.c.bf16 %v398_v38, %v397_v34  ;;  %v417_v51 = vld [vmem:[%s2561_s1 + $0xe0] sm:$0xff]  ;;  %v1518_v53 = vpack.c.bf16 %v400_v48, %v399_v44  ;;  %v402_v58 = vld [vmem:[%s2561_s1 + $0x68] sm:$0xff]  ;;  %v419_v61 = vld [vmem:[%s2561_s1 + $0xf0] sm:$0xff] }
  0x10   : > { %s1777_s13 = scalar_lea.vmem %s2560_s0, %s1387_s25  ;;  %v401_v54 = vld [vmem:[%s2561_s1 + $0x60] sm:$0xff]  ;;  %v1520_v57 = vpack.c.bf16 %v418_v52, %v417_v51  ;;  %v420_v62 = vld [vmem:[%s2561_s1 + $0xf8] sm:$0xff]  ;;  %v403_v0 = vld [vmem:[%s2561_s1 + $0x70] sm:$0xff]  ;;  %s2518_s29 = scalar_lea.vmem %s2566_s6, %s1387_s25 }
  0x11   : > { %v375_v25 = vld [vmem:[%s1777_s13 + $0x10] sm:$0xff]  ;;  %v373_v27 = vld [vmem:[%s1777_s13] sm:$0xff]  ;;  %v376_v31 = vld [vmem:[%s1777_s13 + $0x18] sm:$0xff]  ;;  %v1522_v63 = vpack.c.bf16 %v402_v58, %v401_v54  ;;  %v1524_v3 = vpack.c.bf16 %v420_v62, %v419_v61 }
  0x12   : > { %1503 = vmatpush3.bf16.xpose.msra.mxu0 %v1502_v13  ;;  %v462_v29 = vmul.f32 %v1798_v26, %v375_v25  ;;  %v460_v30 = vmul.f32 %v1798_v26, %v373_v27  ;;  %v374_v32 = vld [vmem:[%s1777_s13 + $0x8] sm:$0xff]  ;;  %1437 = vmatpush3.bf16.msra.mxu1 %v1506_v20  ;;  %v463_v35 = vmul.f32 %v1798_v26, %v376_v31  ;;  %v377_v40 = vld [vmem:[%s1777_s13 + $0x20] sm:$0xff]  ;;  %v380_v49 = vld [vmem:[%s1777_s13 + $0x38] sm:$0xff] }
  0x13   : > { %1505 = vmatprep.subr.bf16.mxu0 %v1504_v14  ;;  %1438 = vmatprep.subr.bf16.mxu1 %v1508_v24  ;;  %v461_v36 = vmul.f32 %v1798_v26, %v374_v32  ;;  %v378_v39 = vld [vmem:[%s1777_s13 + $0x28] sm:$0xff]  ;;  %v464_v46 = vmul.f32 %v1798_v26, %v377_v40  ;;  %v379_v50 = vld [vmem:[%s1777_s13 + $0x30] sm:$0xff]  ;;  %v467_v55 = vmul.f32 %v1798_v26, %v380_v49  ;;  %v381_v60 = vld [vmem:[%s1777_s13 + $0x40] sm:$0xff] }
  0x14   : > { %480 = vadd.xlane.f32.xlu1 %v462_v29  ;;  %476 = vadd.xlane.f32.xlu0 %v460_v30  ;;  %v465_v45 = vmul.f32 %v1798_v26, %v378_v39  ;;  %v466_v56 = vmul.f32 %v1798_v26, %v379_v50  ;;  %v382_v59 = vld [vmem:[%s1777_s13 + $0x48] sm:$0xff]  ;;  %v468_v2 = vmul.f32 %v1798_v26, %v381_v60  ;;  %v404_v4 = vld [vmem:[%s2561_s1 + $0x78] sm:$0xff]  ;;  %v383_v6 = vld [vmem:[%s1777_s13 + $0x50] sm:$0xff] }
  0x15   : > { %v469_v1 = vmul.f32 %v1798_v26, %v382_v59  ;;  %v384_v5 = vld [vmem:[%s1777_s13 + $0x58] sm:$0xff]  ;;  %v1526_v7 = vpack.c.bf16 %v404_v4, %v403_v0  ;;  %v470_v9 = vmul.f32 %v1798_v26, %v383_v6  ;;  %v386_v10 = vld [vmem:[%s1777_s13 + $0x68] sm:$0xff]  ;;  %v385_v11 = vld [vmem:[%s1777_s13 + $0x60] sm:$0xff] }
  0x16   : > { %1439 = vmatpush3.bf16.msra.mxu1 %v1510_v33  ;;  %v471_v8 = vmul.f32 %v1798_v26, %v384_v5  ;;  %v473_v12 = vmul.f32 %v1798_v26, %v386_v10  ;;  %v472_v13 = vmul.f32 %v1798_v26, %v385_v11  ;;  %v388_v14 = vld [vmem:[%s1777_s13 + $0x78] sm:$0xff]  ;;  %v387_v15 = vld [vmem:[%s1777_s13 + $0x70] sm:$0xff]  ;;  %s1397_s13 = sshll.u32 %s2654_s7, 2 }
  0x17   : > { %1440 = vmatprep.subr.bf16.mxu1 %v1512_v37  ;;  %v475_v16 = vmul.f32 %v1798_v26, %v388_v14  ;;  %v474_v17 = vmul.f32 %v1798_v26, %v387_v15  ;;  %s1897_s20 = scalar_lea.vmem %s2564_s4, %s1397_s13 }
  0x18   : > { %482 = vadd.xlane.f32.xlu1 %v463_v35  ;;  %478 = vadd.xlane.f32.xlu0 %v461_v36  ;;  %v421_v27 = vld [vmem:[%s1897_s20] sm:$0xf]  ;;  %v422_v28 = vld [vmem:[%s1897_s20 + $0x4] sm:$0xf]  ;;  %v423_v31 = vld [vmem:[%s1897_s20 + $0x8] sm:$0xf] }
  0x19   : > { %v424_v32 = vld [vmem:[%s1897_s20 + $0xc] sm:$0xf]  ;;  %vm437_vm0 = vnez %v421_v27  ;;  %vm438_vm1 = vnez %v422_v28  ;;  %v426_v34 = vld [vmem:[%s1897_s20 + $0x14] sm:$0xf]  ;;  %v425_v35 = vld [vmem:[%s1897_s20 + $0x10] sm:$0xf]  ;;  %vm439_vm2 = vnez %v423_v31 }
  0x1a   : > { %1507 = vmatpush3.bf16.xpose.msra.mxu0 %v1506_v20  ;;  %1441 = vmatpush3.bf16.msra.mxu1 %v1514_v43  ;;  %vm440_vm3 = vnez %v424_v32  ;;  %v1673_v36 = vmov 0   ;;  %vm442_vm4 = vnez %v426_v34  ;;  %v428_v39 = vld [vmem:[%s1897_s20 + $0x1c] sm:$0xf]  ;;  %vm441_vm5 = vnez %v425_v35  ;;  %v427_v42 = vld [vmem:[%s1897_s20 + $0x18] sm:$0xf] }
  0x1b   : > { %1509 = vmatprep.subr.bf16.mxu0 %v1508_v24  ;;  %1442 = vmatprep.subr.bf16.mxu1 %v1516_v47  ;;  %v1915_v38 = vsel %vm438_vm1, 16843009, %v1673_v36  ;;  %v1925_v44 = vsel %vm439_vm2, 16843009, %v1673_v36  ;;  %v1934_v49 = vsel %vm442_vm4, 16843009, %v1673_v36  ;;  %vm444_vm6 = vnez %v428_v39 }
  0x1c   : > { %486 = vadd.xlane.f32.xlu1 %v465_v45  ;;  %484 = vadd.xlane.f32.xlu0 %v464_v46  ;;  %v1928_v45 = vsel %vm440_vm3, 16843009, %v1673_v36  ;;  %v430_v46 = vld [vmem:[%s1897_s20 + $0x24] sm:$0xf]  ;;  %v734_v48 = vunpack.c.0.s8 %v1915_v38  ;;  %v429_v50 = vld [vmem:[%s1897_s20 + $0x20] sm:$0xf]  ;;  %v735_v52 = vunpack.c.1.s8 %v1915_v38  ;;  %vm443_vm7 = vnez %v427_v42 }
  0x1d   : > { %v432_v54 = vld [vmem:[%s1897_s20 + $0x2c] sm:$0xf]  ;;  %vm446_vm8 = vnez %v430_v46  ;;  %v431_v58 = vld [vmem:[%s1897_s20 + $0x28] sm:$0xf]  ;;  %v434_v59 = vld [vmem:[%s1897_s20 + $0x34] sm:$0xf]  ;;  %v739_v60 = vunpack.c.1.s8 %v1928_v45  ;;  %v742_v61 = vunpack.c.0.s8 %v1934_v49  ;;  %vm445_vm9 = vnez %v429_v50 }
  0x1e   : > { %1443 = vmatpush3.bf16.msra.mxu1 %v1518_v53  ;;  %v1951_v62 = vsel %vm444_vm6, 16843009, %v1673_v36  ;;  %v436_v0 = vld [vmem:[%s1897_s20 + $0x3c] sm:$0xf]  ;;  %v1961_v4 = vsel %vm443_vm7, 16843009, %v1673_v36  ;;  %vm448_vm10 = vnez %v432_v54  ;;  %vm447_vm11 = vnez %v431_v58 }
  0x1f   : > { %1444 = vmatprep.subr.bf16.mxu1 %v1520_v57  ;;  %v435_v5 = vld [vmem:[%s1897_s20 + $0x38] sm:$0xf]  ;;  %vm450_vm12 = vnez %v434_v59  ;;  %v1973_v10 = vsel %vm445_vm9, 16843009, %v1673_v36  ;;  %vm452_vm14 = vnez %v436_v0  ;;  %v747_v11 = vunpack.c.1.s8 %v1951_v62 }
  0x20   : > { %490 = vadd.xlane.f32.xlu1 %v467_v55  ;;  %488 = vadd.xlane.f32.xlu0 %v466_v56  ;;  %v736_v55 = vunpack.c.0.s8 %v1925_v44  ;;  %v737_v56 = vunpack.c.1.s8 %v1925_v44  ;;  %vm451_vm15 = vnez %v435_v5  ;;  %v1994_v31 = vsel %vm452_vm14, 16843009, %v1673_v36 }
  0x21   : > { %vm2004_vm2 = vcmp.ne.s32.totalorder %v734_v48, 0  ;;  %v2013_v46 = vsel %vm451_vm15, 16843009, %v1673_v36  ;;  %vm2015_vm3 = vcmp.ne.s32.totalorder %v735_v52, 0  ;;  %vm2083_vm9 = vcmp.ne.s32.totalorder %v739_v60, 0 }
  0x22   : > { %1511 = vmatpush3.bf16.xpose.msra.mxu0 %v1510_v33  ;;  %1445 = vmatpush3.bf16.msra.mxu1 %v1522_v63  ;;  %vm2049_vm4 = vcmp.ne.s32.totalorder %v736_v55, 0 }
  0x23   : > { %1513 = vmatprep.subr.bf16.mxu0 %v1512_v37  ;;  %1446 = vmatprep.subr.bf16.mxu1 %v1524_v3  ;;  %v1912_v37 = vsel %vm437_vm0, 16843009, %v1673_v36 }
  0x24   : > { %494 = vadd.xlane.f32.xlu1 %v469_v1  ;;  %492 = vadd.xlane.f32.xlu0 %v468_v2  ;;  %v733_v51 = vunpack.c.1.s8 %v1912_v37  ;;  %v743_v2 = vunpack.c.1.s8 %v1934_v49 }
  0x26   : > { %1447 = vmatpush3.bf16.msra.mxu1 %v1526_v7  ;;  %vm2000_vm1 = vcmp.ne.s32.totalorder %v733_v51, 0  ;;  %vm2111_vm14 = vcmp.ne.s32.totalorder %v743_v2, 0 }
  0x28   : > { %498 = vadd.xlane.f32.xlu1 %v471_v8  ;;  %496 = vadd.xlane.f32.xlu0 %v470_v9  ;;  %v1969_v8 = vsel %vm446_vm8, 16843009, %v1673_v36  ;;  %v746_v9 = vunpack.c.0.s8 %v1951_v62 }
  0x2a   : > { %1515 = vmatpush3.bf16.xpose.msra.mxu0 %v1514_v43 }
  0x2b   : > { %1517 = vmatprep.subr.bf16.mxu0 %v1516_v47  ;;  %v732_v47 = vunpack.c.0.s8 %v1912_v37 }
  0x2c   : > { %502 = vadd.xlane.f32.xlu1 %v473_v12  ;;  %500 = vadd.xlane.f32.xlu0 %v472_v13  ;;  %v1978_v13 = vsel %vm448_vm10, 16843009, %v1673_v36 }
  0x2d   : > { %vm1996_vm0 = vcmp.ne.s32.totalorder %v732_v47, 0 }
  0x30   : > { %506 = vadd.xlane.f32.xlu1 %v475_v16  ;;  %504 = vadd.xlane.f32.xlu0 %v474_v17  ;;  %v1983_v16 = vsel %vm447_vm11, 16843009, %v1673_v36  ;;  %v1986_v17 = vsel %vm450_vm12, 16843009, %v1673_v36 }
  0x31   : > { %v2619_v0 = vunpack.c.0.s8 %v1983_v16 }
  0x32   : > { %1519 = vmatpush3.bf16.xpose.msra.mxu0 %v1518_v53  ;;  %v1940_v53 = vsel %vm441_vm5, 16843009, %v1673_v36  ;;  %vm2065_vm5 = vcmp.ne.s32.totalorder %v737_v56, 0 }
  0x33   : > { %1521 = vmatprep.subr.bf16.mxu0 %v1520_v57  ;;  %v738_v57 = vunpack.c.0.s8 %v1928_v45 }
  0x35   : > { %vm2077_vm8 = vcmp.ne.s32.totalorder %v738_v57, 0 }
  0x3a   : > { %1523 = vmatpush3.bf16.xpose.msra.mxu0 %v1522_v63  ;;  %v433_v63 = vld [vmem:[%s1897_s20 + $0x30] sm:$0xf] }
  0x3b   : > { %1525 = vmatprep.subr.bf16.mxu0 %v1524_v3  ;;  %v740_v3 = vunpack.c.0.s8 %v1940_v53  ;;  %vm449_vm13 = vnez %v433_v63 }
  0x3c   : > { %v1991_v28 = vsel %vm449_vm13, 16843009, %v1673_v36  ;;  %vm2105_vm13 = vcmp.ne.s32.totalorder %v742_v61, 0 }
  0x3d   : > { %vm2130_vm15 = vcmp.ne.s32.totalorder %v740_v3, 0 }
  0x42   : > { %1527 = vmatpush3.bf16.xpose.msra.mxu0 %v1526_v7  ;;  %v741_v7 = vunpack.c.1.s8 %v1940_v53 }
  0x49   : > { %1431 = vmatmul.mubr.f32.vlgmr.msra.gmra.mrb[0].mxu0 %v1791_v23  ;;  %v580_v23 = vlaneseq }
  0x4b   : > { %v1907_v33 = vshrl.u32 %v580_v23, 7 }
  0x4d   : > { %v582_v41 = vsub.s32 0, %v1907_v33 }
  0xa1   : > { %v1877_v18 = vpop.xlane.xlu1 %480  ;;  %v1879_v19 = vpop.xlane.xlu0 %476 }
  0xa5   : > { %v1881_v20 = vpop.xlane.xlu1 %482  ;;  %v1883_v21 = vpop.xlane.xlu0 %478 }
  0xa9   : > { %v1885_v22 = vpop.xlane.xlu1 %486  ;;  %v1887_v24 = vpop.xlane.xlu0 %484 }
  0xad   : > { %v1890_v25 = vpop.xlane.xlu1 %490  ;;  %v1892_v26 = vpop.xlane.xlu0 %488 }
  0xb1   : > { %v1901_v29 = vpop.xlane.xlu1 %494  ;;  %v1903_v30 = vpop.xlane.xlu0 %492 }
  0xb5   : > { %v1918_v40 = vpop.xlane.xlu1 %498  ;;  %v1922_v43 = vpop.xlane.xlu0 %496 }
  0xb9   : > { %v1955_v1 = vpop.xlane.xlu1 %502  ;;  %v1964_v6 = vpop.xlane.xlu0 %500 }
  0xbd   : > { %v507_v32 = vpop.xlane.xlu1 %506  ;;  %v505_v50 = vpop.xlane.xlu0 %504 }
 0x11c   : > { %v575_v47 = vpop.f32.mrb[0].mxu0 }
 0x11d   : > { %v2025_v63 = vrot.slane %v575_v47, %v582_v41  ;;  %v577_v36 = vpop.f32.mrb[1].mxu0 }
 0x11e   : > { %v2032_v48 = vrot.slane %v577_v36, %v582_v41 }
 0x11f   : > { %v2038_v47 = vadd.f32 %v2025_v63, %v507_v32  ;;  %v2041_v42 = vadd.f32 %v2025_v63, %v505_v50  ;;  %v588_v52 = vadd.f32 %v2025_v63, %v1879_v19  ;;  %v590_v33 = vadd.f32 %v2025_v63, %v1883_v21 }
 0x120   : > { %v2054_v36 = vadd.f32 %v2032_v48, %v507_v32  ;;  %v2057_v59 = vadd.f32 %v2032_v48, %v505_v50  ;;  %v589_v58 = vadd.f32 %v2032_v48, %v1879_v19  ;;  %v591_v54 = vadd.f32 %v2032_v48, %v1883_v21 }
 0x121   : > { %v2070_v55 = vmul.f32 0.2, %v2038_v47  ;;  %v2073_v32 = vmul.f32 0.2, %v2041_v42  ;;  %vm620_vm6 = vcmp.gt.f32.partialorder %v588_v52, 0.0  ;;  %vm622_vm7 = vcmp.gt.f32.partialorder %v590_v33, 0.0 }
 0x122   : > { %v2088_v44 = vmul.f32 0.2, %v2054_v36  ;;  %v2091_v56 = vmul.f32 0.2, %v2057_v59  ;;  %vm621_vm10 = vcmp.gt.f32.partialorder %v589_v58, 0.0  ;;  %vm623_vm11 = vcmp.gt.f32.partialorder %v591_v54, 0.0 }
 0x123   : > { %v652_v50 = vmul.f32 0.2, %v588_v52  ;;  %v653_v5 = vmul.f32 0.2, %v589_v58  ;;  %v654_v57 = vmul.f32 0.2, %v590_v33  ;;  %v592_v39 = vadd.f32 %v2025_v63, %v1877_v18 }
 0x124   : > { %v655_v38 = vmul.f32 0.2, %v591_v54  ;;  %v593_v45 = vadd.f32 %v2032_v48, %v1877_v18  ;;  %v594_v60 = vadd.f32 %v2025_v63, %v1881_v20  ;;  %v595_v27 = vadd.f32 %v2032_v48, %v1881_v20 }
 0x125   : > { %v684_v23 = vsel %vm620_vm6, %v588_v52, %v652_v50  ;;  %v685_v15 = vsel %vm621_vm10, %v589_v58, %v653_v5  ;;  %v686_v14 = vsel %vm622_vm7, %v590_v33, %v654_v57  ;;  %vm624_vm12 = vcmp.gt.f32.partialorder %v592_v39, 0.0 }
 0x126   : > { %v2117_v20 = vsel %vm1996_vm0, %v684_v23, -1e+30  ;;  %v2121_v58 = vsel %vm2000_vm1, %v685_v15, -1e+30  ;;  %v687_v52 = vsel %vm623_vm11, %v591_v54, %v655_v38  ;;  %v2126_v61 = vsel %vm2004_vm2, %v686_v14, -1e+30 }
 0x127   : > { %v828_v2 = vmax.f32 %v2117_v20, %v2121_v58  ;;  %v2138_v23 = vsel %vm2015_vm3, %v687_v52, -1e+30  ;;  %vm625_vm0 = vcmp.gt.f32.partialorder %v593_v45, 0.0  ;;  %v656_v15 = vmul.f32 0.2, %v592_v39 }
 0x128   : > { %vm2142_vm1 = vcmp.ne.s32.totalorder %v741_v7, 0  ;;  %v831_v3 = vmax.f32 %v2126_v61, %v2138_v23  ;;  %v657_v34 = vmul.f32 0.2, %v593_v45  ;;  %vm626_vm2 = vcmp.gt.f32.partialorder %v594_v60, 0.0 }
 0x129   : > { %vm627_vm6 = vcmp.gt.f32.partialorder %v595_v27, 0.0  ;;  %829 = vmax.xlane.f32.xlu0 %v828_v2  ;;  %v688_v35 = vsel %vm624_vm12, %v592_v39, %v656_v15  ;;  %v658_v37 = vmul.f32 0.2, %v594_v60  ;;  %v659_v38 = vmul.f32 0.2, %v595_v27 }
 0x12a   : > { %v598_v51 = vadd.f32 %v2025_v63, %v1885_v22  ;;  %832 = vmax.xlane.f32.xlu1 %v831_v3  ;;  %v689_v53 = vsel %vm625_vm0, %v593_v45, %v657_v34  ;;  %v2153_v7 = vsel %vm2049_vm4, %v688_v35, -1e+30  ;;  %v599_v54 = vadd.f32 %v2032_v48, %v1885_v22 }
 0x12b   : > { %v596_v5 = vadd.f32 %v2025_v63, %v1887_v24  ;;  %vm2161_vm3 = vcmp.ne.s32.totalorder %v746_v9, 0  ;;  %vm2167_vm7 = vcmp.ne.s32.totalorder %v747_v11, 0  ;;  %v2173_v41 = vsel %vm2065_vm5, %v689_v53, -1e+30 }
 0x12c   : > { %v690_v22 = vsel %vm626_vm2, %v594_v60, %v658_v37  ;;  %v691_v50 = vsel %vm627_vm6, %v595_v27, %v659_v38  ;;  %vm630_vm4 = vcmp.gt.f32.partialorder %v598_v51, 0.0  ;;  %v834_v57 = vmax.f32 %v2153_v7, %v2173_v41 }
 0x12d   : > { %v2179_v9 = vsel %vm2077_vm8, %v690_v22, -1e+30  ;;  %v2183_v62 = vsel %vm2083_vm9, %v691_v50, -1e+30  ;;  %vm631_vm10 = vcmp.gt.f32.partialorder %v599_v54, 0.0  ;;  %v2595_v11 = vunpack.c.0.s8 %v1961_v4 }
 0x12e   : > { %v837_v27 = vmax.f32 %v2179_v9, %v2183_v62  ;;  %v662_v45 = vmul.f32 0.2, %v598_v51  ;;  %v663_v60 = vmul.f32 0.2, %v599_v54  ;;  %v597_v19 = vadd.f32 %v2032_v48, %v1887_v24  ;;  %835 = vmax.xlane.f32.xlu0 %v834_v57 }
 0x12f   : > { %vm2187_vm11 = vcmp.ne.s32.totalorder %v2595_v11, 0  ;;  %vm628_vm5 = vcmp.gt.f32.partialorder %v596_v5, 0.0  ;;  %v660_v21 = vmul.f32 0.2, %v596_v5  ;;  %v602_v52 = vadd.f32 %v2025_v63, %v1890_v25 }
 0x130   : > { %v603_v2 = vadd.f32 %v2032_v48, %v1890_v25  ;;  %v2598_v15 = vunpack.c.1.s8 %v1961_v4  ;;  %838 = vmax.xlane.f32.xlu1 %v837_v27  ;;  %v694_v34 = vsel %vm630_vm4, %v598_v51, %v662_v45  ;;  %v695_v35 = vsel %vm631_vm10, %v599_v54, %v663_v60 }
 0x131   : > { %vm629_vm9 = vcmp.gt.f32.partialorder %v597_v19, 0.0  ;;  %v661_v24 = vmul.f32 0.2, %v597_v19  ;;  %v2601_v37 = vunpack.c.0.s8 %v1969_v8  ;;  %v2604_v25 = vunpack.c.1.s8 %v1969_v8 }
 0x132   : > { %vm2201_vm8 = vcmp.ne.s32.totalorder %v2598_v15, 0  ;;  %v2220_v53 = vsel %vm2105_vm13, %v694_v34, -1e+30  ;;  %v2224_v51 = vsel %vm2111_vm14, %v695_v35, -1e+30  ;;  %v692_v54 = vsel %vm628_vm5, %v596_v5, %v660_v21 }
 0x133   : > { %vm2208_vm12 = vcmp.ne.s32.totalorder %v2601_v37, 0  ;;  %vm2214_vm0 = vcmp.ne.s32.totalorder %v2604_v25, 0  ;;  %vm634_vm2 = vcmp.gt.f32.partialorder %v602_v52, 0.0  ;;  %v843_v22 = vmax.f32 %v2220_v53, %v2224_v51 }
 0x134   : > { %v693_v50 = vsel %vm629_vm9, %v597_v19, %v661_v24  ;;  %v2230_v8 = vsel %vm2130_vm15, %v692_v54, -1e+30  ;;  %vm635_vm6 = vcmp.gt.f32.partialorder %v603_v2, 0.0  ;;  %v666_v57 = vmul.f32 0.2, %v602_v52 }
 0x135   : > { %v2234_v12 = vsel %vm2142_vm1, %v693_v50, -1e+30  ;;  %v667_v11 = vmul.f32 0.2, %v603_v2  ;;  %v600_v18 = vadd.f32 %v2025_v63, %v1892_v26  ;;  %844 = vmax.xlane.f32.xlu1 %v843_v22  ;;  %v601_v27 = vadd.f32 %v2032_v48, %v1892_v26 }
 0x136   : > { %v840_v5 = vmax.f32 %v2230_v8, %v2234_v12  ;;  %v606_v49 = vadd.f32 %v2025_v63, %v1901_v29  ;;  %v607_v14 = vadd.f32 %v2032_v48, %v1901_v29  ;;  %v2607_v45 = vunpack.c.0.s8 %v1973_v10 }
 0x137   : > { %v2610_v19 = vunpack.c.1.s8 %v1973_v10  ;;  %v698_v26 = vsel %vm634_vm2, %v602_v52, %v666_v57  ;;  %v699_v15 = vsel %vm635_vm6, %v603_v2, %v667_v11  ;;  %vm632_vm15 = vcmp.gt.f32.partialorder %v600_v18, 0.0 }
 0x138   : > { %vm2248_vm13 = vcmp.ne.s32.totalorder %v2607_v45, 0  ;;  %v664_v34 = vmul.f32 0.2, %v600_v18  ;;  %v2613_v35 = vunpack.c.0.s8 %v1978_v13  ;;  %v2616_v24 = vunpack.c.1.s8 %v1978_v13  ;;  %841 = vmax.xlane.f32.xlu0 %v840_v5 }
 0x139   : > { %vm2254_vm14 = vcmp.ne.s32.totalorder %v2610_v19, 0  ;;  %v2273_v10 = vsel %vm2161_vm3, %v698_v26, -1e+30  ;;  %v2277_v52 = vsel %vm2167_vm7, %v699_v15, -1e+30  ;;  %vm633_vm10 = vcmp.gt.f32.partialorder %v601_v27, 0.0 }
 0x13a   : > { %vm2261_vm1 = vcmp.ne.s32.totalorder %v2613_v35, 0  ;;  %vm2267_vm4 = vcmp.ne.s32.totalorder %v2616_v24, 0  ;;  %vm638_vm5 = vcmp.gt.f32.partialorder %v606_v49, 0.0  ;;  %v849_v2 = vmax.f32 %v2273_v10, %v2277_v52 }
 0x13b   : > { %v665_v25 = vmul.f32 0.2, %v601_v27  ;;  %v696_v13 = vsel %vm632_vm15, %v600_v18, %v664_v34  ;;  %vm639_vm9 = vcmp.gt.f32.partialorder %v607_v14, 0.0  ;;  %v670_v22 = vmul.f32 0.2, %v606_v49 }
 0x13c   : > { %v2283_v54 = vsel %vm2187_vm11, %v696_v13, -1e+30  ;;  %v671_v39 = vmul.f32 0.2, %v607_v14  ;;  %v604_v50 = vadd.f32 %v2025_v63, %v1903_v30  ;;  %850 = vmax.xlane.f32.xlu1 %v849_v2  ;;  %v605_v57 = vadd.f32 %v2032_v48, %v1903_v30 }
 0x13d   : > { %v697_v33 = vsel %vm633_vm10, %v601_v27, %v665_v25  ;;  %v610_v11 = vadd.f32 %v2025_v63, %v1918_v40  ;;  %v611_v18 = vadd.f32 %v2032_v48, %v1918_v40  ;;  %vm2295_vm3 = vcmp.ne.s32.totalorder %v2619_v0, 0 }
 0x13e   : > { %v2622_v45 = vunpack.c.1.s8 %v1983_v16  ;;  %v2307_v30 = vsel %vm2201_vm8, %v697_v33, -1e+30  ;;  %v702_v27 = vsel %vm638_vm5, %v606_v49, %v670_v22  ;;  %v703_v26 = vsel %vm639_vm9, %v607_v14, %v671_v39 }
 0x13f   : > { %vm636_vm11 = vcmp.gt.f32.partialorder %v604_v50, 0.0  ;;  %v2625_v40 = vunpack.c.0.s8 %v1986_v17  ;;  %v846_v16 = vmax.f32 %v2283_v54, %v2307_v30  ;;  %v2320_v34 = vsel %vm2208_vm12, %v702_v27, -1e+30 }
 0x140   : > { %vm2301_vm7 = vcmp.ne.s32.totalorder %v2622_v45, 0  ;;  %v2324_v3 = vsel %vm2214_vm0, %v703_v26, -1e+30  ;;  %vm637_vm8 = vcmp.gt.f32.partialorder %v605_v57, 0.0  ;;  %v668_v14 = vmul.f32 0.2, %v604_v50 }
 0x141   : > { %vm2312_vm2 = vcmp.ne.s32.totalorder %v2625_v40, 0  ;;  %v855_v49 = vmax.f32 %v2320_v34, %v2324_v3  ;;  %v669_v35 = vmul.f32 0.2, %v605_v57  ;;  %vm642_vm6 = vcmp.gt.f32.partialorder %v610_v11, 0.0  ;;  %847 = vmax.xlane.f32.xlu0 %v846_v16 }
 0x142   : > { %vm643_vm15 = vcmp.gt.f32.partialorder %v611_v18, 0.0  ;;  %v674_v24 = vmul.f32 0.2, %v610_v11  ;;  %v675_v2 = vmul.f32 0.2, %v611_v18  ;;  %v608_v38 = vadd.f32 %v2025_v63, %v1922_v43 }
 0x143   : > { %v2628_v25 = vunpack.c.1.s8 %v1986_v17  ;;  %v2631_v13 = vunpack.c.0.s8 %v1994_v31  ;;  %856 = vmax.xlane.f32.xlu1 %v855_v49  ;;  %v700_v39 = vsel %vm636_vm11, %v604_v50, %v668_v14  ;;  %v701_v33 = vsel %vm637_vm8, %v605_v57, %v669_v35 }
 0x144   : > { %v609_v0 = vadd.f32 %v2032_v48, %v1922_v43  ;;  %v614_v17 = vadd.f32 %v2025_v63, %v1955_v1  ;;  %v2634_v45 = vunpack.c.0.s8 %v1991_v28  ;;  %v2637_v26 = vunpack.c.1.s8 %v1991_v28 }
 0x145   : > { %vm2332_vm12 = vcmp.ne.s32.totalorder %v2628_v25, 0  ;;  %vm2338_vm0 = vcmp.ne.s32.totalorder %v2631_v13, 0  ;;  %v2640_v50 = vunpack.c.1.s8 %v1994_v31  ;;  %v2367_v43 = vsel %vm2248_vm13, %v700_v39, -1e+30 }
 0x146   : > { %vm2349_vm10 = vcmp.ne.s32.totalorder %v2634_v45, 0  ;;  %vm2355_vm5 = vcmp.ne.s32.totalorder %v2637_v26, 0  ;;  %v2371_v16 = vsel %vm2254_vm14, %v701_v33, -1e+30  ;;  %v706_v28 = vsel %vm642_vm6, %v610_v11, %v674_v24 }
 0x147   : > { %vm2361_vm9 = vcmp.ne.s32.totalorder %v2640_v50, 0  ;;  %v707_v49 = vsel %vm643_vm15, %v611_v18, %v675_v2  ;;  %v852_v14 = vmax.f32 %v2367_v43, %v2371_v16  ;;  %v2379_v31 = vsel %vm2261_vm1, %v706_v28, -1e+30 }
 0x148   : > { %v2383_v60 = vsel %vm2267_vm4, %v707_v49, -1e+30  ;;  %vm640_vm13 = vcmp.gt.f32.partialorder %v608_v38, 0.0  ;;  %v2643_v21 = vunpack.c.0.s8 %v2013_v46  ;;  %vm641_vm11 = vcmp.gt.f32.partialorder %v609_v0, 0.0 }
 0x149   : > { %v861_v11 = vmax.f32 %v2379_v31, %v2383_v60  ;;  %v672_v18 = vmul.f32 0.2, %v608_v38  ;;  %v673_v24 = vmul.f32 0.2, %v609_v0  ;;  %v2646_v29 = vunpack.c.1.s8 %v2013_v46  ;;  %853 = vmax.xlane.f32.xlu0 %v852_v14 }
 0x14a   : > { %vm2387_vm14 = vcmp.ne.s32.totalorder %v2643_v21, 0  ;;  %v615_v37 = vadd.f32 %v2032_v48, %v1955_v1  ;;  %vm646_vm4 = vcmp.gt.f32.partialorder %v614_v17, 0.0  ;;  %v678_v25 = vmul.f32 0.2, %v614_v17 }
 0x14b   : > { %vm2395_vm1 = vcmp.ne.s32.totalorder %v2646_v29, 0  ;;  %v612_v13 = vadd.f32 %v2025_v63, %v1964_v6  ;;  %862 = vmax.xlane.f32.xlu1 %v861_v11  ;;  %v704_v39 = vsel %vm640_vm13, %v608_v38, %v672_v18  ;;  %v705_v33 = vsel %vm641_vm11, %v609_v0, %v673_v24 }
 0x14c   : > { %v613_v45 = vadd.f32 %v2032_v48, %v1964_v6  ;;  %vm650_vm8 = vcmp.gt.f32.partialorder %v2038_v47, 0.0  ;;  %v2408_v46 = vsel %vm2295_vm3, %v704_v39, -1e+30  ;;  %v2412_v1 = vsel %vm2301_vm7, %v705_v33, -1e+30 }
 0x14d   : > { %vm647_vm6 = vcmp.gt.f32.partialorder %v615_v37, 0.0  ;;  %v710_v26 = vsel %vm646_vm4, %v614_v17, %v678_v25  ;;  %v858_v63 = vmax.f32 %v2408_v46, %v2412_v1  ;;  %v679_v38 = vmul.f32 0.2, %v615_v37 }
 0x14e   : > { %v2418_v0 = vsel %vm2312_vm2, %v710_v26, -1e+30  ;;  %vm644_vm15 = vcmp.gt.f32.partialorder %v612_v13, 0.0  ;;  %vm645_vm13 = vcmp.gt.f32.partialorder %v613_v45, 0.0  ;;  %v676_v6 = vmul.f32 0.2, %v612_v13 }
 0x14f   : > { %v677_v48 = vmul.f32 0.2, %v613_v45  ;;  %vm651_vm3 = vcmp.gt.f32.partialorder %v2054_v36, 0.0  ;;  %859 = vmax.xlane.f32.xlu0 %v858_v63  ;;  %v711_v5 = vsel %vm647_vm6, %v615_v37, %v679_v38  ;;  %v714_v19 = vsel %vm650_vm8, %v2038_v47, %v2070_v55 }
 0x150   : > { %v715_v17 = vsel %vm651_vm3, %v2054_v36, %v2088_v44  ;;  %vm648_vm7 = vcmp.gt.f32.partialorder %v2041_v42, 0.0  ;;  %v2428_v15 = vsel %vm2332_vm12, %v711_v5, -1e+30  ;;  %v708_v50 = vsel %vm644_vm15, %v612_v13, %v676_v6 }
 0x151   : > { %v709_v28 = vsel %vm645_vm13, %v613_v45, %v677_v48  ;;  %v2432_v49 = vsel %vm2338_vm0, %v714_v19, -1e+30  ;;  %v867_v14 = vmax.f32 %v2418_v0, %v2428_v15  ;;  %v2438_v47 = vsel %vm2349_vm10, %v708_v50, -1e+30 }
 0x152   : > { %v2442_v36 = vsel %vm2355_vm5, %v709_v28, -1e+30  ;;  %v2446_v55 = vsel %vm2361_vm9, %v715_v17, -1e+30  ;;  %vm649_vm2 = vcmp.gt.f32.partialorder %v2057_v59, 0.0  ;;  %v712_v4 = vsel %vm648_vm7, %v2041_v42, %v2073_v32 }
 0x153   : > { %v864_v44 = vmax.f32 %v2438_v47, %v2442_v36  ;;  %868 = vmax.xlane.f32.xlu1 %v867_v14  ;;  %v713_v22 = vsel %vm649_vm2, %v2057_v59, %v2091_v56  ;;  %v2457_v27 = vsel %vm2387_vm14, %v712_v4, -1e+30  ;;  %v873_v57 = vmax.f32 %v2432_v49, %v2446_v55 }
 0x154   : > { %v2461_v40 = vsel %vm2395_vm1, %v713_v22, -1e+30 }
 0x155   : > { %865 = vmax.xlane.f32.xlu0 %v864_v44  ;;  %v870_v21 = vmax.f32 %v2457_v27, %v2461_v40 }
 0x157   : > { %874 = vmax.xlane.f32.xlu1 %v873_v57 }
 0x159   : > { %871 = vmax.xlane.f32.xlu0 %v870_v21 }
 0x1b6   : > { %v830_v42 = vpop.xlane.xlu0 %829 }
 0x1b7   : > { %v833_v32 = vpop.xlane.xlu1 %832  ;;  %v876_v59 = vsub.f32 %v2117_v20, %v830_v42  ;;  %v877_v56 = vsub.f32 %v2121_v58, %v830_v42 }
 0x1b8   : > { %v878_v35 = vsub.f32 %v2126_v61, %v833_v32  ;;  %v879_v11 = vsub.f32 %v2138_v23, %v833_v32 }
 0x1b9   : > { %v908_v18 = vmul.f32 1.442695, %v876_v59  ;;  %v910_v2 = vmul.f32 1.442695, %v877_v56 }
 0x1ba   : > { %v912_v24 = vmul.f32 1.442695, %v878_v35  ;;  %v914_v29 = vmul.f32 1.442695, %v879_v11 }
 0x1bb   : > { %1553 = vpow2.f32 %v908_v18  ;;  %v836_v37 = vpop.xlane.xlu0 %835 }
 0x1bc   : > { %1555 = vpow2.f32 %v912_v24  ;;  %v880_v13 = vsub.f32 %v2153_v7, %v836_v37  ;;  %v881_v39 = vsub.f32 %v2173_v41, %v836_v37 }
 0x1bd   : > { %v839_v25 = vpop.xlane.xlu1 %838  ;;  %1557 = vpow2.f32 %v914_v29 }
 0x1be   : > { %v882_v20 = vsub.f32 %v2179_v9, %v839_v25  ;;  %v883_v58 = vsub.f32 %v2183_v62, %v839_v25  ;;  %1559 = vpow2.f32 %v910_v2  ;;  %v916_v61 = vmul.f32 1.442695, %v880_v13 }
 0x1bf   : > { %v918_v45 = vmul.f32 1.442695, %v881_v39 }
 0x1c0   : > { %v920_v23 = vmul.f32 1.442695, %v882_v20  ;;  %v922_v33 = vmul.f32 1.442695, %v883_v58  ;;  %1561 = vpow2.f32 %v916_v61 }
 0x1c2   : > { %v845_v26 = vpop.xlane.xlu1 %844  ;;  %1563 = vpow2.f32 %v920_v23 }
 0x1c3   : > { %v886_v63 = vsub.f32 %v2220_v53, %v845_v26  ;;  %v887_v38 = vsub.f32 %v2224_v51, %v845_v26  ;;  %1565 = vpow2.f32 %v922_v33 }
 0x1c4   : > { %1567 = vpow2.f32 %v918_v45 }
 0x1c5   : > { %v842_v7 = vpop.xlane.xlu0 %841  ;;  %v928_v41 = vmul.f32 1.442695, %v886_v63  ;;  %v930_v6 = vmul.f32 1.442695, %v887_v38  ;;  %v1554_v48 = vpop.eup %1553 }
 0x1c6   : > { %v884_v9 = vsub.f32 %v2230_v8, %v842_v7  ;;  %v885_v62 = vsub.f32 %v2234_v12, %v842_v7  ;;  %v1556_v17 = vpop.eup %1555 }
 0x1c7   : > { %1569 = vpow2.f32 %v928_v41  ;;  %v1558_v28 = vpop.eup %1557  ;;  %v1020_v14 = vpack.c.bf16 %v1556_v17, %v1554_v48 }
 0x1c8   : > { %v924_v5 = vmul.f32 1.442695, %v884_v9  ;;  %1571 = vpow2.f32 %v930_v6  ;;  %v926_v50 = vmul.f32 1.442695, %v885_v62  ;;  %v1560_v44 = vpop.eup %1559  ;;  %v975_v22 = vadd.f32 %v1558_v28, %v1556_v17 }
 0x1c9   : > { %v851_v19 = vpop.xlane.xlu1 %850  ;;  %v1021_v57 = vpack.c.bf16 %v1558_v28, %v1560_v44  ;;  %v972_v21 = vadd.f32 %v1560_v44, %v1554_v48 }
 0x1ca   : > { %v890_v53 = vsub.f32 %v2273_v10, %v851_v19  ;;  %v891_v51 = vsub.f32 %v2277_v52, %v851_v19  ;;  %1573 = vpow2.f32 %v924_v5  ;;  %v1562_v42 = vpop.eup %1561  ;;  %976 = vadd.xlane.f32.xlu1 %v975_v22 }
 0x1cb   : > { %1575 = vpow2.f32 %v926_v50  ;;  %1084 = vmatprep.mubr.bf16.mxu1 %v1021_v57  ;;  %973 = vadd.xlane.f32.xlu0 %v972_v21 }
 0x1cc   : > { %v936_v4 = vmul.f32 1.442695, %v890_v53  ;;  %v938_v8 = vmul.f32 1.442695, %v891_v51  ;;  %v1564_v52 = vpop.eup %1563  ;;  %1085 = vmatmul.mubr.bf16.vlgmr.msra.gmra.mrb[0].mxu1 %v1020_v14 }
 0x1cd   : > { %v1566_v11 = vpop.eup %1565 }
 0x1ce   : > { %v848_v12 = vpop.xlane.xlu0 %847  ;;  %1577 = vpow2.f32 %v936_v4  ;;  %v1568_v29 = vpop.eup %1567 }
 0x1cf   : > { %v888_v32 = vsub.f32 %v2283_v54, %v848_v12  ;;  %v889_v59 = vsub.f32 %v2307_v30, %v848_v12  ;;  %1579 = vpow2.f32 %v938_v8  ;;  %v981_v54 = vadd.f32 %v1566_v11, %v1564_v52 }
 0x1d0   : > { %v857_v10 = vpop.xlane.xlu1 %856  ;;  %v1023_v25 = vpack.c.bf16 %v1566_v11, %v1568_v29  ;;  %v978_v13 = vadd.f32 %v1568_v29, %v1562_v42 }
 0x1d1   : > { %v894_v56 = vsub.f32 %v2320_v34, %v857_v10  ;;  %v895_v35 = vsub.f32 %v2324_v3, %v857_v10  ;;  %v932_v18 = vmul.f32 1.442695, %v888_v32  ;;  %v934_v24 = vmul.f32 1.442695, %v889_v59  ;;  %v2485_v39 = vpop.eup %1569  ;;  %982 = vadd.xlane.f32.xlu1 %v981_v54 }
 0x1d2   : > { %v1572_v58 = vpop.eup %1571  ;;  %1092 = vmatprep.mubr.bf16.mxu1 %v1023_v25  ;;  %979 = vadd.xlane.f32.xlu0 %v978_v13 }
 0x1d3   : > { %v944_v2 = vmul.f32 1.442695, %v894_v56  ;;  %v946_v37 = vmul.f32 1.442695, %v895_v35  ;;  %1581 = vpow2.f32 %v932_v18  ;;  %v987_v63 = vadd.f32 %v1572_v58, %v2485_v39 }
 0x1d4   : > { %1583 = vpow2.f32 %v934_v24  ;;  %v1574_v33 = vpop.eup %1573 }
 0x1d5   : > { %1585 = vpow2.f32 %v944_v2  ;;  %v1576_v38 = vpop.eup %1575  ;;  %988 = vadd.xlane.f32.xlu1 %v987_v63  ;;  %v1024_v57 = vpack.c.bf16 %v2485_v39, %v1574_v33 }
 0x1d6   : > { %v854_v30 = vpop.xlane.xlu0 %853  ;;  %1587 = vpow2.f32 %v946_v37  ;;  %v984_v6 = vadd.f32 %v1576_v38, %v1574_v33  ;;  %v1025_v9 = vpack.c.bf16 %v1572_v58, %v1576_v38 }
 0x1d7   : > { %v892_v34 = vsub.f32 %v2367_v43, %v854_v30  ;;  %v893_v3 = vsub.f32 %v2371_v16, %v854_v30  ;;  %v1022_v16 = vpack.c.bf16 %v1564_v52, %v1562_v42 }
 0x1d8   : > { %v863_v20 = vpop.xlane.xlu1 %862  ;;  %985 = vadd.xlane.f32.xlu0 %v984_v6 }
 0x1d9   : > { %v898_v61 = vsub.f32 %v2379_v31, %v863_v20  ;;  %v899_v23 = vsub.f32 %v2383_v60, %v863_v20  ;;  %v940_v45 = vmul.f32 1.442695, %v892_v34  ;;  %v942_v26 = vmul.f32 1.442695, %v893_v3  ;;  %v2492_v31 = vpop.eup %1577  ;;  %1093 = vmatmul.mubr.bf16.gmra.mrb[4].mxu1 %v1022_v16 }
 0x1da   : > { %v1580_v48 = vpop.eup %1579  ;;  %1100 = vmatprep.mubr.bf16.mxu1 %v1025_v9 }
 0x1db   : > { %v952_v43 = vmul.f32 1.442695, %v898_v61  ;;  %v954_v7 = vmul.f32 1.442695, %v899_v23  ;;  %1589 = vpow2.f32 %v940_v45  ;;  %v993_v17 = vadd.f32 %v1580_v48, %v2492_v31 }
 0x1dc   : > { %v860_v41 = vpop.xlane.xlu0 %859  ;;  %1591 = vpow2.f32 %v942_v26 }
 0x1dd   : > { %v896_v60 = vsub.f32 %v2408_v46, %v860_v41  ;;  %v897_v62 = vsub.f32 %v2412_v1, %v860_v41  ;;  %1593 = vpow2.f32 %v952_v43  ;;  %v1582_v53 = vpop.eup %1581  ;;  %994 = vadd.xlane.f32.xlu1 %v993_v17 }
 0x1de   : > { %1595 = vpow2.f32 %v954_v7  ;;  %v1584_v1 = vpop.eup %1583 }
 0x1df   : > { %v948_v5 = vmul.f32 1.442695, %v896_v60  ;;  %v950_v19 = vmul.f32 1.442695, %v897_v62  ;;  %v1586_v4 = vpop.eup %1585  ;;  %v990_v12 = vadd.f32 %v1584_v1, %v1582_v53  ;;  %v1027_v59 = vpack.c.bf16 %v1580_v48, %v1584_v1 }
 0x1e0   : > { %v869_v50 = vpop.xlane.xlu1 %868  ;;  %v1588_v21 = vpop.eup %1587 }
 0x1e1   : > { %1597 = vpow2.f32 %v948_v5  ;;  %v902_v51 = vsub.f32 %v2418_v0, %v869_v50  ;;  %v903_v28 = vsub.f32 %v2428_v15, %v869_v50  ;;  %991 = vadd.xlane.f32.xlu0 %v990_v12  ;;  %1101 = vmatmul.mubr.bf16.gmra.mrb[8].mxu1 %v1024_v57 }
 0x1e2   : > { %v866_v46 = vpop.xlane.xlu0 %865  ;;  %1599 = vpow2.f32 %v950_v19  ;;  %1108 = vmatprep.mubr.bf16.mxu1 %v1027_v59 }
 0x1e3   : > { %v900_v14 = vsub.f32 %v2438_v47, %v866_v46  ;;  %v901_v44 = vsub.f32 %v2442_v36, %v866_v46  ;;  %v960_v8 = vmul.f32 1.442695, %v902_v51  ;;  %v962_v22 = vmul.f32 1.442695, %v903_v28  ;;  %v2510_v28 = vld [vmem:[%s2565_s5] ss:$0 sm:$0xff] }
 0x1e4   : > { %v875_v0 = vpop.xlane.xlu1 %874  ;;  %v999_v47 = vadd.f32 %v1588_v21, %v1586_v4 }
 0x1e5   : > { %v956_v42 = vmul.f32 1.442695, %v900_v14  ;;  %v958_v32 = vmul.f32 1.442695, %v901_v44  ;;  %1601 = vpow2.f32 %v960_v8  ;;  %v906_v15 = vsub.f32 %v2432_v49, %v875_v0  ;;  %v1590_v36 = vpop.eup %1589 }
 0x1e6   : > { %v907_v10 = vsub.f32 %v2446_v55, %v875_v0  ;;  %v872_v52 = vpop.xlane.xlu0 %871  ;;  %1603 = vpow2.f32 %v962_v22  ;;  %v1592_v11 = vpop.eup %1591  ;;  %1000 = vadd.xlane.f32.xlu1 %v999_v47  ;;  %v1028_v33 = vpack.c.bf16 %v1586_v4, %v1590_v36 }
 0x1e7   : > { %v904_v56 = vsub.f32 %v2457_v27, %v872_v52  ;;  %v905_v35 = vsub.f32 %v2461_v40, %v872_v52  ;;  %1605 = vpow2.f32 %v956_v42  ;;  %v968_v18 = vmul.f32 1.442695, %v906_v15  ;;  %v1594_v29 = vpop.eup %1593 }
 0x1e8   : > { %v970_v24 = vmul.f32 1.442695, %v907_v10  ;;  %1607 = vpow2.f32 %v958_v32  ;;  %v996_v2 = vadd.f32 %v1592_v11, %v1590_v36  ;;  %v1596_v37 = vpop.eup %1595  ;;  %v1026_v27 = vpack.c.bf16 %v2492_v31, %v1582_v53 }
 0x1e9   : > { %v964_v49 = vmul.f32 1.442695, %v904_v56  ;;  %v966_v55 = vmul.f32 1.442695, %v905_v35  ;;  %1609 = vpow2.f32 %v968_v18  ;;  %v1005_v54 = vadd.f32 %v1596_v37, %v1594_v29 }
 0x1ea   : > { %1611 = vpow2.f32 %v970_v24  ;;  %997 = vadd.xlane.f32.xlu0 %v996_v2  ;;  %v1029_v25 = vpack.c.bf16 %v1588_v21, %v1592_v11  ;;  %1109 = vmatmul.mubr.bf16.gmra.mrb[12].mxu1 %v1026_v27 }
 0x1eb   : > { %v1598_v30 = vpop.eup %1597  ;;  %1613 = vpow2.f32 %v964_v49  ;;  %1006 = vadd.xlane.f32.xlu1 %v1005_v54 }
 0x1ec   : > { %v1600_v40 = vpop.eup %1599  ;;  %1615 = vpow2.f32 %v966_v55  ;;  %1116 = vmatprep.mubr.bf16.mxu1 %v1029_v25  ;;  %v1030_v16 = vpack.c.bf16 %v1594_v29, %v1598_v30 }
 0x1ed   : > { %v1002_v13 = vadd.f32 %v1600_v40, %v1598_v30  ;;  %v1031_v26 = vpack.c.bf16 %v1596_v37, %v1600_v40 }
 0x1ef   : > { %v1602_v39 = vpop.eup %1601  ;;  %1003 = vadd.xlane.f32.xlu0 %v1002_v13 }
 0x1f0   : > { %v1604_v34 = vpop.eup %1603 }
 0x1f1   : > { %v1606_v3 = vpop.eup %1605  ;;  %v1011_v20 = vadd.f32 %v1604_v34, %v1602_v39 }
 0x1f2   : > { %v1608_v58 = vpop.eup %1607  ;;  %1117 = vmatmul.mubr.bf16.gmra.mrb[16].mxu1 %v1028_v33  ;;  %v1032_v6 = vpack.c.bf16 %v1602_v39, %v1606_v3 }
 0x1f3   : > { %v1610_v61 = vpop.eup %1609  ;;  %1012 = vadd.xlane.f32.xlu1 %v1011_v20  ;;  %v1008_v23 = vadd.f32 %v1608_v58, %v1606_v3  ;;  %1124 = vmatprep.mubr.bf16.mxu1 %v1031_v26  ;;  %v1033_v41 = vpack.c.bf16 %v1604_v34, %v1608_v58 }
 0x1f4   : > { %v1612_v45 = vpop.eup %1611 }
 0x1f5   : > { %v1614_v63 = vpop.eup %1613  ;;  %1009 = vadd.xlane.f32.xlu0 %v1008_v23  ;;  %v1017_v38 = vadd.f32 %v1612_v45, %v1610_v61 }
 0x1f6   : > { %v1616_v43 = vpop.eup %1615  ;;  %v1034_v31 = vpack.c.bf16 %v1610_v61, %v1614_v63 }
 0x1f7   : > { %1018 = vadd.xlane.f32.xlu1 %v1017_v38  ;;  %v1014_v7 = vadd.f32 %v1616_v43, %v1614_v63  ;;  %v1035_v9 = vpack.c.bf16 %v1612_v45, %v1616_v43 }
 0x1f9   : > { %1015 = vadd.xlane.f32.xlu0 %v1014_v7 }
 0x1fa   : > { %1125 = vmatmul.mubr.bf16.gmra.mrb[20].mxu1 %v1030_v16 }
 0x1fb   : > { %1132 = vmatprep.mubr.bf16.mxu1 %v1033_v41 }
 0x202   : > { %1133 = vmatmul.mubr.bf16.gmra.mrb[24].mxu1 %v1032_v6 }
 0x203   : > { %1140 = vmatprep.mubr.bf16.mxu1 %v1035_v9 }
 0x20a   : > { %1141 = vmatmul.mubr.bf16.gmra.mrb[28].mxu1 %v1034_v31 }
 0x257   : > { %v977_v62 = vpop.xlane.xlu1 %976 }
 0x258   : > { %v974_v60 = vpop.xlane.xlu0 %973 }
 0x259   : > { %1617 = vrcp.f32 %v974_v60 }
 0x25a   : > { %1619 = vrcp.f32 %v977_v62 }
 0x25e   : > { %v983_v5 = vpop.xlane.xlu1 %982 }
 0x25f   : > { %v980_v48 = vpop.xlane.xlu0 %979 }
 0x260   : > { %1621 = vrcp.f32 %v980_v48 }
 0x261   : > { %1623 = vrcp.f32 %v983_v5 }
 0x262   : > { %v989_v12 = vpop.xlane.xlu1 %988 }
 0x263   : > { %v1618_v51 = vpop.eup %1617 }
 0x264   : > { %v1620_v44 = vpop.eup %1619 }
 0x265   : > { %v986_v4 = vpop.xlane.xlu0 %985 }
 0x266   : > { %1625 = vrcp.f32 %v986_v4 }
 0x267   : > { %1627 = vrcp.f32 %v989_v12 }
 0x26a   : > { %v1622_v10 = vpop.eup %1621  ;;  %v995_v24 = vpop.xlane.xlu1 %994 }
 0x26b   : > { %v1624_v56 = vpop.eup %1623 }
 0x26e   : > { %v992_v35 = vpop.xlane.xlu0 %991 }
 0x26f   : > { %1629 = vrcp.f32 %v992_v35 }
 0x270   : > { %v1626_v27 = vpop.eup %1625  ;;  %1631 = vrcp.f32 %v995_v24 }
 0x271   : > { %v1628_v39 = vpop.eup %1627 }
 0x273   : > { %v1001_v58 = vpop.xlane.xlu1 %1000 }
 0x277   : > { %v998_v34 = vpop.xlane.xlu0 %997 }
 0x278   : > { %1633 = vrcp.f32 %v998_v34  ;;  %v1007_v62 = vpop.xlane.xlu1 %1006 }
 0x279   : > { %v1630_v43 = vpop.eup %1629  ;;  %1635 = vrcp.f32 %v1001_v58 }
 0x27a   : > { %v1632_v6 = vpop.eup %1631 }
 0x27c   : > { %v1004_v9 = vpop.xlane.xlu0 %1003 }
 0x27d   : > { %1637 = vrcp.f32 %v1004_v9 }
 0x27e   : > { %1639 = vrcp.f32 %v1007_v62 }
 0x29f   : > { %v1448_v19 = vpop.f32.mrb[0].mxu1 }
 0x2a0   : > { %v1449_v17 = vpop.f32.mrb[1].mxu1 }
 0x2a1   : > { %v1450_v50 = vadd.f32 %v1449_v17, %v1448_v19  ;;  %v1451_v53 = vpop.f32.mrb[2].mxu1 }
 0x2a2   : > { %v1452_v46 = vpop.f32.mrb[3].mxu1 }
 0x2a3   : > { %v1165_v1 = vmul.f32 %v1618_v51, %v1450_v50  ;;  %v1453_v14 = vadd.f32 %v1452_v46, %v1451_v53  ;;  %v1634_v46 = vpop.eup %1633 }
 0x2a4   : > { %v1636_v4 = vpop.eup %1635 }
 0x2a5   : > { %v1188_v8 = vadd.f32 %v2510_v28, %v1165_v1  ;;  %v1166_v22 = vmul.f32 %v1620_v44, %v1453_v14 }
 0x2a7   : > { %v1204_v57 = vmax.f32 %v1188_v8, 0.0  ;;  %v1189_v21 = vadd.f32 %v2510_v28, %v1166_v22  ;;  %v1010_v8 = vpop.xlane.xlu0 %1009 }
 0x2a8   : > { %1641 = vrcp.f32 %v1010_v8 }
 0x2a9   : > { %1220 = vst [vmem:[%s2518_s29] sm:$0xff] %v1204_v57  ;;  %v1205_v0 = vmax.f32 %v1189_v21, 0.0  ;;  %v1013_v57 = vpop.xlane.xlu1 %1012 }
 0x2aa   : > { %1643 = vrcp.f32 %v1013_v57 }
 0x2ab   : > { %1221 = vst [vmem:[%s2518_s29 + $0x8] sm:$0xff] %v1205_v0 }
 0x2ac   : > { %v1454_v42 = vpop.f32.mrb[4].mxu1 }
 0x2ad   : > { %v1455_v32 = vpop.f32.mrb[5].mxu1 }
 0x2ae   : > { %v1456_v59 = vadd.f32 %v1455_v32, %v1454_v42  ;;  %v1457_v15 = vpop.f32.mrb[6].mxu1 }
 0x2af   : > { %v1458_v52 = vpop.f32.mrb[7].mxu1 }
 0x2b0   : > { %v1167_v47 = vmul.f32 %v1622_v10, %v1456_v59  ;;  %v1459_v36 = vadd.f32 %v1458_v52, %v1457_v15  ;;  %v1638_v52 = vpop.eup %1637 }
 0x2b1   : > { %v1640_v35 = vpop.eup %1639 }
 0x2b2   : > { %v1190_v11 = vadd.f32 %v2510_v28, %v1167_v47  ;;  %v1168_v18 = vmul.f32 %v1624_v56, %v1459_v36 }
 0x2b4   : > { %v1206_v29 = vmax.f32 %v1190_v11, 0.0  ;;  %v1191_v49 = vadd.f32 %v2510_v28, %v1168_v18  ;;  %v1460_v55 = vpop.f32.mrb[8].mxu1  ;;  %v1016_v11 = vpop.xlane.xlu0 %1015 }
 0x2b5   : > { %v1461_v2 = vpop.f32.mrb[9].mxu1  ;;  %1645 = vrcp.f32 %v1016_v11 }
 0x2b6   : > { %1222 = vst [vmem:[%s2518_s29 + $0x10] sm:$0xff] %v1206_v29  ;;  %v1207_v37 = vmax.f32 %v1191_v49, 0.0  ;;  %v1462_v54 = vadd.f32 %v1461_v2, %v1460_v55  ;;  %v1463_v30 = vpop.f32.mrb[10].mxu1  ;;  %v1019_v29 = vpop.xlane.xlu1 %1018 }
 0x2b7   : > { %v1464_v40 = vpop.f32.mrb[11].mxu1  ;;  %1647 = vrcp.f32 %v1019_v29 }
 0x2b8   : > { %1223 = vst [vmem:[%s2518_s29 + $0x18] sm:$0xff] %v1207_v37  ;;  %v1169_v25 = vmul.f32 %v1626_v27, %v1462_v54  ;;  %v1465_v13 = vadd.f32 %v1464_v40, %v1463_v30  ;;  %v1642_v40 = vpop.eup %1641 }
 0x2b9   : > { %v1644_v34 = vpop.eup %1643 }
 0x2ba   : > { %v1192_v3 = vadd.f32 %v2510_v28, %v1169_v25  ;;  %v1170_v20 = vmul.f32 %v1628_v39, %v1465_v13 }
 0x2bc   : > { %v1208_v61 = vmax.f32 %v1192_v3, 0.0  ;;  %v1193_v23 = vadd.f32 %v2510_v28, %v1170_v20 }
 0x2bd   : > { %v1466_v33 = vpop.f32.mrb[12].mxu1 }
 0x2be   : > { %v1467_v45 = vpop.f32.mrb[13].mxu1  ;;  %1224 = vst [vmem:[%s2518_s29 + $0x20] sm:$0xff] %v1208_v61  ;;  %v1209_v26 = vmax.f32 %v1193_v23, 0.0 }
 0x2bf   : > { %v1468_v63 = vadd.f32 %v1467_v45, %v1466_v33  ;;  %v1469_v38 = vpop.f32.mrb[14].mxu1 }
 0x2c0   : > { %v1470_v7 = vpop.f32.mrb[15].mxu1  ;;  %1225 = vst [vmem:[%s2518_s29 + $0x28] sm:$0xff] %v1209_v26 }
 0x2c1   : > { %v1171_v16 = vmul.f32 %v1630_v43, %v1468_v63  ;;  %v1471_v41 = vadd.f32 %v1470_v7, %v1469_v38  ;;  %v1646_v38 = vpop.eup %1645 }
 0x2c3   : > { %v1194_v31 = vadd.f32 %v2510_v28, %v1171_v16  ;;  %v1172_v60 = vmul.f32 %v1632_v6, %v1471_v41  ;;  %v1648_v41 = vpop.eup %1647 }
 0x2c5   : > { %v1210_v48 = vmax.f32 %v1194_v31, 0.0  ;;  %v1195_v5 = vadd.f32 %v2510_v28, %v1172_v60  ;;  %v1472_v19 = vpop.f32.mrb[16].mxu1 }
 0x2c6   : > { %v1473_v17 = vpop.f32.mrb[17].mxu1 }
 0x2c7   : > { %1226 = vst [vmem:[%s2518_s29 + $0x30] sm:$0xff] %v1210_v48  ;;  %v1211_v50 = vmax.f32 %v1195_v5, 0.0  ;;  %v1474_v53 = vadd.f32 %v1473_v17, %v1472_v19  ;;  %v1475_v51 = vpop.f32.mrb[18].mxu1 }
 0x2c8   : > { %v1476_v1 = vpop.f32.mrb[19].mxu1 }
 0x2c9   : > { %1227 = vst [vmem:[%s2518_s29 + $0x38] sm:$0xff] %v1211_v50  ;;  %v1173_v14 = vmul.f32 %v1634_v46, %v1474_v53  ;;  %v1477_v44 = vadd.f32 %v1476_v1, %v1475_v51 }
 0x2cb   : > { %v1196_v22 = vadd.f32 %v2510_v28, %v1173_v14  ;;  %v1174_v12 = vmul.f32 %v1636_v4, %v1477_v44 }
 0x2cd   : > { %v1212_v21 = vmax.f32 %v1196_v22, 0.0  ;;  %v1197_v42 = vadd.f32 %v2510_v28, %v1174_v12  ;;  %v1478_v32 = vpop.f32.mrb[20].mxu1 }
 0x2ce   : > { %v1479_v0 = vpop.f32.mrb[21].mxu1 }
 0x2cf   : > { %1228 = vst [vmem:[%s2518_s29 + $0x40] sm:$0xff] %v1212_v21  ;;  %v1213_v59 = vmax.f32 %v1197_v42, 0.0  ;;  %v1480_v15 = vadd.f32 %v1479_v0, %v1478_v32  ;;  %v1481_v10 = vpop.f32.mrb[22].mxu1 }
 0x2d0   : > { %v1482_v47 = vpop.f32.mrb[23].mxu1 }
 0x2d1   : > { %1229 = vst [vmem:[%s2518_s29 + $0x48] sm:$0xff] %v1213_v59  ;;  %v1175_v36 = vmul.f32 %v1638_v52, %v1480_v15  ;;  %v1483_v56 = vadd.f32 %v1482_v47, %v1481_v10 }
 0x2d3   : > { %v1198_v18 = vadd.f32 %v2510_v28, %v1175_v36  ;;  %v1176_v24 = vmul.f32 %v1640_v35, %v1483_v56 }
 0x2d5   : > { %v1214_v49 = vmax.f32 %v1198_v18, 0.0  ;;  %v1199_v55 = vadd.f32 %v2510_v28, %v1176_v24  ;;  %v1484_v2 = vpop.f32.mrb[24].mxu1 }
 0x2d6   : > { %v1485_v37 = vpop.f32.mrb[25].mxu1 }
 0x2d7   : > { %1230 = vst [vmem:[%s2518_s29 + $0x50] sm:$0xff] %v1214_v49  ;;  %v1215_v54 = vmax.f32 %v1199_v55, 0.0  ;;  %v1486_v30 = vadd.f32 %v1485_v37, %v1484_v2  ;;  %v1487_v27 = vpop.f32.mrb[26].mxu1 }
 0x2d8   : > { %v1488_v25 = vpop.f32.mrb[27].mxu1 }
 0x2d9   : > { %1231 = vst [vmem:[%s2518_s29 + $0x58] sm:$0xff] %v1215_v54  ;;  %v1177_v13 = vmul.f32 %v1642_v40, %v1486_v30  ;;  %v1489_v39 = vadd.f32 %v1488_v25, %v1487_v27 }
 0x2db   : > { %v1200_v3 = vadd.f32 %v2510_v28, %v1177_v13  ;;  %v1178_v20 = vmul.f32 %v1644_v34, %v1489_v39 }
 0x2dd   : > { %v1216_v58 = vmax.f32 %v1200_v3, 0.0  ;;  %v1201_v61 = vadd.f32 %v2510_v28, %v1178_v20  ;;  %v1490_v23 = vpop.f32.mrb[28].mxu1 }
 0x2de   : > { %v1491_v33 = vpop.f32.mrb[29].mxu1 }
 0x2df   : > { %1232 = vst [vmem:[%s2518_s29 + $0x60] sm:$0xff] %v1216_v58  ;;  %v1217_v45 = vmax.f32 %v1201_v61, 0.0  ;;  %v1492_v26 = vadd.f32 %v1491_v33, %v1490_v23  ;;  %v1493_v63 = vpop.f32.mrb[30].mxu1 }
 0x2e0   : > { %v1494_v43 = vpop.f32.mrb[31].mxu1 }
 0x2e1   : > { %1233 = vst [vmem:[%s2518_s29 + $0x68] sm:$0xff] %v1217_v45  ;;  %v1179_v7 = vmul.f32 %v1646_v38, %v1492_v26  ;;  %v1495_v16 = vadd.f32 %v1494_v43, %v1493_v63 }
 0x2e3   : > { %v1202_v6 = vadd.f32 %v2510_v28, %v1179_v7  ;;  %v1180_v9 = vmul.f32 %v1648_v41, %v1495_v16 }
 0x2e5   : > { %v1218_v31 = vmax.f32 %v1202_v6, 0.0  ;;  %v1203_v60 = vadd.f32 %v2510_v28, %v1180_v9 }
 0x2e7   : > { %1234 = vst [vmem:[%s2518_s29 + $0x70] sm:$0xff] %v1218_v31  ;;  %v1219_v62 = vmax.f32 %v1203_v60, 0.0 }
 0x2e9   : > { %1235 = vst [vmem:[%s2518_s29 + $0x78] sm:$0xff] %v1219_v62 }
 0x2ea PF: > { %s16_s23 = sadd.s32 1, %s1671_s23   ;;  %s2649_s21 = smov %s1667_s22 }
 0x2eb   : > { %p13_p5 = scmp.ge.s32.totalorder %s16_s23, 4   ;;  %s2650_s22 = smov %s2652_s24 }
 0x2ed   :  { %15 = sbr.rel (!%p13_p5) target bundleno = 2 (0x2), region = 89 }

// kernel: gat_classifier_forward.9
= control target key start
LH: loop header
LB: loop body
LE: loop exit
PB: predicated region body
PF: predicated region fallthrough
CT: control target
= control target key end

     0   :  { %s760_s18 = smov 0   ;;  %s922_s0 = inlined_call_operand.vmem [shape: f32[256,128], index: 0, kind: input, shape index: {}]   ;;  %s923_s1 = inlined_call_operand.vmem [shape: f32[128,128], index: 1, kind: input, shape index: {}]   ;;  %s924_s2 = inlined_call_operand.vmem [shape: f32[1,128], index: 2, kind: input, shape index: {}]   ;;  %s925_s3 = inlined_call_operand.vmem [shape: f32[128,128], index: 3, kind: input, shape index: {}]   ;;  %s926_s4 = inlined_call_operand.vmem [shape: f32[1,128], index: 4, kind: input, shape index: {}]   ;;  %s927_s5 = inlined_call_operand.vmem [shape: f32[256,128], index: 5, kind: output, shape index: {}]  }
   0x1 LB: > { %s605_s19 = sadd.s32 4294967295, %s728_s18   ;;  %p609_p0 = scmp.ge.s32.totalorder %s728_s18, 1  ;;  %s728_s18 = sphi %s760_s18, %s15_s18  }
   0x2   : > { %p188_p1 = scmp.lt.s32.totalorder %s728_s18, 3 }
   0x4   : > { %p189_p2 = pnand %p609_p0, %p188_p1 }
   0x5   : > { %v253_v0 = vld [vmem:[%s923_s1] sm:$0xff] (!%p189_p2)  ;;  %v254_v1 = vld [vmem:[%s923_s1 + $0x8] sm:$0xff] (!%p189_p2)  ;;  %v255_v2 = vld [vmem:[%s923_s1 + $0x10] sm:$0xff] (!%p189_p2)  ;;  %s610_s26 = sshll.u32 (!%p189_p2), %s605_s19, 4 }
   0x6   : > { %192 = sbr.rel (%p189_p2) target bundleno = 504 (0x1f8), region = 40  ;;  %v269_v3 = vpack.c.bf16 (!%p189_p2), %v254_v1, %v253_v0  ;;  %v256_v4 = vld [vmem:[%s923_s1 + $0x18] sm:$0xff] (!%p189_p2)  ;;  %p217_p3 = scmp.lt.s32.totalorder (!%p189_p2), %s610_s26, 31  ;;  %v257_v6 = vld [vmem:[%s923_s1 + $0x20] sm:$0xff] (!%p189_p2)  ;;  %v258_v7 = vld [vmem:[%s923_s1 + $0x28] sm:$0xff] (!%p189_p2) }
   0x7   : > { %v270_v5 = vpack.c.bf16 (!%p189_p2), %v256_v4, %v255_v2  ;;  %v271_v8 = vpack.c.bf16 (!%p189_p2), %v258_v7, %v257_v6  ;;  %v259_v9 = vld [vmem:[%s923_s1 + $0x30] sm:$0xff] (!%p189_p2)  ;;  %v405_v10 = vld [vmem:[%s925_s3] sm:$0xff] (!%p189_p2)  ;;  %v406_v11 = vld [vmem:[%s925_s3 + $0x8] sm:$0xff] (!%p189_p2) }
   0x8   : > { %650 = vmatprep.subr.bf16.mxu0 (!%p189_p2), %v269_v3  ;;  %v260_v12 = vld [vmem:[%s923_s1 + $0x38] sm:$0xff] (!%p189_p2)  ;;  %v421_v13 = vpack.c.bf16 (!%p189_p2), %v406_v11, %v405_v10  ;;  %v407_v14 = vld [vmem:[%s925_s3 + $0x10] sm:$0xff] (!%p189_p2)  ;;  %v261_v21 = vld [vmem:[%s923_s1 + $0x40] sm:$0xff] (!%p189_p2) }
   0x9   : > { %651 = vmatpush3.bf16.msra.mxu0 (!%p189_p2), %v269_v3  ;;  %v408_v15 = vld [vmem:[%s925_s3 + $0x18] sm:$0xff] (!%p189_p2)  ;;  %v272_v20 = vpack.c.bf16 (!%p189_p2), %v260_v12, %v259_v9  ;;  %v262_v22 = vld [vmem:[%s923_s1 + $0x48] sm:$0xff] (!%p189_p2)  ;;  %v409_v23 = vld [vmem:[%s925_s3 + $0x20] sm:$0xff] (!%p189_p2) }
   0xa   : > { %652 = vmatprep.subr.bf16.mxu0 (!%p189_p2), %v270_v5  ;;  %v422_v18 = vpack.c.bf16 (!%p189_p2), %v408_v15, %v407_v14  ;;  %682 = vmatprep.subr.bf16.mxu1 (!%p189_p2), %v421_v13  ;;  %v410_v24 = vld [vmem:[%s925_s3 + $0x28] sm:$0xff] (!%p189_p2)  ;;  %v411_v25 = vld [vmem:[%s925_s3 + $0x30] sm:$0xff] (!%p189_p2)  ;;  %v273_v26 = vpack.c.bf16 (!%p189_p2), %v262_v22, %v261_v21  ;;  %v412_v28 = vld [vmem:[%s925_s3 + $0x38] sm:$0xff] (!%p189_p2) }
   0xb   : > { %683 = vmatpush3.bf16.msra.mxu1 (!%p189_p2), %v421_v13  ;;  %v423_v27 = vpack.c.bf16 (!%p189_p2), %v410_v24, %v409_v23  ;;  %v263_v29 = vld [vmem:[%s923_s1 + $0x50] sm:$0xff] (!%p189_p2)  ;;  %v264_v30 = vld [vmem:[%s923_s1 + $0x58] sm:$0xff] (!%p189_p2)  ;;  %v424_v31 = vpack.c.bf16 (!%p189_p2), %v412_v28, %v411_v25  ;;  %v413_v32 = vld [vmem:[%s925_s3 + $0x40] sm:$0xff] (!%p189_p2) }
   0xc   : > { %684 = vmatprep.subr.bf16.mxu1 (!%p189_p2), %v422_v18  ;;  %v414_v33 = vld [vmem:[%s925_s3 + $0x48] sm:$0xff] (!%p189_p2)  ;;  %v274_v34 = vpack.c.bf16 (!%p189_p2), %v264_v30, %v263_v29  ;;  %v265_v35 = vld [vmem:[%s923_s1 + $0x60] sm:$0xff] (!%p189_p2)  ;;  %v415_v38 = vld [vmem:[%s925_s3 + $0x50] sm:$0xff] (!%p189_p2) }
   0xd   : > { %s929_s26 = smov (!%p217_p3, %s610_s26), 31  ;;  %653 = vmatpush3.bf16.msra.mxu0 %v270_v5  ;;  %v266_v36 = vld [vmem:[%s923_s1 + $0x68] sm:$0xff]  ;;  %v425_v37 = vpack.c.bf16 %v414_v33, %v413_v32  ;;  %v416_v39 = vld [vmem:[%s925_s3 + $0x58] sm:$0xff]  ;;  %v267_v41 = vld [vmem:[%s923_s1 + $0x70] sm:$0xff] }
   0xe   : > { %s611_s10 = sshll.u32 %s929_s26, 3  ;;  %654 = vmatprep.subr.bf16.mxu0 %v271_v8  ;;  %v275_v40 = vpack.c.bf16 %v266_v36, %v265_v35  ;;  %v268_v42 = vld [vmem:[%s923_s1 + $0x78] sm:$0xff]  ;;  %v426_v43 = vpack.c.bf16 %v416_v39, %v415_v38  ;;  %v417_v2 = vld [vmem:[%s925_s3 + $0x60] sm:$0xff]  ;;  %v418_v3 = vld [vmem:[%s925_s3 + $0x68] sm:$0xff] }
   0xf   : > { %s806_s20 = scalar_lea.vmem %s922_s0, %s611_s10  ;;  %685 = vmatpush3.bf16.msra.mxu1 %v422_v18  ;;  %v276_v44 = vpack.c.bf16 %v268_v42, %v267_v41  ;;  %v427_v4 = vpack.c.bf16 %v418_v3, %v417_v2  ;;  %v419_v5 = vld [vmem:[%s925_s3 + $0x70] sm:$0xff]  ;;  %v420_v6 = vld [vmem:[%s925_s3 + $0x78] sm:$0xff]  ;;  %s901_s29 = scalar_lea.vmem %s927_s5, %s611_s10 }
  0x10   : > { %v229_v16 = vld [vmem:[%s806_s20] sm:$0xff]  ;;  %v230_v17 = vld [vmem:[%s806_s20 + $0x8] sm:$0xff]  ;;  %686 = vmatprep.subr.bf16.mxu1 %v423_v27  ;;  %v231_v45 = vld [vmem:[%s806_s20 + $0x10] sm:$0xff]  ;;  %v428_v7 = vpack.c.bf16 %v420_v6, %v419_v5 }
  0x11   : > { %v245_v19 = vpack.c.bf16 %v230_v17, %v229_v16  ;;  %655 = vmatpush3.bf16.msra.mxu0 %v271_v8  ;;  %v232_v46 = vld [vmem:[%s806_s20 + $0x18] sm:$0xff]  ;;  %v233_v47 = vld [vmem:[%s806_s20 + $0x20] sm:$0xff]  ;;  %v234_v48 = vld [vmem:[%s806_s20 + $0x28] sm:$0xff] }
  0x12   : > { %656 = vmatprep.subr.bf16.mxu0 %v272_v20  ;;  %v246_v49 = vpack.c.bf16 %v232_v46, %v231_v45  ;;  %v247_v50 = vpack.c.bf16 %v234_v48, %v233_v47  ;;  %v235_v51 = vld [vmem:[%s806_s20 + $0x30] sm:$0xff]  ;;  %v236_v52 = vld [vmem:[%s806_s20 + $0x38] sm:$0xff]  ;;  %v237_v53 = vld [vmem:[%s806_s20 + $0x40] sm:$0xff] }
  0x13   : > { %666 = vmatprep.mubr.bf16.mxu0 %v245_v19  ;;  %687 = vmatpush3.bf16.msra.mxu1 %v423_v27  ;;  %v238_v54 = vld [vmem:[%s806_s20 + $0x48] sm:$0xff]  ;;  %v248_v55 = vpack.c.bf16 %v236_v52, %v235_v51  ;;  %v239_v57 = vld [vmem:[%s806_s20 + $0x50] sm:$0xff]  ;;  %v240_v58 = vld [vmem:[%s806_s20 + $0x58] sm:$0xff] }
  0x14   : > { %688 = vmatprep.subr.bf16.mxu1 %v424_v31  ;;  %v249_v56 = vpack.c.bf16 %v238_v54, %v237_v53  ;;  %v241_v59 = vld [vmem:[%s806_s20 + $0x60] sm:$0xff]  ;;  %v242_v60 = vld [vmem:[%s806_s20 + $0x68] sm:$0xff]  ;;  %v250_v61 = vpack.c.bf16 %v240_v58, %v239_v57  ;;  %v243_v63 = vld [vmem:[%s806_s20 + $0x70] sm:$0xff] }
  0x15   : > { %657 = vmatpush3.bf16.msra.mxu0 %v272_v20  ;;  %v251_v62 = vpack.c.bf16 %v242_v60, %v241_v59  ;;  %v244_v0 = vld [vmem:[%s806_s20 + $0x78] sm:$0xff]  ;;  %v614_v8 = vld [vmem:[%s924_s2] ss:$0 sm:$0xff] }
  0x16   : > { %658 = vmatprep.subr.bf16.mxu0 %v273_v26  ;;  %v252_v1 = vpack.c.bf16 %v244_v0, %v243_v63 }
  0x17   : > { %689 = vmatpush3.bf16.msra.mxu1 %v424_v31 }
  0x18   : > { %690 = vmatprep.subr.bf16.mxu1 %v425_v37 }
  0x19   : > { %659 = vmatpush3.bf16.msra.mxu0 %v273_v26 }
  0x1a   : > { %660 = vmatprep.subr.bf16.mxu0 %v274_v34 }
  0x1b   : > { %691 = vmatpush3.bf16.msra.mxu1 %v425_v37 }
  0x1c   : > { %692 = vmatprep.subr.bf16.mxu1 %v426_v43 }
  0x1d   : > { %661 = vmatpush3.bf16.msra.mxu0 %v274_v34 }
  0x1e   : > { %662 = vmatprep.subr.bf16.mxu0 %v275_v40 }
  0x1f   : > { %693 = vmatpush3.bf16.msra.mxu1 %v426_v43 }
  0x20   : > { %694 = vmatprep.subr.bf16.mxu1 %v427_v4 }
  0x21   : > { %663 = vmatpush3.bf16.msra.mxu0 %v275_v40 }
  0x22   : > { %664 = vmatprep.subr.bf16.mxu0 %v276_v44 }
  0x23   : > { %695 = vmatpush3.bf16.msra.mxu1 %v427_v4 }
  0x24   : > { %696 = vmatprep.subr.bf16.mxu1 %v428_v7 }
  0x25   : > { %665 = vmatpush3.bf16.msra.mxu0 %v276_v44 }
  0x27   : > { %697 = vmatpush3.bf16.msra.mxu1 %v428_v7 }
  0x28   : > { %667 = vmatmul.mubr.bf16.vlgmr.msra.gmra.mrb[0].mxu0 %v246_v49 }
  0x29   : > { %670 = vmatprep.mubr.bf16.mxu0 %v247_v50 }
  0x30   : > { %671 = vmatmul.mubr.bf16.gmra.mrb[4].mxu0 %v248_v55 }
  0x31   : > { %674 = vmatprep.mubr.bf16.mxu0 %v249_v56 }
  0x38   : > { %675 = vmatmul.mubr.bf16.gmra.mrb[8].mxu0 %v250_v61 }
  0x39   : > { %678 = vmatprep.mubr.bf16.mxu0 %v251_v62 }
  0x40   : > { %679 = vmatmul.mubr.bf16.gmra.mrb[12].mxu0 %v252_v1  ;;  %v615_v1 = vld [vmem:[%s926_s4] ss:$0 sm:$0xff] }
  0xfb   : > { %v668_v9 = vpop.f32.mrb[0].mxu0 }
  0xfc   : > { %v327_v10 = vadd.f32 %v668_v9, %v614_v8  ;;  %v318_v11 = vpop.f32.mrb[1].mxu0 }
  0xfd   : > { %v319_v12 = vadd.f32 %v614_v8, %v318_v11  ;;  %v669_v13 = vpop.f32.mrb[2].mxu0 }
  0xfe   : > { %v330_v14 = vadd.f32 %v669_v13, %v614_v8  ;;  %v321_v15 = vpop.f32.mrb[3].mxu0  ;;  %v383_v17 = vmax.f32 %v327_v10, 0.0 }
  0xff   : > { %v322_v16 = vadd.f32 %v614_v8, %v321_v15  ;;  %v381_v19 = vmax.f32 %v319_v12, 0.0 }
 0x100   : > { %v384_v18 = vmax.f32 %v330_v14, 0.0 }
 0x101   : > { %v382_v20 = vmax.f32 %v322_v16, 0.0 }
 0x102   : > { %v398_v21 = vpack.c.bf16 %v384_v18, %v383_v17 }
 0x103   : > { %v672_v22 = vpop.f32.mrb[4].mxu0  ;;  %v397_v23 = vpack.c.bf16 %v382_v20, %v381_v19 }
 0x104   : > { %v343_v24 = vadd.f32 %v672_v22, %v614_v8  ;;  %v334_v25 = vpop.f32.mrb[5].mxu0 }
 0x105   : > { %v335_v26 = vadd.f32 %v614_v8, %v334_v25  ;;  %v673_v27 = vpop.f32.mrb[6].mxu0  ;;  %698 = vmatprep.mubr.bf16.mxu1 %v397_v23 }
 0x106   : > { %v346_v28 = vadd.f32 %v673_v27, %v614_v8  ;;  %v337_v29 = vpop.f32.mrb[7].mxu0  ;;  %699 = vmatmul.mubr.bf16.vlgmr.msra.gmra.mrb[0].mxu1 %v398_v21  ;;  %v387_v31 = vmax.f32 %v343_v24, 0.0 }
 0x107   : > { %v338_v30 = vadd.f32 %v614_v8, %v337_v29  ;;  %v385_v33 = vmax.f32 %v335_v26, 0.0 }
 0x108   : > { %v388_v32 = vmax.f32 %v346_v28, 0.0 }
 0x109   : > { %v386_v34 = vmax.f32 %v338_v30, 0.0 }
 0x10a   : > { %v400_v35 = vpack.c.bf16 %v388_v32, %v387_v31 }
 0x10b   : > { %v399_v36 = vpack.c.bf16 %v386_v34, %v385_v33  ;;  %v676_v37 = vpop.f32.mrb[8].mxu0 }
 0x10c   : > { %v359_v38 = vadd.f32 %v676_v37, %v614_v8  ;;  %v350_v39 = vpop.f32.mrb[9].mxu0 }
 0x10d   : > { %v351_v40 = vadd.f32 %v614_v8, %v350_v39  ;;  %v677_v41 = vpop.f32.mrb[10].mxu0  ;;  %702 = vmatprep.mubr.bf16.mxu1 %v399_v36 }
 0x10e   : > { %v362_v42 = vadd.f32 %v677_v41, %v614_v8  ;;  %v353_v43 = vpop.f32.mrb[11].mxu0  ;;  %703 = vmatmul.mubr.bf16.gmra.mrb[4].mxu1 %v400_v35  ;;  %v391_v45 = vmax.f32 %v359_v38, 0.0 }
 0x10f   : > { %v354_v44 = vadd.f32 %v614_v8, %v353_v43  ;;  %v389_v47 = vmax.f32 %v351_v40, 0.0 }
 0x110   : > { %v392_v46 = vmax.f32 %v362_v42, 0.0 }
 0x111   : > { %v390_v48 = vmax.f32 %v354_v44, 0.0 }
 0x112   : > { %v402_v49 = vpack.c.bf16 %v392_v46, %v391_v45 }
 0x113   : > { %v401_v50 = vpack.c.bf16 %v390_v48, %v389_v47  ;;  %v680_v51 = vpop.f32.mrb[12].mxu0 }
 0x114   : > { %v375_v52 = vadd.f32 %v680_v51, %v614_v8  ;;  %v366_v53 = vpop.f32.mrb[13].mxu0 }
 0x115   : > { %v367_v54 = vadd.f32 %v614_v8, %v366_v53  ;;  %v681_v55 = vpop.f32.mrb[14].mxu0  ;;  %706 = vmatprep.mubr.bf16.mxu1 %v401_v50 }
 0x116   : > { %v378_v56 = vadd.f32 %v681_v55, %v614_v8  ;;  %v369_v57 = vpop.f32.mrb[15].mxu0  ;;  %707 = vmatmul.mubr.bf16.gmra.mrb[8].mxu1 %v402_v49  ;;  %v395_v59 = vmax.f32 %v375_v52, 0.0 }
 0x117   : > { %v370_v58 = vadd.f32 %v614_v8, %v369_v57  ;;  %v393_v61 = vmax.f32 %v367_v54, 0.0 }
 0x118   : > { %v396_v60 = vmax.f32 %v378_v56, 0.0 }
 0x119   : > { %v394_v62 = vmax.f32 %v370_v58, 0.0 }
 0x11a   : > { %v404_v63 = vpack.c.bf16 %v396_v60, %v395_v59 }
 0x11b   : > { %v403_v0 = vpack.c.bf16 %v394_v62, %v393_v61 }
 0x11d   : > { %710 = vmatprep.mubr.bf16.mxu1 %v403_v0 }
 0x11e   : > { %711 = vmatmul.mubr.bf16.gmra.mrb[12].mxu1 %v404_v63 }
 0x1d9   : > { %v700_v2 = vpop.f32.mrb[0].mxu1 }
 0x1da   : > { %v479_v3 = vadd.f32 %v700_v2, %v615_v1  ;;  %v470_v4 = vpop.f32.mrb[1].mxu1 }
 0x1db   : > { %v471_v5 = vadd.f32 %v615_v1, %v470_v4  ;;  %v701_v6 = vpop.f32.mrb[2].mxu1 }
 0x1dc   : > { %535 = vst [vmem:[%s901_s29 + $0x10] sm:$0xff] %v479_v3  ;;  %v482_v7 = vadd.f32 %v701_v6, %v615_v1  ;;  %v473_v8 = vpop.f32.mrb[3].mxu1 }
 0x1dd   : > { %533 = vst [vmem:[%s901_s29] sm:$0xff] %v471_v5  ;;  %v474_v9 = vadd.f32 %v615_v1, %v473_v8 }
 0x1de   : > { %536 = vst [vmem:[%s901_s29 + $0x18] sm:$0xff] %v482_v7 }
 0x1df   : > { %534 = vst [vmem:[%s901_s29 + $0x8] sm:$0xff] %v474_v9 }
 0x1e1   : > { %v704_v10 = vpop.f32.mrb[4].mxu1 }
 0x1e2   : > { %v495_v11 = vadd.f32 %v704_v10, %v615_v1  ;;  %v486_v12 = vpop.f32.mrb[5].mxu1 }
 0x1e3   : > { %v487_v13 = vadd.f32 %v615_v1, %v486_v12  ;;  %v705_v14 = vpop.f32.mrb[6].mxu1 }
 0x1e4   : > { %539 = vst [vmem:[%s901_s29 + $0x30] sm:$0xff] %v495_v11  ;;  %v498_v15 = vadd.f32 %v705_v14, %v615_v1  ;;  %v489_v16 = vpop.f32.mrb[7].mxu1 }
 0x1e5   : > { %537 = vst [vmem:[%s901_s29 + $0x20] sm:$0xff] %v487_v13  ;;  %v490_v17 = vadd.f32 %v615_v1, %v489_v16 }
 0x1e6   : > { %540 = vst [vmem:[%s901_s29 + $0x38] sm:$0xff] %v498_v15 }
 0x1e7   : > { %538 = vst [vmem:[%s901_s29 + $0x28] sm:$0xff] %v490_v17 }
 0x1e9   : > { %v708_v18 = vpop.f32.mrb[8].mxu1 }
 0x1ea   : > { %v511_v19 = vadd.f32 %v708_v18, %v615_v1  ;;  %v502_v20 = vpop.f32.mrb[9].mxu1 }
 0x1eb   : > { %v503_v21 = vadd.f32 %v615_v1, %v502_v20  ;;  %v709_v22 = vpop.f32.mrb[10].mxu1 }
 0x1ec   : > { %543 = vst [vmem:[%s901_s29 + $0x50] sm:$0xff] %v511_v19  ;;  %v514_v23 = vadd.f32 %v709_v22, %v615_v1  ;;  %v505_v24 = vpop.f32.mrb[11].mxu1 }
 0x1ed   : > { %541 = vst [vmem:[%s901_s29 + $0x40] sm:$0xff] %v503_v21  ;;  %v506_v25 = vadd.f32 %v615_v1, %v505_v24 }
 0x1ee   : > { %544 = vst [vmem:[%s901_s29 + $0x58] sm:$0xff] %v514_v23 }
 0x1ef   : > { %542 = vst [vmem:[%s901_s29 + $0x48] sm:$0xff] %v506_v25 }
 0x1f1   : > { %v712_v26 = vpop.f32.mrb[12].mxu1 }
 0x1f2   : > { %v527_v27 = vadd.f32 %v712_v26, %v615_v1  ;;  %v518_v28 = vpop.f32.mrb[13].mxu1 }
 0x1f3   : > { %v519_v29 = vadd.f32 %v615_v1, %v518_v28  ;;  %v713_v30 = vpop.f32.mrb[14].mxu1 }
 0x1f4   : > { %547 = vst [vmem:[%s901_s29 + $0x70] sm:$0xff] %v527_v27  ;;  %v530_v31 = vadd.f32 %v713_v30, %v615_v1  ;;  %v521_v32 = vpop.f32.mrb[15].mxu1 }
 0x1f5   : > { %545 = vst [vmem:[%s901_s29 + $0x60] sm:$0xff] %v519_v29  ;;  %v522_v33 = vadd.f32 %v615_v1, %v521_v32 }
 0x1f6   : > { %548 = vst [vmem:[%s901_s29 + $0x78] sm:$0xff] %v530_v31 }
 0x1f7   : > { %546 = vst [vmem:[%s901_s29 + $0x68] sm:$0xff] %v522_v33 }
 0x1f8 PF: > { %s15_s18 = sadd.s32 1, %s728_s18  }
 0x1f9   : > { %p12_p4 = scmp.ge.s32.totalorder %s15_s18, 4  }
 0x1fb   :  { %14 = sbr.rel (!%p12_p4) target bundleno = 1 (0x1), region = 70 }

</bundles_post_ra>
